<compile_context>
chip_gen: v7x
topology: tpu7x:2x2x1
jax: 0.10.0
libtpu: 0.0.40
codegen_flags: <defaults>
</compile_context>

<pallas_src>
import functools

import jax
import jax.numpy as jnp
import numpy as np
from jax import lax
from jax.experimental import pallas as pl
from jax.experimental.pallas import tpu as pltpu

COORDS_WEIGHT = 1.0
TILE_E = 512          # review item 1: sweep 256-1024; 512 is the tuned default


def e_gcl_kernel(
    # packed edge-index tile: [2, TILE_E] int32 (row 0 = source, row 1 = target)
    idx_ref,
    # node inputs (full blocks, resident across the edge grid)
    h_ref, coord_ref, counts_ref,
    # edge_mlp layer 1 (split: h-part, h_col-part, radial column, bias) [f32]
    we1a_ref, we1b_ref, we1r_ref, be1_ref,
    # edge_mlp layer 2 [bf16 weight, f32 bias]
    we2_ref, be2_ref,
    # coord_mlp: Linear+ReLU, Linear(H,1,no bias) [bf16 weights, f32 bias]
    wc1_ref, bc1_ref, wc2_ref,
    # node_mlp layer 1 (split: h-part, agg-part, bias) and layer 2 [f32]
    wn1a_ref, wn1b_ref, bn1_ref, wn2_ref, bn2_ref,
    # outputs
    h_out_ref, coord_out_ref,
    # VMEM scratch (persist across grid steps)
    acc_ref,        # [N, H+3] f32   : [sum edge_feat | sum trans]
    gsrc_ref,       # [N, H+3] bf16  : [h@We1a |  coord]
    gdst_ref,       # [N, H+3] bf16  : [h@We1b | -coord]
    iota_ref,       # [N, TILE_E] int32, built once (hoisted out of the loop)
):
    t = pl.program_id(0)
    n_tiles = pl.num_programs(0)
    H = be1_ref.shape[1]
    f32 = jnp.float32
    bf16 = jnp.bfloat16
    dot = functools.partial(jnp.dot, preferred_element_type=f32)

    # gather through a [N, TILE_E] one-hot: (sel^T @ x)[e] == x[idx[e]]
    def gathr(sel, x):
        return lax.dot_general(sel, x, (((0,), (0,)), ((), ())),
                               preferred_element_type=f32)

    @pl.when(t == 0)
    def _init():
        acc_ref[...] = jnp.zeros_like(acc_ref)
        iota_ref[...] = lax.broadcasted_iota(jnp.int32, iota_ref.shape, 0)
        coord = coord_ref[...]
        # First edge-MLP layer projected once per node (not once per edge),
        # with the coordinate columns fused alongside.  gdst carries -coord so
        # one add of the two gathers yields both hwa[row] + hwb[col] and
        # coord[row] - coord[col].
        hwa = dot(h_ref[...], we1a_ref[...])
        hwb = dot(h_ref[...], we1b_ref[...])
        gsrc_ref[...] = jnp.concatenate([hwa, coord], axis=1).astype(bf16)
        gdst_ref[...] = jnp.concatenate([hwb, -coord], axis=1).astype(bf16)

    row_l = idx_ref[0:1, :]                       # [1, TILE_E] int32
    col_l = idx_ref[1:2, :]
    iota_n = iota_ref[...]
    # 0/1 selection matrices are exact in bf16 -> native bf16 MXU path.
    sel_r = (iota_n == row_l).astype(f32).astype(bf16)    # [N, TILE_E]
    sel_c = (iota_n == col_l).astype(f32).astype(bf16)

    # ---- fused gathers: one (H+3)-wide gather per endpoint -----------------
    g = gathr(sel_r, gsrc_ref[...]) + gathr(sel_c, gdst_ref[...])  # [TILE_E, H+3]
    z1_pre = g[:, :H]                       # hwa[row] + hwb[col]
    coord_diff = g[:, H:]                   # coord[row] - coord[col]
    radial = jnp.sum(coord_diff * coord_diff, axis=1, keepdims=True)

    # ---- edge_model (attention=False): 2 x (Linear + ReLU) -----------------
    e1 = jnp.maximum(z1_pre + radial * we1r_ref[...] + be1_ref[...], 0.0)
    edge_feat = jnp.maximum(dot(e1.astype(bf16), we2_ref[...]) + be2_ref[...], 0.0)
    ef_bf = edge_feat.astype(bf16)

    # ---- coord_model (per-edge part) ----------------------------------------
    c1 = jnp.maximum(dot(ef_bf, wc1_ref[...]) + bc1_ref[...], 0.0)
    coff = dot(c1.astype(bf16), wc2_ref[...])                   # [TILE_E, 1]
    trans = jnp.clip(coord_diff * coff, -100.0, 100.0)

    # ---- fused scatter-add: single one-hot MXU matmul into [N, H+3] ---------
    y = jnp.concatenate([ef_bf, trans.astype(bf16)], axis=1)    # [TILE_E, H+3]
    acc_ref[...] += dot(sel_r, y)

    # ---- epilogue: node-side updates on the last edge tile ------------------
    @pl.when(t == n_tiles - 1)
    def _finish():
        h = h_ref[...]
        agg_edge = acc_ref[:, :H]
        agg_mean = acc_ref[:, H:] / jnp.maximum(counts_ref[...], 1.0)
        coord_out_ref[...] = coord_ref[...] + agg_mean * COORDS_WEIGHT
        n1 = jnp.maximum(dot(h, wn1a_ref[...]) + dot(agg_edge, wn1b_ref[...])
                         + bn1_ref[...], 0.0)
        h_out_ref[...] = h + dot(n1, wn2_ref[...]) + bn2_ref[...]   # recurrent


def e_gcl_pallas(h, coord, row, col, params, tile_e=TILE_E):
    N, F = h.shape
    H = params["be1"].shape[1]
    O = params["bn2"].shape[1]
    E = int(row.shape[0])
    n_tiles = max(1, pl.cdiv(E, tile_e))
    e_pad = n_tiles * tile_e

    row = row.astype(jnp.int32)
    col = col.astype(jnp.int32)
    if e_pad > E:
        fill = jnp.full((e_pad - E,), N, jnp.int32)   # out-of-range => no-op edges
        row_p = jnp.concatenate([row, fill])
        col_p = jnp.concatenate([col, fill])
    else:
        row_p, col_p = row, col
    idx = jnp.stack([row_p, col_p])                   # [2, E_pad]: one DMA per tile

    # node degrees (w.r.t. `row`) precomputed outside the kernel
    counts = jax.ops.segment_sum(jnp.ones((E, 1), jnp.float32), row,
                                 num_segments=N)

    bf16 = jnp.bfloat16
    we1, wn1 = params["we1"], params["wn1"]
    weights = [
        we1[:F], we1[F:2 * F], we1[2 * F:2 * F + 1], params["be1"],
        params["we2"].astype(bf16), params["be2"],
        params["wc1"].astype(bf16), params["bc1"], params["wc2"].astype(bf16),
        wn1[:F], wn1[F:], params["bn1"],
        params["wn2"], params["bn2"],
    ]

    idx_spec = pl.BlockSpec((2, tile_e), lambda t: (0, t))

    def full_spec(a):
        # Grid-invariant block: stays VMEM-resident across all edge tiles.
        # TODO(synk): pipeline_mode=pl.Buffered(1) would drop the second buffer
        #             for these invariant blocks; unnecessary at these sizes.
        return pl.BlockSpec(a.shape, lambda t: (0, 0))

    node_inputs = [h, coord, counts]
    in_specs = ([idx_spec]
                + [full_spec(a) for a in node_inputs]
                + [full_spec(w) for w in weights])

    flops = int(n_tiles * (6 * N * tile_e * (H + 3)
                           + 4 * tile_e * H * H + 2 * tile_e * H)
                + 2 * N * (3 * F * H + H * H + H * O))
    bytes_acc = int(4 * (idx.size + h.size + coord.size + counts.size
                         + N * O + N * 3)
                    + sum(int(w.size) * w.dtype.itemsize for w in weights))

    return pl.pallas_call(
        e_gcl_kernel,
        grid=(n_tiles,),
        in_specs=in_specs,
        out_specs=(pl.BlockSpec((N, O), lambda t: (0, 0)),
                   pl.BlockSpec((N, 3), lambda t: (0, 0))),
        out_shape=(jax.ShapeDtypeStruct((N, O), jnp.float32),
                   jax.ShapeDtypeStruct((N, 3), jnp.float32)),
        scratch_shapes=[pltpu.VMEM((N, H + 3), jnp.float32),    # acc
                        pltpu.VMEM((N, H + 3), jnp.bfloat16),   # gsrc
                        pltpu.VMEM((N, H + 3), jnp.bfloat16),   # gdst
                        pltpu.VMEM((N, tile_e), jnp.int32)],    # iota
        compiler_params=pltpu.CompilerParams(
            dimension_semantics=("arbitrary",),
            # <= ~48 MiB keeps headroom under v7x's 64 MiB physical VMEM while
            # allowing much larger TILE_E / N than the old 32 MiB on v5e/v6e.
            vmem_limit_bytes=48 * 1024 * 1024),
        cost_estimate=pl.CostEstimate(flops=flops, transcendentals=0,
                                      bytes_accessed=bytes_acc),
    )(idx, h, coord, counts, *weights)


# ---------------- pure-JAX reference (mirrors the PyTorch E_GCL) --------------
def e_gcl_reference(h, coord, row, col, p):
    relu = jax.nn.relu
    mm = functools.partial(jnp.matmul, precision=jax.lax.Precision.HIGHEST)
    N = h.shape[0]

    coord_diff = coord[row] - coord[col]
    radial = jnp.sum(coord_diff ** 2, axis=1, keepdims=True)

    edge_in = jnp.concatenate([h[row], h[col], radial], axis=1)
    e = relu(mm(edge_in, p["we1"]) + p["be1"])
    edge_feat = relu(mm(e, p["we2"]) + p["be2"])

    c = relu(mm(edge_feat, p["wc1"]) + p["bc1"])
    coff = mm(c, p["wc2"])
    trans = jnp.clip(coord_diff * coff, -100.0, 100.0)
    seg_sum = jax.ops.segment_sum(trans, row, num_segments=N)
    cnt = jax.ops.segment_sum(jnp.ones_like(trans), row, num_segments=N)
    coord_new = coord + (seg_sum / jnp.maximum(cnt, 1.0)) * COORDS_WEIGHT

    agg = jax.ops.segment_sum(edge_feat, row, num_segments=N)
    node_in = jnp.concatenate([h, agg], axis=1)
    n = relu(mm(node_in, p["wn1"]) + p["bn1"])
    n = mm(n, p["wn2"]) + p["bn2"]
    h_out = h + n                                   # recurrent=True
    return h_out, coord_new


# ---------------- deterministic parameter init --------------------------------
def _linear(key, fan_in, fan_out, bias=True):
    kw, kb = jax.random.split(key)
    bound = 1.0 / float(np.sqrt(fan_in))
    w = jax.random.uniform(kw, (fan_in, fan_out), jnp.float32, -bound, bound)
    if not bias:
        return w, None
    b = jax.random.uniform(kb, (1, fan_out), jnp.float32, -bound, bound)
    return w, b


def init_params(key, input_nf, output_nf, hidden_nf, edges_in_d=0):
    keys = jax.random.split(key, 6)
    p = {}
    # edge_mlp: Linear(2F+1+edges_in_d, H), ReLU, Linear(H, H), ReLU
    p["we1"], p["be1"] = _linear(keys[0], 2 * input_nf + 1 + edges_in_d, hidden_nf)
    p["we2"], p["be2"] = _linear(keys[1], hidden_nf, hidden_nf)
    # coord_mlp: Linear(H, H), ReLU, Linear(H, 1, bias=False) with xavier gain 0.001
    p["wc1"], p["bc1"] = _linear(keys[2], hidden_nf, hidden_nf)
    xav = 0.001 * float(np.sqrt(6.0 / (hidden_nf + 1)))
    p["wc2"] = jax.random.uniform(keys[3], (hidden_nf, 1), jnp.float32, -xav, xav)
    # node_mlp: Linear(F + H, H), ReLU, Linear(H, output_nf)
    p["wn1"], p["bn1"] = _linear(keys[4], hidden_nf + input_nf, hidden_nf)
    p["wn2"], p["bn2"] = _linear(keys[5], hidden_nf, output_nf)
    return p


if __name__ == "__main__":
    # input_nf == output_nf (required by the recurrent residual)
    N, F, H = 8, 32, 32
    key = jax.random.PRNGKey(0)
    k_h, k_c, k_p = jax.random.split(key, 3)

    h = jax.random.normal(k_h, (N, F), jnp.float32)
    coord = jax.random.normal(k_c, (N, 3), jnp.float32)

    # fully connected graph without self loops (standard EGNN usage)
    rows, cols = [], []
    for i in range(N):
        for j in range(N):
            if i != j:
                rows.append(i)
                cols.append(j)
    row = jnp.array(rows, jnp.int32)
    col = jnp.array(cols, jnp.int32)

    params = init_params(k_p, F, F, H)

    h_out, coord_out = e_gcl_pallas(h, coord, row, col, params)
    jax.block_until_ready((h_out, coord_out))

    h_ref, coord_ref = e_gcl_reference(h, coord, row, col, params)
    # Kernel runs the per-edge MXU path with bf16 operands / f32 accumulation
    # (review items for v6e/v7x); reference is f32 HIGHEST precision, so the
    # tolerance is relaxed from 5e-3 to 2e-2 accordingly.
    np.testing.assert_allclose(np.asarray(h_out), np.asarray(h_ref),
                               rtol=2e-2, atol=2e-2)
    np.testing.assert_allclose(np.asarray(coord_out), np.asarray(coord_ref),
                               rtol=2e-2, atol=2e-2)

    print("KERNEL_OK")
</pallas_src>

<mosaic_0001>
module attributes {stable_mosaic.version = 11 : i64} {
  func.func @e_gcl_kernel(%arg0: i32, %arg1: memref<2x512xi32, #tpu.memory_space<vmem>>, %arg2: memref<8x32xf32, #tpu.memory_space<vmem>>, %arg3: memref<8x3xf32, #tpu.memory_space<vmem>>, %arg4: memref<8x1xf32, #tpu.memory_space<vmem>>, %arg5: memref<32x32xf32, #tpu.memory_space<vmem>>, %arg6: memref<32x32xf32, #tpu.memory_space<vmem>>, %arg7: memref<1x32xf32, #tpu.memory_space<vmem>>, %arg8: memref<1x32xf32, #tpu.memory_space<vmem>>, %arg9: memref<32x32xbf16, #tpu.memory_space<vmem>>, %arg10: memref<1x32xf32, #tpu.memory_space<vmem>>, %arg11: memref<32x32xbf16, #tpu.memory_space<vmem>>, %arg12: memref<1x32xf32, #tpu.memory_space<vmem>>, %arg13: memref<32x1xbf16, #tpu.memory_space<vmem>>, %arg14: memref<32x32xf32, #tpu.memory_space<vmem>>, %arg15: memref<32x32xf32, #tpu.memory_space<vmem>>, %arg16: memref<1x32xf32, #tpu.memory_space<vmem>>, %arg17: memref<32x32xf32, #tpu.memory_space<vmem>>, %arg18: memref<1x32xf32, #tpu.memory_space<vmem>>, %arg19: memref<8x32xf32, #tpu.memory_space<vmem>>, %arg20: memref<8x3xf32, #tpu.memory_space<vmem>>, %arg21: memref<8x35xf32, #tpu.memory_space<vmem>>, %arg22: memref<8x35xbf16, #tpu.memory_space<vmem>>, %arg23: memref<8x35xbf16, #tpu.memory_space<vmem>>, %arg24: memref<8x512xi32, #tpu.memory_space<vmem>>) attributes {dimension_semantics = [#tpu.dimension_semantics<arbitrary>], iteration_bounds = array<i64: 1>, scalar_prefetch = 0 : i64, scratch_operands = 4 : i64, tpu.core_type = #tpu.core_type<tc>, window_params = [{transform_indices = @transform_0, window_bounds = array<i64: 2, 512>}, {pipeline_mode = #tpu.pipeline_mode<synchronous>, transform_indices = @transform_1, window_bounds = array<i64: 8, 32>}, {pipeline_mode = #tpu.pipeline_mode<synchronous>, transform_indices = @transform_2, window_bounds = array<i64: 8, 3>}, {pipeline_mode = #tpu.pipeline_mode<synchronous>, transform_indices = @transform_3, window_bounds = array<i64: 8, 1>}, {pipeline_mode = #tpu.pipeline_mode<synchronous>, transform_indices = @transform_4, window_bounds = array<i64: 32, 32>}, {pipeline_mode = #tpu.pipeline_mode<synchronous>, transform_indices = @transform_5, window_bounds = array<i64: 32, 32>}, {pipeline_mode = #tpu.pipeline_mode<synchronous>, transform_indices = @transform_6, window_bounds = array<i64: 1, 32>}, {pipeline_mode = #tpu.pipeline_mode<synchronous>, transform_indices = @transform_7, window_bounds = array<i64: 1, 32>}, {pipeline_mode = #tpu.pipeline_mode<synchronous>, transform_indices = @transform_8, window_bounds = array<i64: 32, 32>}, {pipeline_mode = #tpu.pipeline_mode<synchronous>, transform_indices = @transform_9, window_bounds = array<i64: 1, 32>}, {pipeline_mode = #tpu.pipeline_mode<synchronous>, transform_indices = @transform_10, window_bounds = array<i64: 32, 32>}, {pipeline_mode = #tpu.pipeline_mode<synchronous>, transform_indices = @transform_11, window_bounds = array<i64: 1, 32>}, {pipeline_mode = #tpu.pipeline_mode<synchronous>, transform_indices = @transform_12, window_bounds = array<i64: 32, 1>}, {pipeline_mode = #tpu.pipeline_mode<synchronous>, transform_indices = @transform_13, window_bounds = array<i64: 32, 32>}, {pipeline_mode = #tpu.pipeline_mode<synchronous>, transform_indices = @transform_14, window_bounds = array<i64: 32, 32>}, {pipeline_mode = #tpu.pipeline_mode<synchronous>, transform_indices = @transform_15, window_bounds = array<i64: 1, 32>}, {pipeline_mode = #tpu.pipeline_mode<synchronous>, transform_indices = @transform_16, window_bounds = array<i64: 32, 32>}, {pipeline_mode = #tpu.pipeline_mode<synchronous>, transform_indices = @transform_17, window_bounds = array<i64: 1, 32>}, {pipeline_mode = #tpu.pipeline_mode<synchronous>, transform_indices = @transform_18, window_bounds = array<i64: 8, 32>}, {pipeline_mode = #tpu.pipeline_mode<synchronous>, transform_indices = @transform_19, window_bounds = array<i64: 8, 3>}]} {
    %c0_i32 = arith.constant 0 : i32
    %0 = arith.cmpi eq, %arg0, %c0_i32 : i32
    %1 = arith.extui %0 : i1 to i32
    %c0_i32_0 = arith.constant 0 : i32
    %2 = arith.cmpi ne, %1, %c0_i32_0 : i32
    scf.if %2 {
      %cst_40 = arith.constant 0.000000e+00 : f32
      %70 = vector.broadcast %cst_40 : f32 to vector<8x35xf32>
      %c0_41 = arith.constant 0 : index
      %c0_42 = arith.constant 0 : index
      %71 = vector.load %arg21[%c0_41, %c0_42] : memref<8x35xf32, #tpu.memory_space<vmem>>, vector<8x35xf32>
      tpu.vector_store %arg21[%c0_41, %c0_42], %70 {strides = array<i32>} : memref<8x35xf32, #tpu.memory_space<vmem>>, vector<8x35xf32>,
      %72 = tpu.iota {dimensions = array<i32: 0>} : vector<8x512xi32>
      %c0_43 = arith.constant 0 : index
      %c0_44 = arith.constant 0 : index
      %73 = vector.load %arg24[%c0_43, %c0_44] : memref<8x512xi32, #tpu.memory_space<vmem>>, vector<8x512xi32>
      tpu.vector_store %arg24[%c0_43, %c0_44], %72 {strides = array<i32>} : memref<8x512xi32, #tpu.memory_space<vmem>>, vector<8x512xi32>,
      %c0_45 = arith.constant 0 : index
      %c0_46 = arith.constant 0 : index
      %74 = vector.load %arg3[%c0_45, %c0_46] : memref<8x3xf32, #tpu.memory_space<vmem>>, vector<8x3xf32>
      %c0_47 = arith.constant 0 : index
      %c0_48 = arith.constant 0 : index
      %75 = vector.load %arg2[%c0_47, %c0_48] : memref<8x32xf32, #tpu.memory_space<vmem>>, vector<8x32xf32>
      %c0_49 = arith.constant 0 : index
      %c0_50 = arith.constant 0 : index
      %76 = vector.load %arg5[%c0_49, %c0_50] : memref<32x32xf32, #tpu.memory_space<vmem>>, vector<32x32xf32>
      %cst_51 = arith.constant dense<0.000000e+00> : vector<8x32xf32>
      %77 = tpu.matmul %75, %76, %cst_51 {dimension_numbers = #tpu.dot_dimension_numbers<[1], [0], [0], [1], [0, 0, 1, 1], [], []>} : vector<8x32xf32>, vector<32x32xf32>, vector<8x32xf32> -> vector<8x32xf32>
      %c0_52 = arith.constant 0 : index
      %c0_53 = arith.constant 0 : index
      %78 = vector.load %arg2[%c0_52, %c0_53] : memref<8x32xf32, #tpu.memory_space<vmem>>, vector<8x32xf32>
      %c0_54 = arith.constant 0 : index
      %c0_55 = arith.constant 0 : index
      %79 = vector.load %arg6[%c0_54, %c0_55] : memref<32x32xf32, #tpu.memory_space<vmem>>, vector<32x32xf32>
      %cst_56 = arith.constant dense<0.000000e+00> : vector<8x32xf32>
      %80 = tpu.matmul %78, %79, %cst_56 {dimension_numbers = #tpu.dot_dimension_numbers<[1], [0], [0], [1], [0, 0, 1, 1], [], []>} : vector<8x32xf32>, vector<32x32xf32>, vector<8x32xf32> -> vector<8x32xf32>
      %81 = tpu.concatenate %77, %74 in 1 : vector<8x32xf32>, vector<8x3xf32> -> vector<8x35xf32>
      %82 = arith.truncf %81 : vector<8x35xf32> to vector<8x35xbf16>
      %c0_57 = arith.constant 0 : index
      %c0_58 = arith.constant 0 : index
      %83 = vector.load %arg22[%c0_57, %c0_58] : memref<8x35xbf16, #tpu.memory_space<vmem>>, vector<8x35xbf16>
      tpu.vector_store %arg22[%c0_57, %c0_58], %82 {strides = array<i32>} : memref<8x35xbf16, #tpu.memory_space<vmem>>, vector<8x35xbf16>,
      %cst_59 = arith.constant 0.000000e+00 : f32
      %84 = vector.broadcast %cst_59 : f32 to vector<8x3xf32>
      %85 = arith.subf %84, %74 : vector<8x3xf32>
      %86 = tpu.concatenate %80, %85 in 1 : vector<8x32xf32>, vector<8x3xf32> -> vector<8x35xf32>
      %87 = arith.truncf %86 : vector<8x35xf32> to vector<8x35xbf16>
      %c0_60 = arith.constant 0 : index
      %c0_61 = arith.constant 0 : index
      %88 = vector.load %arg23[%c0_60, %c0_61] : memref<8x35xbf16, #tpu.memory_space<vmem>>, vector<8x35xbf16>
      tpu.vector_store %arg23[%c0_60, %c0_61], %87 {strides = array<i32>} : memref<8x35xbf16, #tpu.memory_space<vmem>>, vector<8x35xbf16>,
    } else {
    }
    %c0 = arith.constant 0 : index
    %c0_1 = arith.constant 0 : index
    %3 = vector.load %arg1[%c0, %c0_1] : memref<2x512xi32, #tpu.memory_space<vmem>>, vector<1x512xi32>
    %c1 = arith.constant 1 : index
    %c0_2 = arith.constant 0 : index
    %4 = vector.load %arg1[%c1, %c0_2] : memref<2x512xi32, #tpu.memory_space<vmem>>, vector<1x512xi32>
    %c0_3 = arith.constant 0 : index
    %c0_4 = arith.constant 0 : index
    %5 = vector.load %arg24[%c0_3, %c0_4] : memref<8x512xi32, #tpu.memory_space<vmem>>, vector<8x512xi32>
    %6 = vector.broadcast %3 : vector<1x512xi32> to vector<8x512xi32>
    %7 = arith.cmpi eq, %5, %6 : vector<8x512xi32>
    %8 = arith.extui %7 : vector<8x512xi1> to vector<8x512xi32>
    %9 = arith.sitofp %8 : vector<8x512xi32> to vector<8x512xf32>
    %10 = arith.truncf %9 : vector<8x512xf32> to vector<8x512xbf16>
    %11 = vector.broadcast %4 : vector<1x512xi32> to vector<8x512xi32>
    %12 = arith.cmpi eq, %5, %11 : vector<8x512xi32>
    %13 = arith.extui %12 : vector<8x512xi1> to vector<8x512xi32>
    %14 = arith.sitofp %13 : vector<8x512xi32> to vector<8x512xf32>
    %15 = arith.truncf %14 : vector<8x512xf32> to vector<8x512xbf16>
    %c0_5 = arith.constant 0 : index
    %c0_6 = arith.constant 0 : index
    %16 = vector.load %arg22[%c0_5, %c0_6] : memref<8x35xbf16, #tpu.memory_space<vmem>>, vector<8x35xbf16>
    %cst = arith.constant dense<0.000000e+00> : vector<512x35xf32>
    %17 = tpu.matmul %10, %16, %cst {dimension_numbers = #tpu.dot_dimension_numbers<[0], [0], [1], [1], [0, 1, 1, 1], [], []>} : vector<8x512xbf16>, vector<8x35xbf16>, vector<512x35xf32> -> vector<512x35xf32>
    %c0_7 = arith.constant 0 : index
    %c0_8 = arith.constant 0 : index
    %18 = vector.load %arg23[%c0_7, %c0_8] : memref<8x35xbf16, #tpu.memory_space<vmem>>, vector<8x35xbf16>
    %cst_9 = arith.constant dense<0.000000e+00> : vector<512x35xf32>
    %19 = tpu.matmul %15, %18, %cst_9 {dimension_numbers = #tpu.dot_dimension_numbers<[0], [0], [1], [1], [0, 1, 1, 1], [], []>} : vector<8x512xbf16>, vector<8x35xbf16>, vector<512x35xf32> -> vector<512x35xf32>
    %20 = arith.addf %17, %19 : vector<512x35xf32>
    %21 = vector.extract_strided_slice %20 {offsets = [0, 0], sizes = [512, 32], strides = [1, 1]} : vector<512x35xf32> to vector<512x32xf32>
    %22 = vector.extract_strided_slice %20 {offsets = [0, 32], sizes = [512, 3], strides = [1, 1]} : vector<512x35xf32> to vector<512x3xf32>
    %23 = arith.mulf %22, %22 : vector<512x3xf32>
    %cst_10 = arith.constant dense<0.000000e+00> : vector<512xf32>
    %24 = vector.multi_reduction <add>, %23, %cst_10 [1] : vector<512x3xf32> to vector<512xf32>
    %25 = vector.shape_cast %24 : vector<512xf32> to vector<512x1xf32>
    %c0_11 = arith.constant 0 : index
    %c0_12 = arith.constant 0 : index
    %26 = vector.load %arg7[%c0_11, %c0_12] : memref<1x32xf32, #tpu.memory_space<vmem>>, vector<1x32xf32>
    %27 = vector.broadcast %25 : vector<512x1xf32> to vector<512x32xf32>
    %28 = vector.broadcast %26 : vector<1x32xf32> to vector<512x32xf32>
    %29 = arith.mulf %27, %28 : vector<512x32xf32>
    %30 = arith.addf %21, %29 : vector<512x32xf32>
    %c0_13 = arith.constant 0 : index
    %c0_14 = arith.constant 0 : index
    %31 = vector.load %arg8[%c0_13, %c0_14] : memref<1x32xf32, #tpu.memory_space<vmem>>, vector<1x32xf32>
    %32 = vector.broadcast %31 : vector<1x32xf32> to vector<512x32xf32>
    %33 = arith.addf %30, %32 : vector<512x32xf32>
    %cst_15 = arith.constant 0.000000e+00 : f32
    %34 = vector.broadcast %cst_15 : f32 to vector<512x32xf32>
    %35 = arith.maximumf %33, %34 : vector<512x32xf32>
    %36 = arith.truncf %35 : vector<512x32xf32> to vector<512x32xbf16>
    %c0_16 = arith.constant 0 : index
    %c0_17 = arith.constant 0 : index
    %37 = vector.load %arg9[%c0_16, %c0_17] : memref<32x32xbf16, #tpu.memory_space<vmem>>, vector<32x32xbf16>
    %cst_18 = arith.constant dense<0.000000e+00> : vector<512x32xf32>
    %38 = tpu.matmul %36, %37, %cst_18 {dimension_numbers = #tpu.dot_dimension_numbers<[1], [0], [0], [1], [0, 0, 1, 1], [], []>} : vector<512x32xbf16>, vector<32x32xbf16>, vector<512x32xf32> -> vector<512x32xf32>
    %c0_19 = arith.constant 0 : index
    %c0_20 = arith.constant 0 : index
    %39 = vector.load %arg10[%c0_19, %c0_20] : memref<1x32xf32, #tpu.memory_space<vmem>>, vector<1x32xf32>
    %40 = vector.broadcast %39 : vector<1x32xf32> to vector<512x32xf32>
    %41 = arith.addf %38, %40 : vector<512x32xf32>
    %cst_21 = arith.constant 0.000000e+00 : f32
    %42 = vector.broadcast %cst_21 : f32 to vector<512x32xf32>
    %43 = arith.maximumf %41, %42 : vector<512x32xf32>
    %44 = arith.truncf %43 : vector<512x32xf32> to vector<512x32xbf16>
    %c0_22 = arith.constant 0 : index
    %c0_23 = arith.constant 0 : index
    %45 = vector.load %arg11[%c0_22, %c0_23] : memref<32x32xbf16, #tpu.memory_space<vmem>>, vector<32x32xbf16>
    %cst_24 = arith.constant dense<0.000000e+00> : vector<512x32xf32>
    %46 = tpu.matmul %44, %45, %cst_24 {dimension_numbers = #tpu.dot_dimension_numbers<[1], [0], [0], [1], [0, 0, 1, 1], [], []>} : vector<512x32xbf16>, vector<32x32xbf16>, vector<512x32xf32> -> vector<512x32xf32>
    %c0_25 = arith.constant 0 : index
    %c0_26 = arith.constant 0 : index
    %47 = vector.load %arg12[%c0_25, %c0_26] : memref<1x32xf32, #tpu.memory_space<vmem>>, vector<1x32xf32>
    %48 = vector.broadcast %47 : vector<1x32xf32> to vector<512x32xf32>
    %49 = arith.addf %46, %48 : vector<512x32xf32>
    %cst_27 = arith.constant 0.000000e+00 : f32
    %50 = vector.broadcast %cst_27 : f32 to vector<512x32xf32>
    %51 = arith.maximumf %49, %50 : vector<512x32xf32>
    %52 = arith.truncf %51 : vector<512x32xf32> to vector<512x32xbf16>
    %c0_28 = arith.constant 0 : index
    %c0_29 = arith.constant 0 : index
    %53 = vector.load %arg13[%c0_28, %c0_29] : memref<32x1xbf16, #tpu.memory_space<vmem>>, vector<32x1xbf16>
    %cst_30 = arith.constant dense<0.000000e+00> : vector<512x1xf32>
    %54 = tpu.matmul %52, %53, %cst_30 {dimension_numbers = #tpu.dot_dimension_numbers<[1], [0], [0], [1], [0, 0, 1, 1], [], []>} : vector<512x32xbf16>, vector<32x1xbf16>, vector<512x1xf32> -> vector<512x1xf32>
    %55 = vector.broadcast %54 : vector<512x1xf32> to vector<512x3xf32>
    %56 = arith.mulf %22, %55 : vector<512x3xf32>
    %cst_31 = arith.constant -1.000000e+02 : f32
    %cst_32 = arith.constant 1.000000e+02 : f32
    %57 = vector.broadcast %cst_31 : f32 to vector<512x3xf32>
    %58 = arith.maximumf %57, %56 : vector<512x3xf32>
    %59 = vector.broadcast %cst_32 : f32 to vector<512x3xf32>
    %60 = arith.minimumf %59, %58 : vector<512x3xf32>
    %61 = arith.truncf %60 : vector<512x3xf32> to vector<512x3xbf16>
    %62 = tpu.concatenate %44, %61 in 1 : vector<512x32xbf16>, vector<512x3xbf16> -> vector<512x35xbf16>
    %c0_33 = arith.constant 0 : index
    %c0_34 = arith.constant 0 : index
    %63 = vector.load %arg21[%c0_33, %c0_34] : memref<8x35xf32, #tpu.memory_space<vmem>>, vector<8x35xf32>
    %cst_35 = arith.constant dense<0.000000e+00> : vector<8x35xf32>
    %64 = tpu.matmul %10, %62, %cst_35 {dimension_numbers = #tpu.dot_dimension_numbers<[1], [0], [0], [1], [0, 0, 1, 1], [], []>} : vector<8x512xbf16>, vector<512x35xbf16>, vector<8x35xf32> -> vector<8x35xf32>
    %65 = arith.addf %63, %64 : vector<8x35xf32>
    %c0_36 = arith.constant 0 : index
    %c0_37 = arith.constant 0 : index
    %66 = vector.load %arg21[%c0_36, %c0_37] : memref<8x35xf32, #tpu.memory_space<vmem>>, vector<8x35xf32>
    tpu.vector_store %arg21[%c0_36, %c0_37], %65 {strides = array<i32>} : memref<8x35xf32, #tpu.memory_space<vmem>>, vector<8x35xf32>,
    %c0_i32_38 = arith.constant 0 : i32
    %67 = arith.cmpi eq, %arg0, %c0_i32_38 : i32
    %68 = arith.extui %67 : i1 to i32
    %c0_i32_39 = arith.constant 0 : i32
    %69 = arith.cmpi ne, %68, %c0_i32_39 : i32
    scf.if %69 {
      %c0_40 = arith.constant 0 : index
      %c0_41 = arith.constant 0 : index
      %70 = vector.load %arg2[%c0_40, %c0_41] : memref<8x32xf32, #tpu.memory_space<vmem>>, vector<8x32xf32>
      %c0_42 = arith.constant 0 : index
      %c0_43 = arith.constant 0 : index
      %71 = vector.load %arg21[%c0_42, %c0_43] : memref<8x35xf32, #tpu.memory_space<vmem>>, vector<8x32xf32>
      %c0_44 = arith.constant 0 : index
      %c32 = arith.constant 32 : index
      %72 = vector.load %arg21[%c0_44, %c32] : memref<8x35xf32, #tpu.memory_space<vmem>>, vector<8x3xf32>
      %c0_45 = arith.constant 0 : index
      %c0_46 = arith.constant 0 : index
      %73 = vector.load %arg4[%c0_45, %c0_46] : memref<8x1xf32, #tpu.memory_space<vmem>>, vector<8x1xf32>
      %cst_47 = arith.constant 1.000000e+00 : f32
      %74 = vector.broadcast %cst_47 : f32 to vector<8x1xf32>
      %75 = arith.maximumf %73, %74 : vector<8x1xf32>
      %76 = vector.broadcast %75 : vector<8x1xf32> to vector<8x3xf32>
      %77 = arith.divf %72, %76 : vector<8x3xf32>
      %c0_48 = arith.constant 0 : index
      %c0_49 = arith.constant 0 : index
      %78 = vector.load %arg3[%c0_48, %c0_49] : memref<8x3xf32, #tpu.memory_space<vmem>>, vector<8x3xf32>
      %cst_50 = arith.constant 1.000000e+00 : f32
      %79 = vector.broadcast %cst_50 : f32 to vector<8x3xf32>
      %80 = arith.mulf %77, %79 : vector<8x3xf32>
      %81 = arith.addf %78, %80 : vector<8x3xf32>
      %c0_51 = arith.constant 0 : index
      %c0_52 = arith.constant 0 : index
      %82 = vector.load %arg20[%c0_51, %c0_52] : memref<8x3xf32, #tpu.memory_space<vmem>>, vector<8x3xf32>
      tpu.vector_store %arg20[%c0_51, %c0_52], %81 {strides = array<i32>} : memref<8x3xf32, #tpu.memory_space<vmem>>, vector<8x3xf32>,
      %c0_53 = arith.constant 0 : index
      %c0_54 = arith.constant 0 : index
      %83 = vector.load %arg14[%c0_53, %c0_54] : memref<32x32xf32, #tpu.memory_space<vmem>>, vector<32x32xf32>
      %cst_55 = arith.constant dense<0.000000e+00> : vector<8x32xf32>
      %84 = tpu.matmul %70, %83, %cst_55 {dimension_numbers = #tpu.dot_dimension_numbers<[1], [0], [0], [1], [0, 0, 1, 1], [], []>} : vector<8x32xf32>, vector<32x32xf32>, vector<8x32xf32> -> vector<8x32xf32>
      %c0_56 = arith.constant 0 : index
      %c0_57 = arith.constant 0 : index
      %85 = vector.load %arg15[%c0_56, %c0_57] : memref<32x32xf32, #tpu.memory_space<vmem>>, vector<32x32xf32>
      %cst_58 = arith.constant dense<0.000000e+00> : vector<8x32xf32>
      %86 = tpu.matmul %71, %85, %cst_58 {dimension_numbers = #tpu.dot_dimension_numbers<[1], [0], [0], [1], [0, 0, 1, 1], [], []>} : vector<8x32xf32>, vector<32x32xf32>, vector<8x32xf32> -> vector<8x32xf32>
      %87 = arith.addf %84, %86 : vector<8x32xf32>
      %c0_59 = arith.constant 0 : index
      %c0_60 = arith.constant 0 : index
      %88 = vector.load %arg16[%c0_59, %c0_60] : memref<1x32xf32, #tpu.memory_space<vmem>>, vector<1x32xf32>
      %89 = vector.broadcast %88 : vector<1x32xf32> to vector<8x32xf32>
      %90 = arith.addf %87, %89 : vector<8x32xf32>
      %cst_61 = arith.constant 0.000000e+00 : f32
      %91 = vector.broadcast %cst_61 : f32 to vector<8x32xf32>
      %92 = arith.maximumf %90, %91 : vector<8x32xf32>
      %c0_62 = arith.constant 0 : index
      %c0_63 = arith.constant 0 : index
      %93 = vector.load %arg17[%c0_62, %c0_63] : memref<32x32xf32, #tpu.memory_space<vmem>>, vector<32x32xf32>
      %cst_64 = arith.constant dense<0.000000e+00> : vector<8x32xf32>
      %94 = tpu.matmul %92, %93, %cst_64 {dimension_numbers = #tpu.dot_dimension_numbers<[1], [0], [0], [1], [0, 0, 1, 1], [], []>} : vector<8x32xf32>, vector<32x32xf32>, vector<8x32xf32> -> vector<8x32xf32>
      %95 = arith.addf %70, %94 : vector<8x32xf32>
      %c0_65 = arith.constant 0 : index
      %c0_66 = arith.constant 0 : index
      %96 = vector.load %arg18[%c0_65, %c0_66] : memref<1x32xf32, #tpu.memory_space<vmem>>, vector<1x32xf32>
      %97 = vector.broadcast %96 : vector<1x32xf32> to vector<8x32xf32>
      %98 = arith.addf %95, %97 : vector<8x32xf32>
      %c0_67 = arith.constant 0 : index
      %c0_68 = arith.constant 0 : index
      %99 = vector.load %arg19[%c0_67, %c0_68] : memref<8x32xf32, #tpu.memory_space<vmem>>, vector<8x32xf32>
      tpu.vector_store %arg19[%c0_67, %c0_68], %98 {strides = array<i32>} : memref<8x32xf32, #tpu.memory_space<vmem>>, vector<8x32xf32>,
    } else {
    }
    return
  }
  func.func @transform_0(%arg0: i32) -> (i32, i32) {
    %c0_i32 = arith.constant 0 : i32
    %c0_i32_0 = arith.constant 0 : i32
    return %c0_i32, %arg0 : i32, i32
  }
  func.func @transform_1(%arg0: i32) -> (i32, i32) {
    %c0_i32 = arith.constant 0 : i32
    %c0_i32_0 = arith.constant 0 : i32
    %c0_i32_1 = arith.constant 0 : i32
    return %c0_i32, %c0_i32_0 : i32, i32
  }
  func.func @transform_2(%arg0: i32) -> (i32, i32) {
    %c0_i32 = arith.constant 0 : i32
    %c0_i32_0 = arith.constant 0 : i32
    %c0_i32_1 = arith.constant 0 : i32
    return %c0_i32, %c0_i32_0 : i32, i32
  }
  func.func @transform_3(%arg0: i32) -> (i32, i32) {
    %c0_i32 = arith.constant 0 : i32
    %c0_i32_0 = arith.constant 0 : i32
    %c0_i32_1 = arith.constant 0 : i32
    return %c0_i32, %c0_i32_0 : i32, i32
  }
  func.func @transform_4(%arg0: i32) -> (i32, i32) {
    %c0_i32 = arith.constant 0 : i32
    %c0_i32_0 = arith.constant 0 : i32
    %c0_i32_1 = arith.constant 0 : i32
    return %c0_i32, %c0_i32_0 : i32, i32
  }
  func.func @transform_5(%arg0: i32) -> (i32, i32) {
    %c0_i32 = arith.constant 0 : i32
    %c0_i32_0 = arith.constant 0 : i32
    %c0_i32_1 = arith.constant 0 : i32
    return %c0_i32, %c0_i32_0 : i32, i32
  }
  func.func @transform_6(%arg0: i32) -> (i32, i32) {
    %c0_i32 = arith.constant 0 : i32
    %c0_i32_0 = arith.constant 0 : i32
    %c0_i32_1 = arith.constant 0 : i32
    return %c0_i32, %c0_i32_0 : i32, i32
  }
  func.func @transform_7(%arg0: i32) -> (i32, i32) {
    %c0_i32 = arith.constant 0 : i32
    %c0_i32_0 = arith.constant 0 : i32
    %c0_i32_1 = arith.constant 0 : i32
    return %c0_i32, %c0_i32_0 : i32, i32
  }
  func.func @transform_8(%arg0: i32) -> (i32, i32) {
    %c0_i32 = arith.constant 0 : i32
    %c0_i32_0 = arith.constant 0 : i32
    %c0_i32_1 = arith.constant 0 : i32
    return %c0_i32, %c0_i32_0 : i32, i32
  }
  func.func @transform_9(%arg0: i32) -> (i32, i32) {
    %c0_i32 = arith.constant 0 : i32
    %c0_i32_0 = arith.constant 0 : i32
    %c0_i32_1 = arith.constant 0 : i32
    return %c0_i32, %c0_i32_0 : i32, i32
  }
  func.func @transform_10(%arg0: i32) -> (i32, i32) {
    %c0_i32 = arith.constant 0 : i32
    %c0_i32_0 = arith.constant 0 : i32
    %c0_i32_1 = arith.constant 0 : i32
    return %c0_i32, %c0_i32_0 : i32, i32
  }
  func.func @transform_11(%arg0: i32) -> (i32, i32) {
    %c0_i32 = arith.constant 0 : i32
    %c0_i32_0 = arith.constant 0 : i32
    %c0_i32_1 = arith.constant 0 : i32
    return %c0_i32, %c0_i32_0 : i32, i32
  }
  func.func @transform_12(%arg0: i32) -> (i32, i32) {
    %c0_i32 = arith.constant 0 : i32
    %c0_i32_0 = arith.constant 0 : i32
    %c0_i32_1 = arith.constant 0 : i32
    return %c0_i32, %c0_i32_0 : i32, i32
  }
  func.func @transform_13(%arg0: i32) -> (i32, i32) {
    %c0_i32 = arith.constant 0 : i32
    %c0_i32_0 = arith.constant 0 : i32
    %c0_i32_1 = arith.constant 0 : i32
    return %c0_i32, %c0_i32_0 : i32, i32
  }
  func.func @transform_14(%arg0: i32) -> (i32, i32) {
    %c0_i32 = arith.constant 0 : i32
    %c0_i32_0 = arith.constant 0 : i32
    %c0_i32_1 = arith.constant 0 : i32
    return %c0_i32, %c0_i32_0 : i32, i32
  }
  func.func @transform_15(%arg0: i32) -> (i32, i32) {
    %c0_i32 = arith.constant 0 : i32
    %c0_i32_0 = arith.constant 0 : i32
    %c0_i32_1 = arith.constant 0 : i32
    return %c0_i32, %c0_i32_0 : i32, i32
  }
  func.func @transform_16(%arg0: i32) -> (i32, i32) {
    %c0_i32 = arith.constant 0 : i32
    %c0_i32_0 = arith.constant 0 : i32
    %c0_i32_1 = arith.constant 0 : i32
    return %c0_i32, %c0_i32_0 : i32, i32
  }
  func.func @transform_17(%arg0: i32) -> (i32, i32) {
    %c0_i32 = arith.constant 0 : i32
    %c0_i32_0 = arith.constant 0 : i32
    %c0_i32_1 = arith.constant 0 : i32
    return %c0_i32, %c0_i32_0 : i32, i32
  }
  func.func @transform_18(%arg0: i32) -> (i32, i32) {
    %c0_i32 = arith.constant 0 : i32
    %c0_i32_0 = arith.constant 0 : i32
    %c0_i32_1 = arith.constant 0 : i32
    return %c0_i32, %c0_i32_0 : i32, i32
  }
  func.func @transform_19(%arg0: i32) -> (i32, i32) {
    %c0_i32 = arith.constant 0 : i32
    %c0_i32_0 = arith.constant 0 : i32
    %c0_i32_1 = arith.constant 0 : i32
    return %c0_i32, %c0_i32_0 : i32, i32
  }
}

</mosaic_0001>

<bundles_post_ra>
// kernel: tpu_custom_call.1
= control target key start
LH: loop header
LB: loop body
LE: loop exit
PB: predicated region body
PF: predicated region fallthrough
CT: control target
= control target key end

     0   :  { %s7555_s0 = inlined_call_operand.hbm [shape: s32[2,512], index: 0, kind: input, shape index: {}]   ;;  %s7556_s1 = inlined_call_operand.hbm [shape: f32[8,32], index: 1, kind: input, shape index: {}]   ;;  %s7557_s2 = inlined_call_operand.vmem [shape: f32[8,3], index: 2, kind: input, shape index: {}]   ;;  %s7558_s3 = inlined_call_operand.vmem [shape: f32[8,1], index: 3, kind: input, shape index: {}]   ;;  %s7559_s4 = inlined_call_operand.vmem [shape: f32[32,32], index: 4, kind: input, shape index: {}]   ;;  %s7560_s5 = inlined_call_operand.hbm [shape: f32[32,32], index: 5, kind: input, shape index: {}]   ;;  %s7561_s6 = inlined_call_operand.hbm [shape: f32[1,32], index: 6, kind: input, shape index: {}]   ;;  %s7562_s7 = inlined_call_operand.hbm [shape: f32[1,32], index: 7, kind: input, shape index: {}]   ;;  %s7563_s8 = inlined_call_operand.hbm [shape: bf16[32,32], index: 8, kind: input, shape index: {}]   ;;  %s7564_s9 = inlined_call_operand.vmem [shape: f32[1,32], index: 9, kind: input, shape index: {}]   ;;  %s7565_s10 = inlined_call_operand.hbm [shape: bf16[32,32], index: 10, kind: input, shape index: {}]   ;;  %s7566_s11 = inlined_call_operand.vmem [shape: f32[1,32], index: 11, kind: input, shape index: {}]   ;;  %s7567_s12 = inlined_call_operand.vmem [shape: bf16[32,1], index: 12, kind: input, shape index: {}]   ;;  %s7568_s13 = inlined_call_operand.vmem [shape: f32[32,32], index: 13, kind: input, shape index: {}]   ;;  %s7569_s14 = inlined_call_operand.hbm [shape: f32[32,32], index: 14, kind: input, shape index: {}]   ;;  %s7570_s15 = inlined_call_operand.hbm [shape: f32[1,32], index: 15, kind: input, shape index: {}]   ;;  %s7571_s16 = inlined_call_operand.vmem [shape: f32[32,32], index: 16, kind: input, shape index: {}]   ;;  %s7572_s17 = inlined_call_operand.vmem [shape: f32[1,32], index: 17, kind: input, shape index: {}]   ;;  %s7573_s18 = inlined_call_operand.hbm [shape: f32[8,32], index: 18, kind: output, shape index: {0}]   ;;  %s7574_s19 = inlined_call_operand.vmem [shape: f32[8,3], index: 19, kind: output, shape index: {1}]  }
   0x1   :  { %7681 = sst [smem:[#allocation84_spill]] %s7555_s0 }
   0x2   :  { %7682 = sst [smem:[#allocation85_spill]] %s7556_s1 }
   0x3   :  { %7683 = sst [smem:[#allocation86_spill]] %s7557_s2 }
   0x4   :  { %7684 = sst [smem:[#allocation87_spill]] %s7558_s3 }
   0x5   :  { %25 = vsyncpa [#allocation7], 0 }
   0x6   :  { %26 = vsyncpa [#allocation10], 0 }
   0x7   :  { %27 = vsyncpa [#allocation13], 0 }
   0x8   :  { %28 = vsyncpa [#allocation16], 0 }
   0x9   :  { %29 = vsyncpa [#allocation19], 0 }
   0xa   :  { %30 = vsyncpa [#allocation8], 0  ;;  %s5831_s0 = smov [#allocation9]   ;;  %s5832_s20 = smov [#allocation12]  }
   0xb   :  { %s47_s30 = sshll.u32 %s5831_s0, 4  ;;  %s75_s21 = sshll.u32 %s5832_s20, 4  ;;  %s48_s30 = int_to_ptr.vmem [resolvable:$true] %s47_s30  ;;  %s76_s21 = int_to_ptr.vmem [resolvable:$true] %s75_s21 }
   0xc   :  { %s7685_s2 = sld [smem:[#allocation85_spill]] }
  0x12   :  { %s5599_s23 = scalar_lea.hbm %s7685_s2, 128 }
  0x13   :  { %p5600_p0 = scmp.ne.s32.totalorder %s7685_s2, %s5599_s23  ;;  %p5603_p1 = scmp.lt.u32.totalorder %s5599_s23, %s7685_s2 }
  0x15   :  { %p5605_p2 = pnand %p5603_p1, %p5600_p0 }
  0x17   :  { %5608 = shalt.err (!%p5605_p2)
}
  0x18   :  { %s5609_s27 = scalar_lea.vmem %s48_s30, 128  ;;  %p5614_p4 = scmp.lt.s32.totalorder %s48_s30, %s48_s30 }
  0x19   :  { %p5610_p3 = scmp.ne.s32.totalorder %s48_s30, %s5609_s27  ;;  %p5615_p5 = scmp.lt.s32.totalorder %s5609_s27, %s5609_s27 }
  0x1b   :  { %p5616_p6 = por %p5615_p5, %p5614_p4 }
  0x1d   :  { %p5617_p7 = pnand %p5616_p6, %p5610_p3 }
  0x1f   :  { %5620 = shalt.err (!%p5617_p7)
}
  0x20   :  { %50 = dma.hbm_to_vmem [thread:$0]  %s7685_s2, 128, %s48_s30, [#allocation10]  }
  0x21   :  { %s5621_s1 = scalar_lea.hbm %s7561_s6, 16 }
  0x22   :  { %p5622_p8 = scmp.ne.s32.totalorder %s7561_s6, %s5621_s1  ;;  %p5625_p9 = scmp.lt.u32.totalorder %s5621_s1, %s7561_s6 }
  0x24   :  { %p5627_p10 = pnand %p5625_p9, %p5622_p8 }
  0x26   :  { %5630 = shalt.err (!%p5627_p10)
}
  0x27   :  { %s5631_s3 = scalar_lea.vmem %s76_s21, 16  ;;  %s5635_s26 = scalar_lea.vmem %s76_s21, 32 }
  0x28   :  { %p5632_p11 = scmp.ne.s32.totalorder %s76_s21, %s5631_s3  ;;  %p5636_p12 = scmp.lt.s32.totalorder %s76_s21, %s76_s21 }
  0x29   :  { %p5637_p13 = scmp.lt.s32.totalorder %s5635_s26, %s5631_s3 }
  0x2b   :  { %p5638_p0 = por %p5637_p13, %p5636_p12 }
  0x2d   :  { %p5639_p1 = pnand %p5638_p0, %p5632_p11 }
  0x2f   :  { %5642 = shalt.err (!%p5639_p1)
}
  0x30   :  { %78 = dma.hbm_to_vmem [thread:$0]  %s7561_s6, 16, %s76_s21, [#allocation13]  }
  0x31   :  { %s5833_s27 = smov [#allocation15]   ;;  %s5643_s20 = scalar_lea.hbm %s7563_s8, 256 }
  0x32   :  { %s94_s28 = sshll.u32 %s5833_s27, 4  ;;  %p5644_p2 = scmp.ne.s32.totalorder %s7563_s8, %s5643_s20  ;;  %s95_s28 = int_to_ptr.vmem [resolvable:$true] %s94_s28 }
  0x33   :  { %p5647_p3 = scmp.lt.u32.totalorder %s5643_s20, %s7563_s8 }
  0x35   :  { %p5649_p4 = pnand %p5647_p3, %p5644_p2 }
  0x37   :  { %5652 = shalt.err (!%p5649_p4)
}
  0x38   :  { %s5653_s25 = scalar_lea.vmem %s95_s28, 256  ;;  %p5658_p6 = scmp.lt.s32.totalorder %s95_s28, %s95_s28 }
  0x39   :  { %p5654_p5 = scmp.ne.s32.totalorder %s95_s28, %s5653_s25  ;;  %p5659_p7 = scmp.lt.s32.totalorder %s5653_s25, %s5653_s25 }
  0x3b   :  { %p5660_p8 = por %p5659_p7, %p5658_p6 }
  0x3d   :  { %p5661_p9 = pnand %p5660_p8, %p5654_p5 }
  0x3f   :  { %5664 = shalt.err (!%p5661_p9)
}
  0x40   :  { %s7578_s6 = smov 64   ;;  %s5835_s21 = smov 4  }
  0x41   :  { %100 = dma.hbm_to_vmem [thread:$0]  %s7563_s8, 256, %s95_s28, [#allocation16], %s7578_s6, %s7578_s6, %s5835_s21  }
  0x42   :  { %s5836_s30 = smov [#allocation18]   ;;  %s5837_s27 = smov [#allocation6]  }
  0x43   :  { %s126_s2 = sshll.u32 %s5836_s30, 4  ;;  %s37_s29 = sshll.u32 %s5837_s27, 4  ;;  %s127_s2 = int_to_ptr.vmem [resolvable:$true] %s126_s2  ;;  %s38_s29 = int_to_ptr.vmem [resolvable:$true] %s37_s29 }
  0x44   :  { %s5665_s1 = scalar_lea.hbm %s7569_s14, 512 }
  0x45   :  { %p5666_p10 = scmp.ne.s32.totalorder %s7569_s14, %s5665_s1  ;;  %p5669_p11 = scmp.lt.u32.totalorder %s5665_s1, %s7569_s14 }
  0x47   :  { %p5671_p12 = pnand %p5669_p11, %p5666_p10 }
  0x49   :  { %5674 = shalt.err (!%p5671_p12)
}
  0x4a   :  { %s5675_s8 = scalar_lea.vmem %s127_s2, 512  ;;  %p5680_p0 = scmp.lt.s32.totalorder %s127_s2, %s127_s2 }
  0x4b   :  { %p5676_p13 = scmp.ne.s32.totalorder %s127_s2, %s5675_s8  ;;  %p5681_p1 = scmp.lt.s32.totalorder %s5675_s8, %s5675_s8 }
  0x4d   :  { %p5682_p2 = por %p5681_p1, %p5680_p0 }
  0x4f   :  { %p5683_p3 = pnand %p5682_p2, %p5676_p13 }
  0x51   :  { %5686 = shalt.err (!%p5683_p3)
}
  0x52   :  { %s5838_s28 = smov 128   ;;  %s5839_s3 = smov 8  }
  0x53   :  { %132 = dma.hbm_to_vmem [thread:$0]  %s7569_s14, 512, %s127_s2, [#allocation19], %s5838_s28, %s5838_s28, %s5839_s3  }
  0x54   :  { %s7686_s20 = sld [smem:[#allocation84_spill]] }
  0x5a   :  { %s5687_s1 = scalar_lea.hbm %s7686_s20, 128 }
  0x5b   :  { %p5688_p4 = scmp.ne.s32.totalorder %s7686_s20, %s5687_s1  ;;  %p5691_p5 = scmp.lt.u32.totalorder %s5687_s1, %s7686_s20 }
  0x5d   :  { %p5693_p6 = pnand %p5691_p5, %p5688_p4 }
  0x5f   :  { %5696 = shalt.err (!%p5693_p6)
}
  0x60   :  { %s5697_s8 = scalar_lea.vmem %s38_s29, 128  ;;  %p5702_p8 = scmp.lt.s32.totalorder %s38_s29, %s38_s29 }
  0x61   :  { %p5698_p7 = scmp.ne.s32.totalorder %s38_s29, %s5697_s8  ;;  %p5703_p9 = scmp.lt.s32.totalorder %s5697_s8, %s5697_s8 }
  0x63   :  { %p5704_p10 = por %p5703_p9, %p5702_p8 }
  0x65   :  { %p5705_p11 = pnand %p5704_p10, %p5698_p7 }
  0x67   :  { %5708 = shalt.err (!%p5705_p11)
}
  0x68   :  { %40 = dma.hbm_to_vmem [thread:$0]  %s7686_s20, 128, %s38_s29, [#allocation7]  }
  0x69   :  { %s5840_s26 = smov [#allocation11]   ;;  %s5841_s27 = smov [#allocation14]  }
  0x6a   :  { %s62_s30 = sshll.u32 %s5840_s26, 4  ;;  %s85_s0 = sshll.u32 %s5841_s27, 4  ;;  %s63_s30 = int_to_ptr.vmem [resolvable:$true] %s62_s30  ;;  %s86_s0 = int_to_ptr.vmem [resolvable:$true] %s85_s0 }
  0x6b   :  { %s5709_s24 = scalar_lea.hbm %s7560_s5, 512 }
  0x6c   :  { %p5710_p12 = scmp.ne.s32.totalorder %s7560_s5, %s5709_s24  ;;  %p5713_p13 = scmp.lt.u32.totalorder %s5709_s24, %s7560_s5 }
  0x6e   :  { %p5715_p0 = pnand %p5713_p13, %p5710_p12 }
  0x70   :  { %5718 = shalt.err (!%p5715_p0)
}
  0x71   :  { %s5719_s29 = scalar_lea.vmem %s63_s30, 512  ;;  %p5724_p2 = scmp.lt.s32.totalorder %s63_s30, %s63_s30 }
  0x72   :  { %p5720_p1 = scmp.ne.s32.totalorder %s63_s30, %s5719_s29  ;;  %p5725_p3 = scmp.lt.s32.totalorder %s5719_s29, %s5719_s29 }
  0x74   :  { %p5726_p4 = por %p5725_p3, %p5724_p2 }
  0x76   :  { %p5727_p5 = pnand %p5726_p4, %p5720_p1 }
  0x78   :  { %5730 = shalt.err (!%p5727_p5)
}
  0x79   :  { %68 = dma.hbm_to_vmem [thread:$0]  %s7560_s5, 512, %s63_s30, [#allocation10], %s5838_s28, %s5838_s28, %s5839_s3  }
  0x7a   :  { %s5731_s26 = scalar_lea.hbm %s7562_s7, 16 }
  0x7b   :  { %p5732_p6 = scmp.ne.s32.totalorder %s7562_s7, %s5731_s26  ;;  %p5735_p7 = scmp.lt.u32.totalorder %s5731_s26, %s7562_s7 }
  0x7d   :  { %p5737_p8 = pnand %p5735_p7, %p5732_p6 }
  0x7f   :  { %5740 = shalt.err (!%p5737_p8)
}
  0x80   :  { %s5741_s23 = scalar_lea.vmem %s86_s0, 16  ;;  %s5745_s25 = scalar_lea.vmem %s86_s0, 32 }
  0x81   :  { %p5742_p9 = scmp.ne.s32.totalorder %s86_s0, %s5741_s23  ;;  %p5746_p10 = scmp.lt.s32.totalorder %s86_s0, %s86_s0 }
  0x82   :  { %p5747_p11 = scmp.lt.s32.totalorder %s5745_s25, %s5741_s23 }
  0x84   :  { %p5748_p12 = por %p5747_p11, %p5746_p10 }
  0x86   :  { %p5749_p13 = pnand %p5748_p12, %p5742_p9 }
  0x88   :  { %5752 = shalt.err (!%p5749_p13)
}
  0x89   :  { %88 = dma.hbm_to_vmem [thread:$0]  %s7562_s7, 16, %s86_s0, [#allocation13]  }
  0x8a   :  { %s5842_s3 = smov [#allocation17]   ;;  %s5843_s8 = smov [#allocation20]  }
  0x8b   :  { %s108_s30 = sshll.u32 %s5842_s3, 4  ;;  %s139_s29 = sshll.u32 %s5843_s8, 4  ;;  %s109_s30 = int_to_ptr.vmem [resolvable:$true] %s108_s30  ;;  %s140_s29 = int_to_ptr.vmem [resolvable:$true] %s139_s29 }
  0x8c   :  { %s5753_s2 = scalar_lea.hbm %s7565_s10, 256 }
  0x8d   :  { %p5754_p0 = scmp.ne.s32.totalorder %s7565_s10, %s5753_s2  ;;  %p5757_p1 = scmp.lt.u32.totalorder %s5753_s2, %s7565_s10 }
  0x8f   :  { %p5759_p2 = pnand %p5757_p1, %p5754_p0 }
  0x91   :  { %5762 = shalt.err (!%p5759_p2)
}
  0x92   :  { %s5763_s7 = scalar_lea.vmem %s109_s30, 256  ;;  %p5768_p4 = scmp.lt.s32.totalorder %s109_s30, %s109_s30 }
  0x93   :  { %p5764_p3 = scmp.ne.s32.totalorder %s109_s30, %s5763_s7  ;;  %p5769_p5 = scmp.lt.s32.totalorder %s5763_s7, %s5763_s7 }
  0x95   :  { %p5770_p6 = por %p5769_p5, %p5768_p4 }
  0x97   :  { %p5771_p7 = pnand %p5770_p6, %p5764_p3 }
  0x99   :  { %5774 = shalt.err (!%p5771_p7)
}
  0x9a   :  { %s7687_s0 = smov 64   ;;  %s5775_s5 = scalar_lea.hbm %s7570_s15, 16 }
  0x9b   :  { %114 = dma.hbm_to_vmem [thread:$0]  %s7565_s10, 256, %s109_s30, [#allocation16], %s7687_s0, %s7687_s0, %s5835_s21  }
  0x9c   :  { %p5776_p8 = scmp.ne.s32.totalorder %s7570_s15, %s5775_s5  ;;  %p5779_p9 = scmp.lt.u32.totalorder %s5775_s5, %s7570_s15 }
  0x9e   :  { %p5781_p10 = pnand %p5779_p9, %p5776_p8 }
  0xa0   :  { %5784 = shalt.err (!%p5781_p10)
}
  0xa1   :  { %s5785_s14 = scalar_lea.vmem %s140_s29, 16  ;;  %s5789_s2 = scalar_lea.vmem %s140_s29, 32 }
  0xa2   :  { %p5786_p11 = scmp.ne.s32.totalorder %s140_s29, %s5785_s14  ;;  %p5790_p12 = scmp.lt.s32.totalorder %s140_s29, %s140_s29 }
  0xa3   :  { %p5791_p13 = scmp.lt.s32.totalorder %s5789_s2, %s5785_s14 }
  0xa5   :  { %p5792_p0 = por %p5791_p13, %p5790_p12 }
  0xa7   :  { %p5793_p1 = pnand %p5792_p0, %p5786_p11 }
  0xa9   :  { %5796 = shalt.err (!%p5793_p1)
}
  0xaa   :  { %142 = dma.hbm_to_vmem [thread:$0]  %s7570_s15, 16, %s140_s29, [#allocation19]  }
  0xab   :  { %5819 = dma.done.wait [#allocation7], 128  }
  0xac   :  { %5820 = vsyncadd [#allocation7], 4294967168 }
  0xad   :  { %5821 = dma.done.wait [#allocation10], 640  }
  0xae   :  { %5822 = vsyncadd [#allocation10], 4294966656 }
  0xaf   :  { %5823 = dma.done.wait [#allocation13], 32  }
  0xb0   :  { %5824 = vsyncadd [#allocation13], 4294967264 }
  0xb1   :  { %5825 = dma.done.wait [#allocation16], 512  }
  0xb2   :  { %5826 = vsyncadd [#allocation16], 4294966784 }
  0xb3   :  { %5827 = dma.done.wait [#allocation19], 528  }
  0xb4   :  { %5828 = vsyncadd [#allocation19], 4294966768  ;;  %v7581_v0 = vmov 0.0|0.0   ;;  %v181_v1 = vlaneseq  ;;  %vm5845_vm0 = vmmov 0   ;;  %v7579_v2 = vmov 0.0   ;;  %v189_v4 = vld [vmem:[%s7559_s4] sm:$0xff] }
  0xb5   :  { %5464 = vmatprep.subr.bf16.mxu0 %v7581_v0  ;;  %5470 = vmatprep.subr.bf16.mxu1 %v7581_v0  ;;  %v190_v5 = vld [vmem:[%s7559_s4 + $0x8] sm:$0xff]  ;;  %v267_v6 = vld [vmem:[#allocation11] sm:$0xff]  ;;  %v191_v10 = vld [vmem:[%s7559_s4 + $0x10] sm:$0xff]  ;;  %s7689_s24 = sld [smem:[#allocation86_spill]]  ;;  %vm193_vm2 = vcmask 261120   ;;  %vm494_vm7 = vcmask 64512  }
  0xb6   :  { %5081 = vmatprep.mubr.msk.f32.mxu0 %vm5845_vm0, %v7579_v2  ;;  %5092 = vmatprep.mubr.msk.f32.mxu1 %vm5845_vm0, %v7579_v2  ;;  %v6078_v3 = vshrl.u32 %v181_v1, 7  ;;  %v5465_v8 = vpack.c.bf16 %v190_v5, %v189_v4  ;;  %v268_v9 = vld [vmem:[#allocation11 + $0x8] sm:$0xff]  ;;  %v192_v11 = vld [vmem:[%s7559_s4 + $0x18] sm:$0xff]  ;;  %v269_v13 = vld [vmem:[#allocation11 + $0x10] sm:$0xff]  ;;  %s5847_s4 = smov 32   ;;  %vm347_vm11 = vcmask 281600  }
  0xb7   :  { %v5471_v12 = vpack.c.bf16 %v268_v9, %v267_v6  ;;  %v270_v14 = vld [vmem:[#allocation11 + $0x18] sm:$0xff]  ;;  %v5468_v15 = vpack.c.bf16 %v192_v11, %v191_v10  ;;  %v359_v17 = vld [vmem:[#allocation6 + $0x1] ss:$2 sm:$0xf]  ;;  %vm591_vm12 = vcmask 1043456   ;;  %s5848_s23 = smov 96  }
  0xb8   :  { %7688 = vst [vmem:[#allocation28_spill] sm:$0xff] %v6078_v3  ;;  %v370_v7 = vsub.s32 1, %v6078_v3  ;;  %5466 = vmatpush3.bf16.msra.mxu0 %v5465_v8  ;;  %v5474_v18 = vpack.c.bf16 %v270_v14, %v269_v13  ;;  %v188_v22 = vld [vmem:[#allocation9] sm:$0xff]  ;;  %v366_v25 = vsub.s32 0, %v6078_v3  ;;  %v374_v26 = vsub.s32 2, %v6078_v3  ;;  %s7787_s2 = sld [smem:[#allocation87_spill]] }
  0xb9   :  { %5472 = vmatpush3.bf16.msra.mxu1 %v5471_v12  ;;  %5467 = vmatprep.subr.bf16.mxu0 %v7581_v0  ;;  %v357_v33 = vld [vmem:[#allocation6] ss:$2 sm:$0xf]  ;;  %v378_v45 = vsub.s32 3, %v6078_v3  ;;  %vm1656_vm13 = vcmask 23552   ;;  %s5851_s8 = smov [#allocation21]  }
  0xba   :  { %v403_v20 = vrot.slane %v359_v17, %v370_v7  ;;  %5473 = vmatprep.subr.bf16.mxu1 %v7581_v0  ;;  %v399_v27 = vrot.slane %v359_v17, %v366_v25  ;;  %v407_v28 = vrot.slane %v359_v17, %v374_v26  ;;  %v6108_v34 = vrot.slane %v357_v33, %v366_v25 }
  0xbb   :  { %v187_v16 = vld [vmem:[%s7689_s24] sm:$0xff]  ;;  %v6116_v37 = vrot.slane %v357_v33, %v370_v7  ;;  %v6125_v42 = vrot.slane %v357_v33, %v374_v26  ;;  %v411_v46 = vrot.slane %v359_v17, %v378_v45  ;;  %v6134_v47 = vrot.slane %v357_v33, %v378_v45 }
  0xbc   :  { %v349_v19 = vsub.f32 0.0, %v187_v16  ;;  %vm413_vm1 = vcmp.eq.s32.totalorder %v6078_v3, %v403_v20  ;;  %5469 = vmatpush3.bf16.msra.mxu0 %v5468_v15  ;;  %vm412_vm3 = vcmp.eq.s32.totalorder %v6078_v3, %v399_v27  ;;  %vm414_vm4 = vcmp.eq.s32.totalorder %v6078_v3, %v407_v28  ;;  %7690 = vst [vmem:[#allocation29_spill] sm:$0xff] %v6108_v34 }
  0xbd   :  { %v4586_v23 = vsel %vm413_vm1, 1.0, %v7579_v2  ;;  %5475 = vmatpush3.bf16.msra.mxu1 %v5474_v18  ;;  %v4585_v29 = vsel %vm412_vm3, 1.0, %v7579_v2  ;;  %v4587_v30 = vsel %vm414_vm4, 1.0, %v7579_v2  ;;  %vm380_vm5 = vcmp.eq.s32.totalorder %v6078_v3, %v6108_v34  ;;  %7691 = vst [vmem:[#allocation30_spill] sm:$0xff] %v6116_v37  ;;  %7692 = vst [vmem:[#allocation31_spill] sm:$0xff] %v6125_v42 }
  0xbe   :  { %v5584_v21 = vpack.i.bf16 %v187_v16, %v349_v19  ;;  %v425_v24 = vpack.c.bf16 %v4586_v23, %v4586_v23  ;;  %v424_v31 = vpack.c.bf16 %v4585_v29, %v4585_v29  ;;  %v426_v32 = vpack.c.bf16 %v4587_v30, %v4587_v30  ;;  %7693 = vst [vmem:[#allocation32_spill] sm:$0xff] %v6134_v47  ;;  %vm4825_vm15 = vmpackc.low %vm380_vm5, %vm380_vm5 }
  0xbf   :  { %5082 = vmatmul.mubr.msk.f32.vlgmr.msra.gmra.mrb[0].mxu0 %vm193_vm2, %v188_v22  ;;  %v4581_v35 = vsel %vm380_vm5, 1.0, %v7579_v2  ;;  %vm381_vm6 = vcmp.eq.s32.totalorder %v6078_v3, %v6116_v37  ;;  %vm382_vm8 = vcmp.eq.s32.totalorder %v6078_v3, %v6125_v42  ;;  %vm415_vm9 = vcmp.eq.s32.totalorder %v6078_v3, %v411_v46 }
  0xc0   :  { %5585 = vrot.lane.b32.xlu0 %v5584_v21, %s5847_s4  ;;  %446 = vxpose.xlu1.c.b16.start.end [1/1] (short) %v425_v24, 128  ;;  %v392_v36 = vpack.c.bf16 %v4581_v35, %v4581_v35  ;;  %v4582_v38 = vsel %vm381_vm6, 1.0, %v7579_v2  ;;  %v4583_v43 = vsel %vm382_vm8, 1.0, %v7579_v2  ;;  %vm383_vm10 = vcmp.eq.s32.totalorder %v6078_v3, %v6134_v47  ;;  %vm4823_vm14 = vmpackc.low %vm381_vm6, %vm381_vm6 }
  0xc1   :  { %5093 = vmatmul.mubr.msk.f32.vlgmr.msra.gmra.mrb[0].mxu1 %vm193_vm2, %v188_v22  ;;  %v393_v39 = vpack.c.bf16 %v4582_v38, %v4582_v38  ;;  %v394_v44 = vpack.c.bf16 %v4583_v43, %v4583_v43  ;;  %v4588_v48 = vsel %vm415_vm9, 1.0, %v7579_v2  ;;  %v4584_v49 = vsel %vm383_vm10, 1.0, %v7579_v2  ;;  %vm4827_vm1 = vmpackc.low %vm383_vm10, %vm383_vm10 }
  0xc2   :  { %v427_v50 = vpack.c.bf16 %v4588_v48, %v4588_v48  ;;  %v395_v51 = vpack.c.bf16 %v4584_v49, %v4584_v49  ;;  %vm4829_vm3 = vmpackc.low %vm382_vm8, %vm382_vm8  ;;  %vm179_vm4 = vcmask 285696  }
  0xdd   :  { %462 = vxpose.xlu1.c.b16.start.end [1/1] (short) %v426_v32, 128 }
  0xde   :  { %430 = vxpose.xlu0.c.b16.start.end [1/1] (short) %v424_v31, 128 }
  0xfa   :  { %884 = vxpose.xlu1.c.b16.start.end [1/1] (short) %v392_v36, 128 }
  0xfb   :  { %900 = vxpose.xlu0.c.b16.start.end [1/1] (short) %v393_v39, 128 }
 0x117   :  { %916 = vxpose.xlu1.c.b16.start.end [1/1] (short) %v394_v44, 128 }
 0x118   :  { %478 = vxpose.xlu0.c.b16.start.end [1/1] (short) %v427_v50, 128 }
 0x126   :  { %v454_v53 = vpop.trf.xlu1 }
 0x12a   :  { %v455_v58 = vpop.trf.xlu1 }
 0x12e   :  { %v456_v6 = vpop.trf.xlu1 }
 0x132   :  { %v5586_v40 = vpop.permute.xlu0 %5585  ;;  %v457_v10 = vpop.trf.xlu1 }
 0x133   :  { %v5588_v55 = vunpack.i.h.bf16 %v5586_v40  ;;  %v5587_v56 = vunpack.i.l.bf16 %v5586_v40 }
 0x134   :  { %932 = vxpose.xlu1.c.b16.start.end [1/1] (short) %v395_v51, 128 }
 0x136   :  { %v458_v14 = vpop.trf.xlu1 }
 0x13a   :  { %v459_v16 = vpop.trf.xlu1 }
 0x13e   :  { %v460_v19 = vpop.trf.xlu1 }
 0x142   :  { %v461_v21 = vpop.trf.xlu1 }
 0x144   :  { %v438_v41 = vpop.trf.xlu0 }
 0x145   :  { %5097 = vmatprep.mubr.msk.bf16.mxu0 %vm494_vm7, %v438_v41 }
 0x146   :  { %v470_v23 = vpop.trf.xlu1 }
 0x148   :  { %v439_v52 = vpop.trf.xlu0 }
 0x14a   :  { %v471_v25 = vpop.trf.xlu1 }
 0x14c   :  { %v440_v54 = vpop.trf.xlu0 }
 0x14e   :  { %v472_v27 = vpop.trf.xlu1 }
 0x150   :  { %v441_v4 = vpop.trf.xlu0 }
 0x152   :  { %v473_v29 = vpop.trf.xlu1 }
 0x154   :  { %v442_v7 = vpop.trf.xlu0 }
 0x156   :  { %v474_v31 = vpop.trf.xlu1 }
 0x158   :  { %v443_v12 = vpop.trf.xlu0 }
 0x15a   :  { %v475_v33 = vpop.trf.xlu1 }
 0x15c   :  { %v444_v15 = vpop.trf.xlu0 }
 0x15e   :  { %v476_v36 = vpop.trf.xlu1 }
 0x160   :  { %v445_v17 = vpop.trf.xlu0 }
 0x162   :  { %v477_v40 = vpop.trf.xlu1 }
 0x164   :  { %v6150_v18 = vpop.trf.xlu0 }
 0x166   :  { %v892_v43 = vpop.trf.xlu1 }
 0x168   :  { %v6154_v20 = vpop.trf.xlu0 }
 0x16a   :  { %v893_v46 = vpop.trf.xlu1 }
 0x16c   :  { %v6158_v22 = vpop.trf.xlu0 }
 0x16e   :  { %v894_v49 = vpop.trf.xlu1 }
 0x170   :  { %v6160_v24 = vpop.trf.xlu0 }
 0x172   :  { %v895_v51 = vpop.trf.xlu1 }
 0x174   :  { %v912_v26 = vpop.trf.xlu0 }
 0x178   :  { %v913_v28 = vpop.trf.xlu0 }
 0x17c   :  { %v914_v30 = vpop.trf.xlu0 }
 0x180   :  { %v915_v32 = vpop.trf.xlu0 }
 0x184   :  { %v486_v35 = vpop.trf.xlu0 }
 0x185   :  { %5145 = vmatprep.mubr.msk.bf16.mxu1 %vm494_vm7, %v486_v35 }
 0x188   :  { %v487_v38 = vpop.trf.xlu0 }
 0x18c   :  { %v488_v39 = vpop.trf.xlu0 }
 0x190   :  { %v489_v41 = vpop.trf.xlu0 }
 0x192   :  { %v263_v57 = vpop.f32.mrb[0].mxu0 }
 0x193   :  { %v345_v59 = vsel %vm193_vm2, %v263_v57, %v5588_v55  ;;  %v5083_v61 = vpop.f32.mrb[1].mxu0 }
 0x194   :  { %v337_v60 = vpop.f32.mrb[0].mxu1  ;;  %v346_v62 = vpack.c.bf16 %v345_v59, %v345_v59  ;;  %v490_v44 = vpop.trf.xlu0 }
 0x195   :  { %v354_v63 = vsel %vm193_vm2, %v337_v60, %v5587_v56  ;;  %v5094_v1 = vpop.f32.mrb[1].mxu1 }
 0x196   :  { %v355_v5 = vpack.c.bf16 %v354_v63, %v354_v63  ;;  %348 = vst.msk [vmem:[#allocation3] sm:$0xf] %vm347_vm11, %v346_v62 }
 0x198   :  { %356 = vst.msk [vmem:[#allocation4] sm:$0xf] %vm347_vm11, %v355_v5  ;;  %v491_v45 = vpop.trf.xlu0 }
 0x19c   :  { %v492_v48 = vpop.trf.xlu0 }
 0x19d   :  { %v428_v11 = vld [vmem:[#allocation3] sm:$0xf] }
 0x19e   :  { %v1045_v13 = vsel %vm591_vm12, %v428_v11, 0 }
 0x19f   :  { %v429_v8 = vld [vmem:[#allocation4] sm:$0xf] }
 0x1a0   :  { %5560 = vmatprep.subr.msk.bf16.mxu0 %vm591_vm12, %v429_v8  ;;  %5561 = vmatprep.subr.msk.bf16.mxu1 %vm591_vm12, %v429_v8  ;;  %v593_v9 = vsel %vm591_vm12, %v429_v8, 0  ;;  %v493_v50 = vpop.trf.xlu0 }
 0x1a1   :  { %5096 = vmatpush3.bf16.msra.mxu0 %v593_v9  ;;  %5495 = vmatpush3.bf16.msra.mxu1 %v593_v9 }
 0x1a2   :  { %5562 = vmatprep.subr.msk.bf16.mxu0 %vm591_vm12, %v428_v11 }
 0x1a4   :  { %5098 = vmatmul.mubr.msk.bf16.vlgmr.msra.gmra.mrb[4].mxu0 %vm494_vm7, %v439_v52  ;;  %5146 = vmatmul.mubr.msk.bf16.vlgmr.msra.gmra.mrb[4].mxu1 %vm494_vm7, %v487_v38  ;;  %v896_v52 = vpop.trf.xlu1 }
 0x1a5   :  { %5162 = vmatpush3.bf16.msra.mxu0 %v1045_v13  ;;  %5101 = vmatprep.mubr.msk.bf16.mxu0 %vm494_vm7, %v440_v54 }
 0x1a6   :  { %5149 = vmatprep.mubr.msk.bf16.mxu1 %vm494_vm7, %v488_v39 }
 0x1ac   :  { %5102 = vmatmul.mubr.msk.bf16.gmra.mrb[8].mxu0 %vm494_vm7, %v441_v4  ;;  %5150 = vmatmul.mubr.msk.bf16.gmra.mrb[8].mxu1 %vm494_vm7, %v489_v41 }
 0x1ad   :  { %5105 = vmatprep.mubr.msk.bf16.mxu0 %vm494_vm7, %v442_v7  ;;  %5153 = vmatprep.mubr.msk.bf16.mxu1 %vm494_vm7, %v490_v44 }
 0x1b4   :  { %5106 = vmatmul.mubr.msk.bf16.gmra.mrb[12].mxu0 %vm494_vm7, %v443_v12  ;;  %5154 = vmatmul.mubr.msk.bf16.gmra.mrb[12].mxu1 %vm494_vm7, %v491_v45 }
 0x1b5   :  { %5109 = vmatprep.mubr.msk.bf16.mxu0 %vm494_vm7, %v444_v15  ;;  %5157 = vmatprep.mubr.msk.bf16.mxu1 %vm494_vm7, %v492_v48 }
 0x1bc   :  { %5110 = vmatmul.mubr.msk.bf16.gmra.mrb[16].mxu0 %vm494_vm7, %v445_v17  ;;  %5158 = vmatmul.mubr.msk.bf16.gmra.mrb[16].mxu1 %vm494_vm7, %v493_v50 }
 0x1bd   :  { %5113 = vmatprep.mubr.msk.bf16.mxu0 %vm494_vm7, %v454_v53  ;;  %v897_v53 = vpop.trf.xlu1 }
 0x1c1   :  { %v898_v54 = vpop.trf.xlu1 }
 0x1c4   :  { %5114 = vmatmul.mubr.msk.bf16.gmra.mrb[20].mxu0 %vm494_vm7, %v455_v58 }
 0x1c5   :  { %5117 = vmatprep.mubr.msk.bf16.mxu0 %vm494_vm7, %v456_v6  ;;  %v899_v55 = vpop.trf.xlu1 }
 0x1c9   :  { %v924_v56 = vpop.trf.xlu1 }
 0x1cc   :  { %5118 = vmatmul.mubr.msk.bf16.gmra.mrb[24].mxu0 %vm494_vm7, %v457_v10 }
 0x1cd   :  { %5121 = vmatprep.mubr.msk.bf16.mxu0 %vm494_vm7, %v458_v14  ;;  %v925_v57 = vpop.trf.xlu1 }
 0x1d1   :  { %v926_v58 = vpop.trf.xlu1 }
 0x1d4   :  { %5122 = vmatmul.mubr.msk.bf16.gmra.mrb[28].mxu0 %vm494_vm7, %v459_v16 }
 0x1d5   :  { %5125 = vmatprep.mubr.msk.bf16.mxu0 %vm494_vm7, %v460_v19  ;;  %v927_v59 = vpop.trf.xlu1 }
 0x1d9   :  { %v928_v60 = vpop.trf.xlu1 }
 0x1dc   :  { %5126 = vmatmul.mubr.msk.bf16.gmra.mrb[32].mxu0 %vm494_vm7, %v461_v21 }
 0x1dd   :  { %5129 = vmatprep.mubr.msk.bf16.mxu0 %vm494_vm7, %v470_v23  ;;  %v929_v61 = vpop.trf.xlu1 }
 0x1e1   :  { %v930_v62 = vpop.trf.xlu1 }
 0x1e4   :  { %5130 = vmatmul.mubr.msk.bf16.gmra.mrb[36].mxu0 %vm494_vm7, %v471_v25 }
 0x1e5   :  { %5133 = vmatprep.mubr.msk.bf16.mxu0 %vm494_vm7, %v472_v27  ;;  %v931_v63 = vpop.trf.xlu1 }
 0x1e9   :  { %v940_v1 = vpop.trf.xlu1 }
 0x1ec   :  { %5134 = vmatmul.mubr.msk.bf16.gmra.mrb[40].mxu0 %vm494_vm7, %v473_v29 }
 0x1ed   :  { %5137 = vmatprep.mubr.msk.bf16.mxu0 %vm494_vm7, %v474_v31  ;;  %v941_v4 = vpop.trf.xlu1 }
 0x1f1   :  { %v942_v5 = vpop.trf.xlu1 }
 0x1f4   :  { %5138 = vmatmul.mubr.msk.bf16.gmra.mrb[44].mxu0 %vm494_vm7, %v475_v33 }
 0x1f5   :  { %5141 = vmatprep.mubr.msk.bf16.mxu0 %vm494_vm7, %v476_v36  ;;  %v943_v6 = vpop.trf.xlu1 }
 0x1f9   :  { %v944_v7 = vpop.trf.xlu1 }
 0x1fc   :  { %5142 = vmatmul.mubr.msk.bf16.gmra.mrb[48].mxu0 %vm494_vm7, %v477_v40 }
 0x1fd   :  { %5163 = vmatprep.mubr.msk.bf16.mxu0 %vm494_vm7, %v892_v43  ;;  %v945_v8 = vpop.trf.xlu1 }
 0x201   :  { %v946_v9 = vpop.trf.xlu1 }
 0x204   :  { %5164 = vmatmul.mubr.msk.bf16.vlgmr.msra.gmra.mrb[4].mxu0 %vm494_vm7, %v893_v46 }
 0x205   :  { %5167 = vmatprep.mubr.msk.bf16.mxu0 %vm494_vm7, %v894_v49  ;;  %v947_v10 = vpop.trf.xlu1 }
 0x20c   :  { %5168 = vmatmul.mubr.msk.bf16.gmra.mrb[8].mxu0 %vm494_vm7, %v895_v51 }
 0x20d   :  { %5171 = vmatprep.mubr.msk.bf16.mxu0 %vm494_vm7, %v896_v52 }
 0x214   :  { %5172 = vmatmul.mubr.msk.bf16.gmra.mrb[12].mxu0 %vm494_vm7, %v897_v53 }
 0x215   :  { %5175 = vmatprep.mubr.msk.bf16.mxu0 %vm494_vm7, %v898_v54 }
 0x21c   :  { %5176 = vmatmul.mubr.msk.bf16.gmra.mrb[16].mxu0 %vm494_vm7, %v899_v55 }
 0x21d   :  { %5179 = vmatprep.mubr.msk.bf16.mxu0 %vm494_vm7, %v6150_v18 }
 0x224   :  { %5180 = vmatmul.mubr.msk.bf16.gmra.mrb[20].mxu0 %vm494_vm7, %v6154_v20 }
 0x225   :  { %5183 = vmatprep.mubr.msk.bf16.mxu0 %vm494_vm7, %v6158_v22 }
 0x22c   :  { %5184 = vmatmul.mubr.msk.bf16.gmra.mrb[24].mxu0 %vm494_vm7, %v6160_v24 }
 0x22d   :  { %5187 = vmatprep.mubr.msk.bf16.mxu0 %vm494_vm7, %v912_v26 }
 0x234   :  { %5188 = vmatmul.mubr.msk.bf16.gmra.mrb[28].mxu0 %vm494_vm7, %v913_v28 }
 0x235   :  { %5191 = vmatprep.mubr.msk.bf16.mxu0 %vm494_vm7, %v914_v30 }
 0x23c   :  { %5192 = vmatmul.mubr.msk.bf16.gmra.mrb[32].mxu0 %vm494_vm7, %v915_v32 }
 0x23d   :  { %5195 = vmatprep.mubr.msk.bf16.mxu0 %vm494_vm7, %v924_v56 }
 0x244   :  { %5196 = vmatmul.mubr.msk.bf16.gmra.mrb[36].mxu0 %vm494_vm7, %v925_v57 }
 0x245   :  { %5199 = vmatprep.mubr.msk.bf16.mxu0 %vm494_vm7, %v926_v58 }
 0x24c   :  { %5200 = vmatmul.mubr.msk.bf16.gmra.mrb[40].mxu0 %vm494_vm7, %v927_v59 }
 0x24d   :  { %5203 = vmatprep.mubr.msk.bf16.mxu0 %vm494_vm7, %v928_v60 }
 0x254   :  { %5204 = vmatmul.mubr.msk.bf16.gmra.mrb[44].mxu0 %vm494_vm7, %v929_v61 }
 0x255   :  { %5207 = vmatprep.mubr.msk.bf16.mxu0 %vm494_vm7, %v930_v62 }
 0x25c   :  { %5208 = vmatmul.mubr.msk.bf16.gmra.mrb[48].mxu0 %vm494_vm7, %v931_v63 }
 0x25d   :  { %5211 = vmatprep.mubr.msk.bf16.mxu0 %vm494_vm7, %v940_v1 }
 0x264   :  { %5212 = vmatmul.mubr.msk.bf16.gmra.mrb[52].mxu0 %vm494_vm7, %v941_v4 }
 0x265   :  { %5215 = vmatprep.mubr.msk.bf16.mxu0 %vm494_vm7, %v942_v5 }
 0x26c   :  { %5216 = vmatmul.mubr.msk.bf16.gmra.mrb[56].mxu0 %vm494_vm7, %v943_v6 }
 0x26d   :  { %5219 = vmatprep.mubr.msk.bf16.mxu0 %vm494_vm7, %v944_v7 }
 0x274   :  { %5220 = vmatmul.mubr.msk.bf16.gmra.mrb[60].mxu0 %vm494_vm7, %v945_v8 }
 0x275   :  { %5223 = vmatprep.mubr.msk.bf16.mxu0 %vm494_vm7, %v946_v9 }
 0x277   :  { %v6221_v11 = vpop.f32.mrb[4].mxu1 }
 0x278   :  { %v6223_v12 = vpop.f32.mrb[5].mxu1 }
 0x279   :  { %v6225_v13 = vpop.f32.mrb[6].mxu1 }
 0x27a   :  { %v6227_v14 = vpop.f32.mrb[7].mxu1 }
 0x27c   :  { %5224 = vmatmul.mubr.msk.bf16.gmra.mrb[64].mxu0 %vm494_vm7, %v947_v10 }
 0x27f   :  { %v6229_v15 = vpop.f32.mrb[8].mxu1 }
 0x280   :  { %v6231_v16 = vpop.f32.mrb[9].mxu1 }
 0x281   :  { %v6233_v17 = vpop.f32.mrb[10].mxu1 }
 0x282   :  { %v6235_v18 = vpop.f32.mrb[11].mxu1 }
 0x287   :  { %v6248_v24 = vpop.f32.mrb[12].mxu1 }
 0x288   :  { %v6252_v26 = vpop.f32.mrb[13].mxu1 }
 0x289   :  { %v6256_v28 = vpop.f32.mrb[14].mxu1 }
 0x28a   :  { %v6259_v29 = vpop.f32.mrb[15].mxu1 }
 0x2d7   :  { %v6237_v19 = vpop.f32.mrb[4].mxu0 }
 0x2d8   :  { %v1338_v20 = vmul.f32 %v6237_v19, %v6237_v19  ;;  %v6241_v21 = vpop.f32.mrb[5].mxu0 }
 0x2d9   :  { %7694 = vst [vmem:[#allocation33_spill] sm:$0xff] %v6241_v21  ;;  %v6243_v22 = vpop.f32.mrb[6].mxu0  ;;  %v1336_v27 = vmul.f32 %v6241_v21, %v6241_v21 }
 0x2da   :  { %1468 = vrot.lane.b32.xlu0 %v1338_v20, %s5848_s23  ;;  %v6246_v23 = vpop.f32.mrb[7].mxu0  ;;  %v1339_v31 = vmul.f32 %v6243_v22, %v6243_v22 }
 0x2db   :  { %v1337_v25 = vmul.f32 %v6246_v23, %v6246_v23 }
 0x2dd   :  { %1466 = vrot.lane.b32.xlu1 %v1337_v25, %s5848_s23 }
 0x2de   :  { %1464 = vrot.lane.b32.xlu0 %v1336_v27, %s5848_s23 }
 0x2df   :  { %v6262_v30 = vpop.f32.mrb[8].mxu0 }
 0x2e0   :  { %v6266_v32 = vpop.f32.mrb[9].mxu0  ;;  %v1342_v36 = vmul.f32 %v6262_v30, %v6262_v30 }
 0x2e1   :  { %v6268_v33 = vpop.f32.mrb[10].mxu0  ;;  %v1340_v39 = vmul.f32 %v6266_v32, %v6266_v32 }
 0x2e2   :  { %1470 = vrot.lane.b32.xlu0 %v1339_v31, %s5848_s23  ;;  %v6271_v35 = vpop.f32.mrb[11].mxu0  ;;  %v1343_v45 = vmul.f32 %v6268_v33, %v6268_v33 }
 0x2e3   :  { %v1341_v49 = vmul.f32 %v6271_v35, %v6271_v35 }
 0x2e6   :  { %1476 = vrot.lane.b32.xlu0 %v1342_v36, %s5848_s23 }
 0x2e7   :  { %v6276_v38 = vpop.f32.mrb[12].mxu0 }
 0x2e8   :  { %v1346_v40 = vmul.f32 %v6276_v38, %v6276_v38  ;;  %v6282_v41 = vpop.f32.mrb[13].mxu0 }
 0x2e9   :  { %v6284_v43 = vpop.f32.mrb[14].mxu0  ;;  %v1344_v46 = vmul.f32 %v6282_v41, %v6282_v41 }
 0x2ea   :  { %1472 = vrot.lane.b32.xlu0 %v1340_v39, %s5848_s23  ;;  %1484 = vrot.lane.b32.xlu1 %v1346_v40, %s5848_s23  ;;  %v6288_v44 = vpop.f32.mrb[15].mxu0  ;;  %v1347_v54 = vmul.f32 %v6284_v43, %v6284_v43 }
 0x2eb   :  { %v1345_v57 = vmul.f32 %v6288_v44, %v6288_v44 }
 0x2ee   :  { %1478 = vrot.lane.b32.xlu0 %v1343_v45, %s5848_s23  ;;  %1480 = vrot.lane.b32.xlu1 %v1344_v46, %s5848_s23 }
 0x2ef   :  { %v6296_v48 = vpop.f32.mrb[16].mxu0 }
 0x2f0   :  { %v1350_v50 = vmul.f32 %v6296_v48, %v6296_v48  ;;  %v6302_v51 = vpop.f32.mrb[17].mxu0 }
 0x2f1   :  { %v6304_v52 = vpop.f32.mrb[18].mxu0  ;;  %v1348_v55 = vmul.f32 %v6302_v51, %v6302_v51 }
 0x2f2   :  { %1474 = vrot.lane.b32.xlu0 %v1341_v49, %s5848_s23  ;;  %1492 = vrot.lane.b32.xlu1 %v1350_v50, %s5848_s23  ;;  %v6308_v53 = vpop.f32.mrb[19].mxu0  ;;  %v1351_v62 = vmul.f32 %v6304_v52, %v6304_v52 }
 0x2f3   :  { %v1349_v4 = vmul.f32 %v6308_v53, %v6308_v53 }
 0x2f6   :  { %1486 = vrot.lane.b32.xlu0 %v1347_v54, %s5848_s23  ;;  %1488 = vrot.lane.b32.xlu1 %v1348_v55, %s5848_s23 }
 0x2f7   :  { %v6316_v56 = vpop.f32.mrb[20].mxu0 }
 0x2f8   :  { %v1354_v58 = vmul.f32 %v6316_v56, %v6316_v56  ;;  %v6322_v59 = vpop.f32.mrb[21].mxu0 }
 0x2f9   :  { %v6324_v60 = vpop.f32.mrb[22].mxu0  ;;  %v1352_v63 = vmul.f32 %v6322_v59, %v6322_v59 }
 0x2fa   :  { %1482 = vrot.lane.b32.xlu0 %v1345_v57, %s5848_s23  ;;  %1500 = vrot.lane.b32.xlu1 %v1354_v58, %s5848_s23  ;;  %v6328_v61 = vpop.f32.mrb[23].mxu0  ;;  %v1355_v9 = vmul.f32 %v6324_v60, %v6324_v60 }
 0x2fb   :  { %v1353_v25 = vmul.f32 %v6328_v61, %v6328_v61 }
 0x2fe   :  { %1494 = vrot.lane.b32.xlu0 %v1351_v62, %s5848_s23  ;;  %1496 = vrot.lane.b32.xlu1 %v1352_v63, %s5848_s23 }
 0x2ff   :  { %v6336_v1 = vpop.f32.mrb[24].mxu0 }
 0x300   :  { %v1358_v5 = vmul.f32 %v6336_v1, %v6336_v1  ;;  %v6342_v6 = vpop.f32.mrb[25].mxu0 }
 0x301   :  { %v6344_v7 = vpop.f32.mrb[26].mxu0  ;;  %v1356_v10 = vmul.f32 %v6342_v6, %v6342_v6 }
 0x302   :  { %1490 = vrot.lane.b32.xlu0 %v1349_v4, %s5848_s23  ;;  %1508 = vrot.lane.b32.xlu1 %v1358_v5, %s5848_s23  ;;  %v6348_v8 = vpop.f32.mrb[27].mxu0  ;;  %v1359_v40 = vmul.f32 %v6344_v7, %v6344_v7  ;;  %v6398_v4 = vpop.f32.mrb[16].mxu1 }
 0x303   :  { %v1357_v49 = vmul.f32 %v6348_v8, %v6348_v8 }
 0x306   :  { %1502 = vrot.lane.b32.xlu0 %v1355_v9, %s5848_s23  ;;  %1504 = vrot.lane.b32.xlu1 %v1356_v10, %s5848_s23 }
 0x307   :  { %v6356_v20 = vpop.f32.mrb[28].mxu0 }
 0x308   :  { %v1362_v27 = vmul.f32 %v6356_v20, %v6356_v20  ;;  %v6362_v31 = vpop.f32.mrb[29].mxu0 }
 0x309   :  { %v6364_v36 = vpop.f32.mrb[30].mxu0  ;;  %v1360_v45 = vmul.f32 %v6362_v31, %v6362_v31 }
 0x30a   :  { %1498 = vrot.lane.b32.xlu0 %v1353_v25, %s5848_s23  ;;  %1516 = vrot.lane.b32.xlu1 %v1362_v27, %s5848_s23  ;;  %v6368_v39 = vpop.f32.mrb[31].mxu0  ;;  %v1363_v58 = vmul.f32 %v6364_v36, %v6364_v36  ;;  %v6406_v25 = vpop.f32.mrb[17].mxu1 }
 0x30b   :  { %v1361_v5 = vmul.f32 %v6368_v39, %v6368_v39 }
 0x30e   :  { %1510 = vrot.lane.b32.xlu0 %v1359_v40, %s5848_s23  ;;  %1512 = vrot.lane.b32.xlu1 %v1360_v45, %s5848_s23  ;;  %v6410_v40 = vpop.f32.mrb[18].mxu1 }
 0x30f   :  { %v6376_v46 = vpop.f32.mrb[32].mxu0 }
 0x310   :  { %v1366_v50 = vmul.f32 %v6376_v46, %v6376_v46  ;;  %v6382_v54 = vpop.f32.mrb[33].mxu0 }
 0x311   :  { %7695 = vst [vmem:[#allocation34_spill] sm:$0xff] %v6382_v54  ;;  %v6384_v55 = vpop.f32.mrb[34].mxu0  ;;  %v1364_v62 = vmul.f32 %v6382_v54, %v6382_v54 }
 0x312   :  { %7696 = vst [vmem:[#allocation35_spill] sm:$0xff] %v6384_v55  ;;  %1506 = vrot.lane.b32.xlu0 %v1357_v49, %s5848_s23  ;;  %1524 = vrot.lane.b32.xlu1 %v1366_v50, %s5848_s23  ;;  %v6388_v57 = vpop.f32.mrb[35].mxu0  ;;  %v6416_v49 = vpop.f32.mrb[19].mxu1  ;;  %v1367_v50 = vmul.f32 %v6384_v55, %v6384_v55 }
 0x313   :  { %7697 = vst [vmem:[#allocation36_spill] sm:$0xff] %v6388_v57 }
 0x316   :  { %1518 = vrot.lane.b32.xlu0 %v1363_v58, %s5848_s23  ;;  %1520 = vrot.lane.b32.xlu1 %v1364_v62, %s5848_s23 }
 0x317   :  { %v6396_v63 = vpop.f32.mrb[36].mxu0 }
 0x318   :  { %7698 = vst [vmem:[#allocation37_spill] sm:$0xff] %v6396_v63  ;;  %v1370_v9 = vmul.f32 %v6396_v63, %v6396_v63  ;;  %v6404_v10 = vpop.f32.mrb[37].mxu0 }
 0x319   :  { %7699 = vst [vmem:[#allocation38_spill] sm:$0xff] %v6404_v10  ;;  %v6408_v27 = vpop.f32.mrb[38].mxu0  ;;  %v1368_v58 = vmul.f32 %v6404_v10, %v6404_v10 }
 0x31a   :  { %7700 = vst [vmem:[#allocation39_spill] sm:$0xff] %v6408_v27  ;;  %1514 = vrot.lane.b32.xlu0 %v1361_v5, %s5848_s23  ;;  %1532 = vrot.lane.b32.xlu1 %v1370_v9, %s5848_s23  ;;  %v6414_v45 = vpop.f32.mrb[39].mxu0  ;;  %v1365_v5 = vmul.f32 %v6388_v57, %v6388_v57  ;;  %v1371_v9 = vmul.f32 %v6408_v27, %v6408_v27 }
 0x31b   :  { %7701 = vst [vmem:[#allocation40_spill] sm:$0xff] %v6414_v45 }
 0x31e   :  { %1526 = vrot.lane.b32.xlu0 %v1367_v50, %s5848_s23  ;;  %1528 = vrot.lane.b32.xlu1 %v1368_v58, %s5848_s23  ;;  %v1369_v50 = vmul.f32 %v6414_v45, %v6414_v45 }
 0x31f   :  { %v6424_v62 = vpop.f32.mrb[40].mxu0 }
 0x320   :  { %7702 = vst [vmem:[#allocation41_spill] sm:$0xff] %v6424_v62  ;;  %v6430_v2 = vpop.f32.mrb[41].mxu0  ;;  %v1374_v58 = vmul.f32 %v6424_v62, %v6424_v62 }
 0x321   :  { %7703 = vst [vmem:[#allocation42_spill] sm:$0xff] %v6430_v2  ;;  %v6432_v0 = vpop.f32.mrb[42].mxu0  ;;  %v1372_v34 = vmul.f32 %v6430_v2, %v6430_v2 }
 0x322   :  { %7704 = vst [vmem:[#allocation43_spill] sm:$0xff] %v6432_v0  ;;  %1522 = vrot.lane.b32.xlu0 %v1365_v5, %s5848_s23  ;;  %1534 = vrot.lane.b32.xlu1 %v1371_v9, %s5848_s23  ;;  %v6436_v42 = vpop.f32.mrb[43].mxu0 }
 0x323   :  { %7705 = vst [vmem:[#allocation44_spill] sm:$0xff] %v6436_v42  ;;  %v1373_v5 = vmul.f32 %v6436_v42, %v6436_v42 }
 0x326   :  { %1530 = vrot.lane.b32.xlu0 %v1369_v50, %s5848_s23  ;;  %1540 = vrot.lane.b32.xlu1 %v1374_v58, %s5848_s23  ;;  %v1375_v58 = vmul.f32 %v6432_v0, %v6432_v0 }
 0x327   :  { %v6444_v47 = vpop.f32.mrb[44].mxu0 }
 0x328   :  { %7706 = vst [vmem:[#allocation45_spill] sm:$0xff] %v6444_v47  ;;  %v6450_v9 = vpop.f32.mrb[45].mxu0  ;;  %v1378_v62 = vmul.f32 %v6444_v47, %v6444_v47 }
 0x329   :  { %7707 = vst [vmem:[#allocation46_spill] sm:$0xff] %v6450_v9  ;;  %v6452_v37 = vpop.f32.mrb[46].mxu0 }
 0x32a   :  { %7708 = vst [vmem:[#allocation47_spill] sm:$0xff] %v6452_v37  ;;  %1536 = vrot.lane.b32.xlu1 %v1372_v34, %s5848_s23  ;;  %1538 = vrot.lane.b32.xlu0 %v1373_v5, %s5848_s23  ;;  %v6456_v3 = vpop.f32.mrb[47].mxu0  ;;  %v1379_v47 = vmul.f32 %v6452_v37, %v6452_v37 }
 0x32b   :  { %7709 = vst [vmem:[#allocation48_spill] sm:$0xff] %v6456_v3  ;;  %v1377_v50 = vmul.f32 %v6456_v3, %v6456_v3 }
 0x32e   :  { %1542 = vrot.lane.b32.xlu1 %v1375_v58, %s5848_s23  ;;  %1546 = vrot.lane.b32.xlu0 %v1377_v50, %s5848_s23  ;;  %v1376_v58 = vmul.f32 %v6450_v9, %v6450_v9 }
 0x32f   :  { %v6464_v42 = vpop.f32.mrb[48].mxu0 }
 0x330   :  { %7710 = vst [vmem:[#allocation49_spill] sm:$0xff] %v6464_v42  ;;  %v6468_v34 = vpop.f32.mrb[49].mxu0  ;;  %v1382_v37 = vmul.f32 %v6464_v42, %v6464_v42 }
 0x331   :  { %7711 = vst [vmem:[#allocation50_spill] sm:$0xff] %v6468_v34  ;;  %v6470_v5 = vpop.f32.mrb[50].mxu0 }
 0x332   :  { %7712 = vst [vmem:[#allocation51_spill] sm:$0xff] %v6470_v5  ;;  %1548 = vrot.lane.b32.xlu1 %v1378_v62, %s5848_s23  ;;  %v6473_v27 = vpop.f32.mrb[51].mxu0 }
 0x333   :  { %7713 = vst [vmem:[#allocation52_spill] sm:$0xff] %v6473_v27  ;;  %v1381_v3 = vmul.f32 %v6473_v27, %v6473_v27 }
 0x335   :  { %1554 = vrot.lane.b32.xlu0 %v1381_v3, %s5848_s23 }
 0x336   :  { %1544 = vrot.lane.b32.xlu1 %v1376_v58, %s5848_s23 }
 0x337   :  { %v5213_v50 = vpop.f32.mrb[52].mxu0 }
 0x338   :  { %v6484_v0 = vadd.f32 %v5213_v50, %v6221_v11  ;;  %v1273_v62 = vpop.f32.mrb[53].mxu0 }
 0x339   :  { %v6487_v2 = vadd.f32 %v1273_v62, %v6223_v12  ;;  %v5214_v45 = vpop.f32.mrb[54].mxu0 }
 0x33a   :  { %7714 = vst [vmem:[#allocation53_spill] sm:$0xff] %v6484_v0  ;;  %v6490_v27 = vadd.f32 %v5214_v45, %v6225_v13  ;;  %1550 = vrot.lane.b32.xlu1 %v1379_v47, %s5848_s23  ;;  %v1276_v3 = vpop.f32.mrb[55].mxu0  ;;  %v1380_v13 = vmul.f32 %v6468_v34, %v6468_v34 }
 0x33b   :  { %7715 = vst [vmem:[#allocation54_spill] sm:$0xff] %v6487_v2  ;;  %v6494_v58 = vadd.f32 %v1276_v3, %v6227_v14 }
 0x33c   :  { %7716 = vst [vmem:[#allocation55_spill] sm:$0xff] %v6490_v27 }
 0x33d   :  { %7717 = vst [vmem:[#allocation56_spill] sm:$0xff] %v6494_v58  ;;  %v1385_v11 = vmul.f32 %v6494_v58, %v6494_v58 }
 0x33e   :  { %1556 = vrot.lane.b32.xlu1 %v1382_v37, %s5848_s23 }
 0x33f   :  { %v5217_v12 = vpop.f32.mrb[56].mxu0  ;;  %1562 = vrot.lane.b32.xlu0 %v1385_v11, %s5848_s23  ;;  %v1383_v11 = vmul.f32 %v6470_v5, %v6470_v5 }
 0x340   :  { %v6505_v47 = vadd.f32 %v5217_v12, %v6229_v15  ;;  %v1289_v45 = vpop.f32.mrb[57].mxu0 }
 0x341   :  { %v6508_v14 = vadd.f32 %v1289_v45, %v6231_v16  ;;  %v5218_v50 = vpop.f32.mrb[58].mxu0 }
 0x342   :  { %7718 = vst [vmem:[#allocation57_spill] sm:$0xff] %v6505_v47  ;;  %v6511_v62 = vadd.f32 %v5218_v50, %v6233_v17  ;;  %1552 = vrot.lane.b32.xlu1 %v1380_v13, %s5848_s23  ;;  %v1292_v37 = vpop.f32.mrb[59].mxu0  ;;  %v1386_v17 = vmul.f32 %v6484_v0, %v6484_v0 }
 0x343   :  { %7719 = vst [vmem:[#allocation58_spill] sm:$0xff] %v6508_v14  ;;  %v6515_v3 = vadd.f32 %v1292_v37, %v6235_v18 }
 0x344   :  { %7720 = vst [vmem:[#allocation59_spill] sm:$0xff] %v6511_v62 }
 0x345   :  { %7721 = vst [vmem:[#allocation60_spill] sm:$0xff] %v6515_v3  ;;  %v1389_v15 = vmul.f32 %v6515_v3, %v6515_v3 }
 0x346   :  { %1558 = vrot.lane.b32.xlu1 %v1383_v11, %s5848_s23 }
 0x347   :  { %1570 = vrot.lane.b32.xlu0 %v1389_v15, %s5848_s23  ;;  %v5221_v16 = vpop.f32.mrb[60].mxu0  ;;  %v1384_v15 = vmul.f32 %v6487_v2, %v6487_v2 }
 0x348   :  { %v6526_v12 = vadd.f32 %v5221_v16, %v6248_v24  ;;  %v1305_v13 = vpop.f32.mrb[61].mxu0 }
 0x349   :  { %v6529_v18 = vadd.f32 %v1305_v13, %v6252_v26  ;;  %v5222_v45 = vpop.f32.mrb[62].mxu0  ;;  %v1387_v26 = vmul.f32 %v6490_v27, %v6490_v27 }
 0x34a   :  { %7722 = vst [vmem:[#allocation61_spill] sm:$0xff] %v6526_v12  ;;  %1564 = vrot.lane.b32.xlu1 %v1386_v17, %s5848_s23  ;;  %v6533_v50 = vadd.f32 %v5222_v45, %v6256_v28  ;;  %v1308_v37 = vpop.f32.mrb[63].mxu0 }
 0x34b   :  { %7723 = vst [vmem:[#allocation62_spill] sm:$0xff] %v6529_v18  ;;  %v6536_v11 = vadd.f32 %v1308_v37, %v6259_v29 }
 0x34c   :  { %7724 = vst [vmem:[#allocation63_spill] sm:$0xff] %v6533_v50 }
 0x34d   :  { %7725 = vst [vmem:[#allocation64_spill] sm:$0xff] %v6536_v11 }
 0x34e   :  { %1560 = vrot.lane.b32.xlu1 %v1384_v15, %s5848_s23  ;;  %v1390_v15 = vmul.f32 %v6505_v47, %v6505_v47 }
 0x34f   :  { %v5225_v24 = vpop.f32.mrb[64].mxu0 }
 0x350   :  { %v6544_v16 = vadd.f32 %v5225_v24, %v6398_v4  ;;  %v1321_v17 = vpop.f32.mrb[65].mxu0  ;;  %v1388_v4 = vmul.f32 %v6508_v14, %v6508_v14  ;;  %v1467_v24 = vpop.permute.xlu1 %1466 }
 0x351   :  { %v6547_v28 = vadd.f32 %v1321_v17, %v6406_v25  ;;  %v5226_v13 = vpop.f32.mrb[66].mxu0  ;;  %v1391_v25 = vmul.f32 %v6511_v62, %v6511_v62  ;;  %v1392_v17 = vmul.f32 %v6529_v18, %v6529_v18 }
 0x352   :  { %7726 = vst [vmem:[#allocation65_spill] sm:$0xff] %v6544_v16  ;;  %1566 = vrot.lane.b32.xlu1 %v1387_v26, %s5848_s23  ;;  %v6551_v29 = vadd.f32 %v5226_v13, %v6410_v40  ;;  %v1324_v45 = vpop.f32.mrb[67].mxu0  ;;  %v1394_v40 = vmul.f32 %v6526_v12, %v6526_v12  ;;  %v1469_v26 = vpop.permute.xlu0 %1468  ;;  %v1398_v27 = vmul.f32 %v6544_v16, %v6544_v16 }
 0x353   :  { %7727 = vst [vmem:[#allocation66_spill] sm:$0xff] %v6547_v28  ;;  %v6554_v37 = vadd.f32 %v1324_v45, %v6416_v49  ;;  %v1663_v13 = vsel %vm1656_vm13, %v1469_v26, 0.0 }
 0x354   :  { %7728 = vst [vmem:[#allocation67_spill] sm:$0xff] %v6551_v29 }
 0x355   :  { %7729 = vst [vmem:[#allocation68_spill] sm:$0xff] %v6554_v37 }
 0x356   :  { %1572 = vrot.lane.b32.xlu1 %v1390_v15, %s5848_s23  ;;  %v1395_v15 = vmul.f32 %v6533_v50, %v6533_v50 }
 0x35a   :  { %1568 = vrot.lane.b32.xlu1 %v1388_v4, %s5848_s23 }
 0x35c   :  { %v6567_v49 = vpop.permute.xlu1 %1484 }
 0x35e   :  { %1574 = vrot.lane.b32.xlu1 %v1391_v25, %s5848_s23 }
 0x360   :  { %v1481_v45 = vpop.permute.xlu1 %1480 }
 0x361   :  { %v1681_v9 = vsel %vm1656_vm13, %v1481_v45, 0.0 }
 0x362   :  { %1580 = vrot.lane.b32.xlu1 %v1394_v40, %s5848_s23  ;;  %v1393_v40 = vmul.f32 %v6536_v11, %v6536_v11 }
 0x364   :  { %v6577_v4 = vpop.permute.xlu1 %1492 }
 0x366   :  { %1664 = vadd.xlane.f32.xlu0 %v1663_v13  ;;  %1576 = vrot.lane.b32.xlu1 %v1392_v17, %s5848_s23  ;;  %v1465_v13 = vpop.permute.xlu0 %1464 }
 0x367   :  { %v1657_v18 = vsel %vm1656_vm13, %v1465_v13, 0.0 }
 0x368   :  { %v1489_v25 = vpop.permute.xlu1 %1488 }
 0x36a   :  { %1582 = vrot.lane.b32.xlu1 %v1395_v15, %s5848_s23  ;;  %v1471_v3 = vpop.permute.xlu0 %1470 }
 0x36b   :  { %v1666_v47 = vsel %vm1656_vm13, %v1471_v3, 0.0 }
 0x36c   :  { %v6579_v12 = vpop.permute.xlu1 %1500 }
 0x36e   :  { %v1477_v14 = vpop.permute.xlu0 %1476 }
 0x36f   :  { %v1675_v58 = vsel %vm1656_vm13, %v1477_v14, 0.0 }
 0x370   :  { %v1497_v26 = vpop.permute.xlu1 %1496 }
 0x371   :  { %v1705_v57 = vsel %vm1656_vm13, %v1497_v26, 0.0 }
 0x372   :  { %v1473_v3 = vpop.permute.xlu0 %1472 }
 0x374   :  { %v6584_v62 = vpop.permute.xlu1 %1508 }
 0x378   :  { %v1505_v17 = vpop.permute.xlu1 %1504 }
 0x379   :  { %v1717_v55 = vsel %vm1656_vm13, %v1505_v17, 0.0 }
 0x37c   :  { %1578 = vrot.lane.b32.xlu0 %v1393_v40, %s5848_s23  ;;  %v6587_v50 = vpop.permute.xlu1 %1516  ;;  %v1660_v40 = vsel %vm1656_vm13, %v1467_v24, 0.0  ;;  %v5591_v24 = vld [vmem:[#allocation15] sm:$0xff]  }
 0x37d   :  { %5227 = vmatprep.subr.bf16.mxu1 %v5591_v24 }
 0x37e   :  { %5228 = vmatpush3.bf16.msra.mxu1 %v5591_v24  ;;  %v1669_v24 = vsel %vm1656_vm13, %v1473_v3, 0.0 }
 0x380   :  { %v1513_v15 = vpop.permute.xlu1 %1512 }
 0x384   :  { %v6592_v11 = vpop.permute.xlu1 %1524 }
 0x388   :  { %v1521_v13 = vpop.permute.xlu1 %1520 }
 0x38c   :  { %v6600_v16 = vpop.permute.xlu1 %1532 }
 0x38e   :  { %1658 = vadd.xlane.f32.xlu1 %v1657_v18  ;;  %v1396_v18 = vmul.f32 %v6547_v28, %v6547_v28 }
 0x390   :  { %v6602_v0 = vpop.permute.xlu1 %1528 }
 0x394   :  { %v6604_v5 = vpop.permute.xlu1 %1534 }
 0x39b   :  { %1667 = vadd.xlane.f32.xlu0 %v1666_v47  ;;  %v1479_v47 = vpop.permute.xlu0 %1478 }
 0x39c   :  { %v1678_v3 = vsel %vm1656_vm13, %v1479_v47, 0.0 }
 0x39f   :  { %1661 = vadd.xlane.f32.xlu0 %v1660_v40  ;;  %1588 = vrot.lane.b32.xlu1 %v1398_v27, %s5848_s23  ;;  %v5592_v40 = vld [vmem:[#allocation15 + $0x8] sm:$0xff]   ;;  %v1475_v27 = vpop.permute.xlu0 %1474 }
 0x3a0   :  { %5229 = vmatprep.subr.bf16.mxu1 %v5592_v40 }
 0x3a1   :  { %5230 = vmatpush3.bf16.msra.mxu1 %v5592_v40 }
 0x3a3   :  { %1676 = vadd.xlane.f32.xlu0 %v1675_v58  ;;  %1584 = vrot.lane.b32.xlu1 %v1396_v18, %s5848_s23  ;;  %v1397_v58 = vmul.f32 %v6554_v37, %v6554_v37  ;;  %v1487_v14 = vpop.permute.xlu0 %1486  ;;  %v6609_v18 = vpop.permute.xlu1 %1540 }
 0x3a4   :  { %v1690_v26 = vsel %vm1656_vm13, %v1487_v14, 0.0 }
 0x3a7   :  { %v1483_v28 = vpop.permute.xlu0 %1482  ;;  %v6611_v2 = vpop.permute.xlu1 %1536 }
 0x3ab   :  { %v1495_v42 = vpop.permute.xlu0 %1494  ;;  %v6613_v34 = vpop.permute.xlu1 %1542 }
 0x3af   :  { %v1491_v40 = vpop.permute.xlu0 %1490  ;;  %v6617_v63 = vpop.permute.xlu1 %1548 }
 0x3b3   :  { %v1503_v37 = vpop.permute.xlu0 %1502  ;;  %v6620_v10 = vpop.permute.xlu1 %1544 }
 0x3b7   :  { %v6625_v45 = vpop.permute.xlu1 %1550 }
 0x3b9   :  { %1586 = vrot.lane.b32.xlu0 %v1397_v58, %s5848_s23  ;;  %v1693_v58 = vsel %vm1656_vm13, %v1489_v25, 0.0  ;;  %v1672_v25 = vsel %vm1656_vm13, %v1475_v27, 0.0 }
 0x3bb   :  { %v6629_v54 = vpop.permute.xlu1 %1556 }
 0x3bf   :  { %v6635_v47 = vpop.permute.xlu1 %1552 }
 0x3c7   :  { %1670 = vadd.xlane.f32.xlu1 %v1669_v24  ;;  %v1499_v24 = vpop.permute.xlu0 %1498 }
 0x3cb   :  { %1682 = vadd.xlane.f32.xlu1 %v1681_v9  ;;  %v1729_v9 = vsel %vm1656_vm13, %v1513_v15, 0.0  ;;  %v1684_v15 = vsel %vm1656_vm13, %v1483_v28, 0.0  ;;  %v1696_v28 = vsel %vm1656_vm13, %v1491_v40, 0.0  ;;  %v1723_v40 = vsel %vm1656_vm13, %v6584_v62, 0.0 }
 0x3cf   :  { %1694 = vadd.xlane.f32.xlu1 %v1693_v58  ;;  %v1511_v58 = vpop.permute.xlu0 %1510 }
 0x3d3   :  { %1706 = vadd.xlane.f32.xlu1 %v1705_v57  ;;  %v1741_v57 = vsel %vm1656_vm13, %v1521_v13, 0.0  ;;  %v1507_v17 = vpop.permute.xlu0 %1506  ;;  %v1699_v13 = vsel %vm1656_vm13, %v6577_v4, 0.0  ;;  %v1711_v4 = vsel %vm1656_vm13, %v6579_v12, 0.0 }
 0x3d7   :  { %1718 = vadd.xlane.f32.xlu1 %v1717_v55  ;;  %v1687_v55 = vsel %vm1656_vm13, %v6567_v49, 0.0  ;;  %v1519_v27 = vpop.permute.xlu0 %1518  ;;  %v1399_v49 = vmul.f32 %v6551_v29, %v6551_v29 }
 0x3d8   :  { %1679 = vadd.xlane.f32.xlu0 %v1678_v3  ;;  %v6638_v3 = vpop.permute.xlu1 %1558 }
 0x3db   :  { %1730 = vadd.xlane.f32.xlu1 %v1729_v9  ;;  %v1702_v9 = vsel %vm1656_vm13, %v1495_v42, 0.0  ;;  %v1515_v14 = vpop.permute.xlu0 %1514 }
 0x3dc   :  { %1673 = vadd.xlane.f32.xlu0 %v1672_v25  ;;  %v6645_v25 = vpop.permute.xlu1 %1564 }
 0x3df   :  { %1742 = vadd.xlane.f32.xlu1 %v1741_v57  ;;  %v1527_v57 = vpop.permute.xlu0 %1526 }
 0x3e0   :  { %1688 = vadd.xlane.f32.xlu0 %v1687_v55  ;;  %v6649_v55 = vpop.permute.xlu1 %1560 }
 0x3e4   :  { %1691 = vadd.xlane.f32.xlu0 %v1690_v26  ;;  %v1714_v26 = vsel %vm1656_vm13, %v1503_v37, 0.0  ;;  %v6654_v42 = vpop.permute.xlu1 %1566  ;;  %v1720_v37 = vsel %vm1656_vm13, %v1507_v17, 0.0 }
 0x3e8   :  { %1685 = vadd.xlane.f32.xlu0 %v1684_v15  ;;  %v1523_v15 = vpop.permute.xlu0 %1522 }
 0x3ec   :  { %1700 = vadd.xlane.f32.xlu0 %v1699_v13  ;;  %v1708_v13 = vsel %vm1656_vm13, %v1499_v24, 0.0 }
 0x3f0   :  { %1703 = vadd.xlane.f32.xlu0 %v1702_v9  ;;  %1590 = vrot.lane.b32.xlu1 %v1399_v49, %s5848_s23  ;;  %v1531_v49 = vpop.permute.xlu0 %1530  ;;  %v6657_v9 = vpop.permute.xlu1 %1572 }
 0x3f4   :  { %1697 = vadd.xlane.f32.xlu0 %v1696_v28  ;;  %v1726_v28 = vsel %vm1656_vm13, %v1511_v58, 0.0  ;;  %v6662_v12 = vpop.permute.xlu0 %1538  ;;  %v1738_v58 = vsel %vm1656_vm13, %v1519_v27, 0.0  ;;  %v1771_v27 = vsel %vm1656_vm13, %v6609_v18, 0.0  ;;  %v1783_v18 = vsel %vm1656_vm13, %v6617_v63, 0.0 }
 0x3f8   :  { %1712 = vadd.xlane.f32.xlu0 %v1711_v4  ;;  %v6664_v4 = vpop.permute.xlu1 %1568 }
 0x3fc   :  { %1715 = vadd.xlane.f32.xlu0 %v1714_v26  ;;  %v6667_v26 = vpop.permute.xlu0 %1546  ;;  %v6669_v24 = vpop.permute.xlu1 %1574 }
 0x400   :  { %1709 = vadd.xlane.f32.xlu0 %v1708_v13  ;;  %v1735_v13 = vsel %vm1656_vm13, %v6587_v50, 0.0  ;;  %v6673_v62 = vpop.permute.xlu0 %1554  ;;  %v6678_v29 = vpop.permute.xlu1 %1580 }
 0x404   :  { %1724 = vadd.xlane.f32.xlu0 %v1723_v40  ;;  %v1753_v40 = vsel %vm1656_vm13, %v6602_v0, 0.0  ;;  %v6680_v17 = vpop.permute.xlu0 %1562  ;;  %v1747_v0 = vsel %vm1656_vm13, %v6592_v11, 0.0  ;;  %v1744_v11 = vsel %vm1656_vm13, %v1523_v15, 0.0 }
 0x408   :  { %1727 = vadd.xlane.f32.xlu0 %v1726_v28  ;;  %v1732_v28 = vsel %vm1656_vm13, %v1515_v14, 0.0  ;;  %v6685_v50 = vpop.permute.xlu0 %1570  ;;  %v1750_v14 = vsel %vm1656_vm13, %v1527_v57, 0.0 }
 0x40c   :  { %1721 = vadd.xlane.f32.xlu0 %v1720_v37  ;;  %v1765_v37 = vsel %vm1656_vm13, %v6611_v2, 0.0  ;;  %v1777_v2 = vsel %vm1656_vm13, %v6620_v10, 0.0 }
 0x410   :  { %1736 = vadd.xlane.f32.xlu0 %v1735_v13  ;;  %v6687_v13 = vpop.permute.xlu1 %1576 }
 0x414   :  { %1739 = vadd.xlane.f32.xlu0 %v1738_v58  ;;  %1754 = vadd.xlane.f32.xlu1 %v1753_v40  ;;  %v1665_v58 = vpop.xlane.xlu0 %1664  ;;  %v6696_v40 = vpop.permute.xlu1 %1582 }
 0x418   :  { %1733 = vadd.xlane.f32.xlu0 %v1732_v28  ;;  %1766 = vadd.xlane.f32.xlu1 %v1765_v37  ;;  %v6698_v28 = vld [vmem:[#allocation12] ss:$0 sm:$0xff] }
 0x419   :  { %v1858_v37 = vmul.f32 %v6698_v28, %v1665_v58  ;;  %v1789_v58 = vsel %vm1656_vm13, %v6635_v47, 0.0 }
 0x41b   :  { %v1922_v10 = vadd.f32 %v6237_v19, %v1858_v37 }
 0x41c   :  { %1748 = vadd.xlane.f32.xlu0 %v1747_v0  ;;  %1772 = vadd.xlane.f32.xlu1 %v1771_v27  ;;  %v6704_v0 = vpop.permute.xlu0 %1578  ;;  %v1659_v27 = vpop.xlane.xlu1 %1658 }
 0x41d   :  { %v1856_v57 = vmul.f32 %v6698_v28, %v1659_v27 }
 0x41f   :  { %v1920_v37 = vadd.f32 %v1856_v57, %v6241_v21 }
 0x420   :  { %1751 = vadd.xlane.f32.xlu0 %v1750_v14  ;;  %1778 = vadd.xlane.f32.xlu1 %v1777_v2  ;;  %v1759_v14 = vsel %vm1656_vm13, %v6600_v16, 0.0  ;;  %v6712_v2 = vld [vmem:[#allocation14] ss:$0 sm:$0xff]  ;;  %v1795_v16 = vsel %vm1656_vm13, %v6629_v54, 0.0 }
 0x421   :  { %v1991_v57 = vadd.f32 %v6712_v2, %v1920_v37  ;;  %v1813_v37 = vsel %vm1656_vm13, %v6664_v4, 0.0  ;;  %v1792_v4 = vsel %vm1656_vm13, %v6673_v62, 0.0  ;;  %v1816_v62 = vsel %vm1656_vm13, %v6685_v50, 0.0 }
 0x424   :  { %1745 = vadd.xlane.f32.xlu0 %v1744_v11  ;;  %1784 = vadd.xlane.f32.xlu1 %v1783_v18  ;;  %v1756_v11 = vsel %vm1656_vm13, %v1531_v49, 0.0  ;;  %v1993_v18 = vadd.f32 %v6712_v2, %v1922_v10  ;;  %v1801_v49 = vsel %vm1656_vm13, %v6649_v55, 0.0 }
 0x426   :  { %v2057_v10 = vmax.f32 %v1993_v18, 0.0  ;;  %v1774_v18 = vsel %vm1656_vm13, %v6613_v34, 0.0  ;;  %v1825_v34 = vsel %vm1656_vm13, %v6687_v13, 0.0 }
 0x428   :  { %1760 = vadd.xlane.f32.xlu0 %v1759_v14  ;;  %v1668_v15 = vpop.xlane.xlu0 %1667  ;;  %1790 = vadd.xlane.f32.xlu1 %v1789_v58 }
 0x429   :  { %v1859_v63 = vmul.f32 %v6698_v28, %v1668_v15  ;;  %v1762_v15 = vsel %vm1656_vm13, %v6604_v5, 0.0  ;;  %v1807_v5 = vsel %vm1656_vm13, %v6645_v25, 0.0  ;;  %v1819_v25 = vsel %vm1656_vm13, %v6657_v9, 0.0 }
 0x42a   :  { %v1798_v9 = vsel %vm1656_vm13, %v6638_v3, 0.0 }
 0x42b   :  { %v1923_v27 = vadd.f32 %v6243_v22, %v1859_v63 }
 0x42c   :  { %1757 = vadd.xlane.f32.xlu0 %v1756_v11  ;;  %v1662_v47 = vpop.xlane.xlu0 %1661  ;;  %1796 = vadd.xlane.f32.xlu1 %v1795_v16 }
 0x42d   :  { %v1994_v14 = vadd.f32 %v6712_v2, %v1923_v27  ;;  %v1857_v58 = vmul.f32 %v6698_v28, %v1662_v47  ;;  %v2055_v27 = vmax.f32 %v1991_v57, 0.0  ;;  %v1768_v47 = vsel %vm1656_vm13, %v6662_v12, 0.0  ;;  %v1589_v12 = vpop.permute.xlu1 %1588 }
 0x42e   :  { %v1843_v13 = vsel %vm1656_vm13, %v1589_v12, 0.0 }
 0x42f   :  { %v2058_v63 = vmax.f32 %v1994_v14, 0.0  ;;  %v1921_v21 = vadd.f32 %v1857_v58, %v6246_v23  ;;  %v1786_v14 = vsel %vm1656_vm13, %v6625_v45, 0.0  ;;  %v1804_v45 = vsel %vm1656_vm13, %v6680_v17, 0.0 }
 0x430   :  { %1763 = vadd.xlane.f32.xlu0 %v1762_v15  ;;  %1802 = vadd.xlane.f32.xlu1 %v1801_v49  ;;  %v1822_v49 = vsel %vm1656_vm13, %v6669_v24, 0.0  ;;  %v1677_v57 = vpop.xlane.xlu0 %1676  ;;  %v1828_v17 = vsel %vm1656_vm13, %v6704_v0, 0.0 }
 0x431   :  { %v2120_v54 = vpack.c.bf16 %v2058_v63, %v2057_v10  ;;  %v1992_v11 = vadd.f32 %v6712_v2, %v1921_v21  ;;  %v1780_v21 = vsel %vm1656_vm13, %v6667_v26, 0.0  ;;  %v1831_v26 = vsel %vm1656_vm13, %v6678_v29, 0.0  ;;  %v1585_v58 = vpop.permute.xlu1 %1584 }
 0x432   :  { %v1837_v15 = vsel %vm1656_vm13, %v1585_v58, 0.0  ;;  %v1810_v29 = vsel %vm1656_vm13, %v6654_v42, 0.0  ;;  %v1834_v42 = vsel %vm1656_vm13, %v6696_v40, 0.0 }
 0x433   :  { %v2056_v16 = vmax.f32 %v1992_v11, 0.0 }
 0x434   :  { %1769 = vadd.xlane.f32.xlu0 %v1768_v47  ;;  %1808 = vadd.xlane.f32.xlu1 %v1807_v5  ;;  %v1587_v11 = vpop.permute.xlu0 %1586 }
 0x435   :  { %v2119_v55 = vpack.c.bf16 %v2056_v16, %v2055_v27  ;;  %v1840_v27 = vsel %vm1656_vm13, %v1587_v11, 0.0 }
 0x437   :  { %5231 = vmatprep.mubr.msk.bf16.mxu1 %vm193_vm2, %v2119_v55 }
 0x438   :  { %1775 = vadd.xlane.f32.xlu0 %v1774_v18  ;;  %1814 = vadd.xlane.f32.xlu1 %v1813_v37 }
 0x439   :  { %5232 = vmatmul.mubr.msk.bf16.vlgmr.msra.gmra.mrb[20].mxu1 %vm193_vm2, %v2120_v54  ;;  %v1862_v54 = vmul.f32 %v6698_v28, %v1677_v57 }
 0x43b   :  { %v1926_v24 = vadd.f32 %v6262_v30, %v1862_v54 }
 0x43c   :  { %1781 = vadd.xlane.f32.xlu0 %v1780_v21  ;;  %1820 = vadd.xlane.f32.xlu1 %v1819_v25 }
 0x43d   :  { %v1997_v40 = vadd.f32 %v6712_v2, %v1926_v24 }
 0x440   :  { %1787 = vadd.xlane.f32.xlu0 %v1786_v14  ;;  %1826 = vadd.xlane.f32.xlu1 %v1825_v34  ;;  %v2061_v14 = vmax.f32 %v1997_v40, 0.0 }
 0x444   :  { %1793 = vadd.xlane.f32.xlu0 %v1792_v4  ;;  %1832 = vadd.xlane.f32.xlu1 %v1831_v26 }
 0x448   :  { %1799 = vadd.xlane.f32.xlu0 %v1798_v9  ;;  %1838 = vadd.xlane.f32.xlu1 %v1837_v15 }
 0x44c   :  { %1805 = vadd.xlane.f32.xlu0 %v1804_v45  ;;  %1844 = vadd.xlane.f32.xlu1 %v1843_v13 }
 0x450   :  { %1811 = vadd.xlane.f32.xlu0 %v1810_v29 }
 0x454   :  { %1817 = vadd.xlane.f32.xlu0 %v1816_v62  ;;  %v1671_v3 = vpop.xlane.xlu1 %1670 }
 0x455   :  { %v1860_v16 = vmul.f32 %v6698_v28, %v1671_v3 }
 0x457   :  { %v1924_v55 = vadd.f32 %v1860_v16, %v6266_v32 }
 0x458   :  { %1823 = vadd.xlane.f32.xlu0 %v1822_v49  ;;  %v1683_v10 = vpop.xlane.xlu1 %1682 }
 0x459   :  { %v1995_v34 = vadd.f32 %v6712_v2, %v1924_v55  ;;  %v1864_v62 = vmul.f32 %v6698_v28, %v1683_v10 }
 0x45b   :  { %v2059_v29 = vmax.f32 %v1995_v34, 0.0 }
 0x45c   :  { %1829 = vadd.xlane.f32.xlu0 %v1828_v17  ;;  %v1695_v63 = vpop.xlane.xlu1 %1694 }
 0x460   :  { %1835 = vadd.xlane.f32.xlu0 %v1834_v42  ;;  %v6769_v50 = vpop.xlane.xlu1 %1706 }
 0x464   :  { %1841 = vadd.xlane.f32.xlu0 %v1840_v27  ;;  %v6774_v47 = vpop.xlane.xlu1 %1718  ;;  %v1928_v27 = vadd.f32 %v1864_v62, %v6282_v41 }
 0x465   :  { %v1680_v0 = vpop.xlane.xlu0 %1679 }
 0x466   :  { %v1863_v5 = vmul.f32 %v6698_v28, %v1680_v0  ;;  %v1999_v40 = vadd.f32 %v6712_v2, %v1928_v27 }
 0x468   :  { %v1927_v18 = vadd.f32 %v6268_v33, %v1863_v5  ;;  %v6780_v37 = vpop.xlane.xlu1 %1730 }
 0x469   :  { %v1674_v21 = vpop.xlane.xlu0 %1673 }
 0x46a   :  { %v1998_v25 = vadd.f32 %v6712_v2, %v1927_v18  ;;  %v1861_v12 = vmul.f32 %v6698_v28, %v1674_v21 }
 0x46c   :  { %v2062_v4 = vmax.f32 %v1998_v25, 0.0  ;;  %v1925_v26 = vadd.f32 %v1861_v12, %v6271_v35  ;;  %v6786_v58 = vpop.xlane.xlu1 %1742 }
 0x46d   :  { %v1689_v9 = vpop.xlane.xlu0 %1688 }
 0x46e   :  { %v1996_v15 = vadd.f32 %v6712_v2, %v1925_v26  ;;  %v1866_v45 = vmul.f32 %v6698_v28, %v1689_v9  ;;  %v2122_v13 = vpack.c.bf16 %v2062_v4, %v2061_v14  ;;  %v2063_v4 = vmax.f32 %v1999_v40, 0.0 }
 0x46f   :  { %v1868_v26 = vmul.f32 %v6698_v28, %v1695_v63  ;;  %v1872_v40 = vmul.f32 %v6698_v28, %v6769_v50 }
 0x470   :  { %v2060_v3 = vmax.f32 %v1996_v15, 0.0  ;;  %v1930_v49 = vadd.f32 %v6276_v38, %v1866_v45  ;;  %v1591_v57 = vpop.permute.xlu1 %1590 }
 0x471   :  { %v1692_v17 = vpop.xlane.xlu0 %1691  ;;  %v1846_v42 = vsel %vm1656_vm13, %v1591_v57, 0.0  ;;  %v1932_v62 = vadd.f32 %v1868_v26, %v6302_v51 }
 0x472   :  { %v1867_v54 = vmul.f32 %v6698_v28, %v1692_v17  ;;  %1847 = vadd.xlane.f32.xlu0 %v1846_v42  ;;  %v2121_v11 = vpack.c.bf16 %v2060_v3, %v2059_v29  ;;  %v2001_v24 = vadd.f32 %v6712_v2, %v1930_v49 }
 0x473   :  { %v2003_v42 = vadd.f32 %v6712_v2, %v1932_v62 }
 0x474   :  { %v1931_v16 = vadd.f32 %v6284_v43, %v1867_v54  ;;  %5235 = vmatprep.mubr.msk.bf16.mxu1 %vm193_vm2, %v2121_v11  ;;  %v2065_v55 = vmax.f32 %v2001_v24, 0.0 }
 0x475   :  { %v1686_v10 = vpop.xlane.xlu0 %1685  ;;  %5236 = vmatmul.mubr.msk.bf16.gmra.mrb[24].mxu1 %vm193_vm2, %v2122_v13 }
 0x476   :  { %v2002_v0 = vadd.f32 %v6712_v2, %v1931_v16  ;;  %v1865_v5 = vmul.f32 %v6698_v28, %v1686_v10 }
 0x478   :  { %v2066_v18 = vmax.f32 %v2002_v0, 0.0  ;;  %v1929_v21 = vadd.f32 %v1865_v5, %v6288_v44  ;;  %v2067_v5 = vmax.f32 %v2003_v42, 0.0 }
 0x479   :  { %v1701_v25 = vpop.xlane.xlu0 %1700 }
 0x47a   :  { %v2000_v12 = vadd.f32 %v6712_v2, %v1929_v21  ;;  %v1870_v14 = vmul.f32 %v6698_v28, %v1701_v25  ;;  %v2124_v34 = vpack.c.bf16 %v2066_v18, %v2065_v55 }
 0x47c   :  { %v2064_v9 = vmax.f32 %v2000_v12, 0.0  ;;  %v1934_v15 = vadd.f32 %v6296_v48, %v1870_v14  ;;  %v1936_v14 = vadd.f32 %v1872_v40, %v6322_v59 }
 0x47d   :  { %v1704_v45 = vpop.xlane.xlu0 %1703 }
 0x47e   :  { %v1871_v13 = vmul.f32 %v6698_v28, %v1704_v45  ;;  %v2123_v29 = vpack.c.bf16 %v2064_v9, %v2063_v4  ;;  %v2005_v3 = vadd.f32 %v6712_v2, %v1934_v15  ;;  %v5593_v9 = vld [vmem:[#allocation17] sm:$0xff]   ;;  %v2007_v45 = vadd.f32 %v6712_v2, %v1936_v14 }
 0x47f   :  { %5295 = vmatprep.subr.bf16.mxu1 %v5593_v9 }
 0x480   :  { %v1935_v49 = vadd.f32 %v6304_v52, %v1871_v13  ;;  %5239 = vmatprep.mubr.msk.bf16.mxu1 %vm193_vm2, %v2123_v29  ;;  %v2069_v54 = vmax.f32 %v2005_v3, 0.0  ;;  %5296 = vmatpush3.bf16.msra.mxu1 %v5593_v9  ;;  %v2071_v42 = vmax.f32 %v2007_v45, 0.0  ;;  %v1880_v45 = vmul.f32 %v6698_v28, %v6780_v37 }
 0x481   :  { %v1698_v57 = vpop.xlane.xlu0 %1697  ;;  %5240 = vmatmul.mubr.msk.bf16.gmra.mrb[28].mxu1 %vm193_vm2, %v2124_v34 }
 0x482   :  { %v2006_v63 = vadd.f32 %v6712_v2, %v1935_v49  ;;  %v1869_v17 = vmul.f32 %v6698_v28, %v1698_v57  ;;  %v5594_v49 = vld [vmem:[#allocation17 + $0x8] sm:$0xff]  }
 0x483   :  { %5297 = vmatprep.subr.bf16.mxu1 %v5594_v49 }
 0x484   :  { %v2070_v11 = vmax.f32 %v2006_v63, 0.0  ;;  %v1933_v27 = vadd.f32 %v1869_v17, %v6308_v53  ;;  %5298 = vmatpush3.bf16.msra.mxu1 %v5594_v49 }
 0x485   :  { %v1713_v24 = vpop.xlane.xlu0 %1712 }
 0x486   :  { %v2004_v16 = vadd.f32 %v6712_v2, %v1933_v27  ;;  %v1874_v10 = vmul.f32 %v6698_v28, %v1713_v24  ;;  %v2126_v0 = vpack.c.bf16 %v2070_v11, %v2069_v54  ;;  %v1876_v54 = vmul.f32 %v6698_v28, %v6774_v47 }
 0x488   :  { %v2068_v55 = vmax.f32 %v2004_v16, 0.0  ;;  %v1938_v18 = vadd.f32 %v6316_v56, %v1874_v10 }
 0x489   :  { %v1716_v21 = vpop.xlane.xlu0 %1715 }
 0x48a   :  { %v1875_v25 = vmul.f32 %v6698_v28, %v1716_v21  ;;  %v2125_v12 = vpack.c.bf16 %v2068_v55, %v2067_v5  ;;  %v2009_v34 = vadd.f32 %v6712_v2, %v1938_v18 }
 0x48c   :  { %v1939_v4 = vadd.f32 %v6324_v60, %v1875_v25  ;;  %5243 = vmatprep.mubr.msk.bf16.mxu1 %vm193_vm2, %v2125_v12  ;;  %v2073_v13 = vmax.f32 %v2009_v34, 0.0 }
 0x48d   :  { %v1710_v26 = vpop.xlane.xlu0 %1709  ;;  %5244 = vmatmul.mubr.msk.bf16.gmra.mrb[32].mxu1 %vm193_vm2, %v2126_v0  ;;  %v1940_v0 = vadd.f32 %v1876_v54, %v6342_v6 }
 0x48e   :  { %v2010_v50 = vadd.f32 %v6712_v2, %v1939_v4  ;;  %v1873_v15 = vmul.f32 %v6698_v28, %v1710_v26 }
 0x48f   :  { %v2011_v21 = vadd.f32 %v6712_v2, %v1940_v0 }
 0x490   :  { %v2074_v29 = vmax.f32 %v2010_v50, 0.0  ;;  %v1937_v62 = vadd.f32 %v1873_v15, %v6328_v61 }
 0x491   :  { %v1725_v3 = vpop.xlane.xlu0 %1724  ;;  %v2075_v50 = vmax.f32 %v2011_v21, 0.0 }
 0x492   :  { %v2008_v57 = vadd.f32 %v6712_v2, %v1937_v62  ;;  %v1878_v63 = vmul.f32 %v6698_v28, %v1725_v3  ;;  %v2128_v17 = vpack.c.bf16 %v2074_v29, %v2073_v13 }
 0x494   :  { %v2072_v11 = vmax.f32 %v2008_v57, 0.0  ;;  %v1942_v27 = vadd.f32 %v6336_v1, %v1878_v63  ;;  %v1944_v63 = vadd.f32 %v1880_v45, %v6362_v31  ;;  %v7731_v45 = vld [vmem:[#allocation35_spill] sm:$0xff] }
 0x495   :  { %v1728_v24 = vpop.xlane.xlu0 %1727 }
 0x496   :  { %v1879_v16 = vmul.f32 %v6698_v28, %v1728_v24  ;;  %v2127_v10 = vpack.c.bf16 %v2072_v11, %v2071_v42  ;;  %v2013_v5 = vadd.f32 %v6712_v2, %v1942_v27 }
 0x498   :  { %v1943_v40 = vadd.f32 %v6344_v7, %v1879_v16  ;;  %5247 = vmatprep.mubr.msk.bf16.mxu1 %vm193_vm2, %v2127_v10  ;;  %v2077_v25 = vmax.f32 %v2013_v5, 0.0  ;;  %v2015_v16 = vadd.f32 %v6712_v2, %v1944_v63 }
 0x499   :  { %v1722_v55 = vpop.xlane.xlu0 %1721  ;;  %5248 = vmatmul.mubr.msk.bf16.gmra.mrb[36].mxu1 %vm193_vm2, %v2128_v17 }
 0x49a   :  { %v2014_v47 = vadd.f32 %v6712_v2, %v1943_v40  ;;  %v1877_v18 = vmul.f32 %v6698_v28, %v1722_v55 }
 0x49c   :  { %v2078_v12 = vmax.f32 %v2014_v47, 0.0  ;;  %v1941_v14 = vadd.f32 %v1877_v18, %v6348_v8  ;;  %v1884_v18 = vmul.f32 %v6698_v28, %v6786_v58 }
 0x49d   :  { %v1737_v34 = vpop.xlane.xlu0 %1736 }
 0x49e   :  { %v2012_v4 = vadd.f32 %v6712_v2, %v1941_v14  ;;  %v1882_v26 = vmul.f32 %v6698_v28, %v1737_v34  ;;  %v2130_v9 = vpack.c.bf16 %v2078_v12, %v2077_v25  ;;  %v2079_v12 = vmax.f32 %v2015_v16, 0.0 }
 0x4a0   :  { %v2076_v15 = vmax.f32 %v2012_v4, 0.0  ;;  %v1946_v13 = vadd.f32 %v6356_v20, %v1882_v26 }
 0x4a1   :  { %v1740_v29 = vpop.xlane.xlu0 %1739  ;;  %v1755_v62 = vpop.xlane.xlu1 %1754 }
 0x4a2   :  { %v1883_v3 = vmul.f32 %v6698_v28, %v1740_v29  ;;  %v2129_v49 = vpack.c.bf16 %v2076_v15, %v2075_v50  ;;  %v2017_v17 = vadd.f32 %v6712_v2, %v1946_v13 }
 0x4a4   :  { %v1947_v57 = vadd.f32 %v6364_v36, %v1883_v3  ;;  %5251 = vmatprep.mubr.msk.bf16.mxu1 %vm193_vm2, %v2129_v49  ;;  %v2081_v10 = vmax.f32 %v2017_v17, 0.0  ;;  %v1888_v49 = vmul.f32 %v6698_v28, %v1755_v62 }
 0x4a5   :  { %v1734_v42 = vpop.xlane.xlu0 %1733  ;;  %5252 = vmatmul.mubr.msk.bf16.gmra.mrb[40].mxu1 %vm193_vm2, %v2130_v9  ;;  %v1767_v54 = vpop.xlane.xlu1 %1766  ;;  %v7730_v9 = vld [vmem:[#allocation34_spill] sm:$0xff] }
 0x4a6   :  { %v2018_v37 = vadd.f32 %v6712_v2, %v1947_v57  ;;  %v1881_v11 = vmul.f32 %v6698_v28, %v1734_v42  ;;  %v1948_v50 = vadd.f32 %v1884_v18, %v7730_v9 }
 0x4a8   :  { %v2082_v27 = vmax.f32 %v2018_v37, 0.0  ;;  %v1945_v24 = vadd.f32 %v1881_v11, %v6368_v39  ;;  %v2019_v63 = vadd.f32 %v6712_v2, %v1948_v50  ;;  %v7732_v37 = vld [vmem:[#allocation36_spill] sm:$0xff] }
 0x4a9   :  { %v1749_v0 = vpop.xlane.xlu0 %1748  ;;  %v1773_v5 = vpop.xlane.xlu1 %1772  ;;  %v7735_v50 = vld [vmem:[#allocation40_spill] sm:$0xff] }
 0x4aa   :  { %v2016_v40 = vadd.f32 %v6712_v2, %v1945_v24  ;;  %v1886_v55 = vmul.f32 %v6698_v28, %v1749_v0  ;;  %v2132_v47 = vpack.c.bf16 %v2082_v27, %v2081_v10  ;;  %v7733_v10 = vld [vmem:[#allocation38_spill] sm:$0xff] }
 0x4ab   :  { %v1952_v0 = vadd.f32 %v1888_v49, %v7733_v10  ;;  %v1894_v49 = vmul.f32 %v6698_v28, %v1773_v5 }
 0x4ac   :  { %v2080_v21 = vmax.f32 %v2016_v40, 0.0  ;;  %v1950_v25 = vadd.f32 %v6376_v46, %v1886_v55  ;;  %v2083_v40 = vmax.f32 %v2019_v63, 0.0 }
 0x4ad   :  { %v1752_v14 = vpop.xlane.xlu0 %1751  ;;  %v1779_v34 = vpop.xlane.xlu1 %1778 }
 0x4ae   :  { %v1887_v4 = vmul.f32 %v6698_v28, %v1752_v14  ;;  %v2131_v26 = vpack.c.bf16 %v2080_v21, %v2079_v12  ;;  %v2021_v15 = vadd.f32 %v6712_v2, %v1950_v25  ;;  %v2023_v12 = vadd.f32 %v6712_v2, %v1952_v0 }
 0x4af   :  { %v1892_v14 = vmul.f32 %v6698_v28, %v1767_v54 }
 0x4b0   :  { %v1951_v13 = vadd.f32 %v7731_v45, %v1887_v4  ;;  %5255 = vmatprep.mubr.msk.bf16.mxu1 %vm193_vm2, %v2131_v26  ;;  %v2085_v17 = vmax.f32 %v2021_v15, 0.0  ;;  %v7734_v4 = vld [vmem:[#allocation37_spill] sm:$0xff] }
 0x4b1   :  { %v1746_v29 = vpop.xlane.xlu0 %1745  ;;  %5256 = vmatmul.mubr.msk.bf16.gmra.mrb[44].mxu1 %vm193_vm2, %v2132_v47  ;;  %v1785_v57 = vpop.xlane.xlu1 %1784 }
 0x4b2   :  { %v2022_v58 = vadd.f32 %v6712_v2, %v1951_v13  ;;  %v1885_v3 = vmul.f32 %v6698_v28, %v1746_v29 }
 0x4b4   :  { %v2086_v42 = vmax.f32 %v2022_v58, 0.0  ;;  %v1949_v11 = vadd.f32 %v1885_v3, %v7732_v37  ;;  %v2087_v3 = vmax.f32 %v2023_v12, 0.0 }
 0x4b5   :  { %v1761_v27 = vpop.xlane.xlu0 %1760  ;;  %v1791_v47 = vpop.xlane.xlu1 %1790 }
 0x4b6   :  { %v2134_v24 = vpack.c.bf16 %v2086_v42, %v2085_v17  ;;  %v2020_v16 = vadd.f32 %v6712_v2, %v1949_v11  ;;  %v1890_v18 = vmul.f32 %v6698_v28, %v1761_v27  ;;  %v7736_v17 = vld [vmem:[#allocation42_spill] sm:$0xff]  ;;  %v7737_v27 = vld [vmem:[#allocation39_spill] sm:$0xff] }
 0x4b7   :  { %v1956_v42 = vadd.f32 %v1892_v14, %v7736_v17  ;;  %v7739_v14 = vld [vmem:[#allocation44_spill] sm:$0xff] }
 0x4b8   :  { %v2084_v55 = vmax.f32 %v2020_v16, 0.0  ;;  %v1954_v26 = vadd.f32 %v7734_v4, %v1890_v18  ;;  %v7738_v18 = vld [vmem:[#allocation41_spill] sm:$0xff] }
 0x4b9   :  { %v1758_v21 = vpop.xlane.xlu0 %1757  ;;  %v1797_v63 = vpop.xlane.xlu1 %1796  ;;  %v2027_v5 = vadd.f32 %v6712_v2, %v1956_v42  ;;  %v1898_v42 = vmul.f32 %v6698_v28, %v1785_v57 }
 0x4ba   :  { %v2133_v62 = vpack.c.bf16 %v2084_v55, %v2083_v40  ;;  %v1889_v25 = vmul.f32 %v6698_v28, %v1758_v21  ;;  %v2025_v54 = vadd.f32 %v6712_v2, %v1954_v26  ;;  %v1958_v21 = vadd.f32 %v7738_v18, %v1894_v49  ;;  %v7740_v49 = vld [vmem:[#allocation46_spill] sm:$0xff] }
 0x4bc   :  { %v1953_v15 = vadd.f32 %v1889_v25, %v7735_v50  ;;  %5259 = vmatprep.mubr.msk.bf16.mxu1 %vm193_vm2, %v2133_v62  ;;  %v1896_v62 = vmul.f32 %v6698_v28, %v1779_v34  ;;  %v2089_v25 = vmax.f32 %v2025_v54, 0.0  ;;  %v2091_v34 = vmax.f32 %v2027_v5, 0.0 }
 0x4bd   :  { %v1764_v13 = vpop.xlane.xlu0 %1763  ;;  %5260 = vmatmul.mubr.msk.bf16.gmra.mrb[48].mxu1 %vm193_vm2, %v2134_v24  ;;  %v1803_v26 = vpop.xlane.xlu1 %1802  ;;  %v1900_v5 = vmul.f32 %v6698_v28, %v1791_v47  ;;  %v7745_v47 = vld [vmem:[#allocation47_spill] sm:$0xff] }
 0x4be   :  { %v2024_v29 = vadd.f32 %v6712_v2, %v1953_v15  ;;  %v1891_v58 = vmul.f32 %v6698_v28, %v1764_v13 }
 0x4c0   :  { %v2088_v11 = vmax.f32 %v2024_v29, 0.0  ;;  %v1955_v16 = vadd.f32 %v7737_v27, %v1891_v58 }
 0x4c1   :  { %v1770_v0 = vpop.xlane.xlu0 %1769 }
 0x4c2   :  { %v2135_v40 = vpack.c.bf16 %v2088_v11, %v2087_v3  ;;  %v2026_v55 = vadd.f32 %v6712_v2, %v1955_v16  ;;  %v1893_v24 = vmul.f32 %v6698_v28, %v1770_v0  ;;  %v2029_v11 = vadd.f32 %v6712_v2, %v1958_v21  ;;  %v7741_v0 = vld [vmem:[#allocation43_spill] sm:$0xff]  ;;  %v1809_v21 = vpop.xlane.xlu1 %1808 }
 0x4c3   :  { %v1960_v16 = vadd.f32 %v1896_v62, %v7740_v49 }
 0x4c4   :  { %v2090_v12 = vmax.f32 %v2026_v55, 0.0  ;;  %v1957_v15 = vadd.f32 %v1893_v24, %v7739_v14  ;;  %5263 = vmatprep.mubr.msk.bf16.mxu1 %vm193_vm2, %v2135_v40  ;;  %v7742_v14 = vld [vmem:[#allocation45_spill] sm:$0xff] }
 0x4c5   :  { %v1776_v13 = vpop.xlane.xlu0 %1775  ;;  %v1962_v62 = vadd.f32 %v7742_v14, %v1898_v42 }
 0x4c6   :  { %v2136_v29 = vpack.c.bf16 %v2090_v12, %v2089_v25  ;;  %v2028_v58 = vadd.f32 %v6712_v2, %v1957_v15  ;;  %v1895_v3 = vmul.f32 %v6698_v28, %v1776_v13  ;;  %v2093_v15 = vmax.f32 %v2029_v11, 0.0 }
 0x4c7   :  { %v2031_v13 = vadd.f32 %v6712_v2, %v1960_v16  ;;  %v1902_v11 = vmul.f32 %v6698_v28, %v1797_v63  ;;  %v2033_v16 = vadd.f32 %v6712_v2, %v1962_v62  ;;  %v1904_v63 = vmul.f32 %v6698_v28, %v1803_v26 }
 0x4c8   :  { %v2092_v54 = vmax.f32 %v2028_v58, 0.0  ;;  %v1959_v55 = vadd.f32 %v7741_v0, %v1895_v3  ;;  %5264 = vmatmul.mubr.msk.bf16.gmra.mrb[52].mxu1 %vm193_vm2, %v2136_v29  ;;  %v7743_v58 = vld [vmem:[#allocation48_spill] sm:$0xff] }
 0x4c9   :  { %v1782_v40 = vpop.xlane.xlu0 %1781 }
 0x4ca   :  { %v2137_v24 = vpack.c.bf16 %v2092_v54, %v2091_v34  ;;  %v2030_v25 = vadd.f32 %v6712_v2, %v1959_v55  ;;  %v1897_v12 = vmul.f32 %v6698_v28, %v1782_v40  ;;  %v2095_v55 = vmax.f32 %v2031_v13, 0.0  ;;  %v7744_v40 = vld [vmem:[#allocation50_spill] sm:$0xff] }
 0x4cb   :  { %v1964_v42 = vadd.f32 %v1900_v5, %v7744_v40 }
 0x4cc   :  { %v2094_v57 = vmax.f32 %v2030_v25, 0.0  ;;  %v1961_v49 = vadd.f32 %v1897_v12, %v7743_v58  ;;  %5267 = vmatprep.mubr.msk.bf16.mxu1 %vm193_vm2, %v2137_v24  ;;  %v1815_v12 = vpop.xlane.xlu1 %1814 }
 0x4cd   :  { %v1788_v29 = vpop.xlane.xlu0 %1787  ;;  %v2035_v62 = vadd.f32 %v6712_v2, %v1964_v42 }
 0x4ce   :  { %v2138_v3 = vpack.c.bf16 %v2094_v57, %v2093_v15  ;;  %v2032_v34 = vadd.f32 %v6712_v2, %v1961_v49  ;;  %v1899_v54 = vmul.f32 %v6698_v28, %v1788_v29  ;;  %v7746_v57 = vld [vmem:[#allocation49_spill] sm:$0xff]  ;;  %v2097_v29 = vmax.f32 %v2033_v16, 0.0 }
 0x4cf   :  { %v1966_v13 = vadd.f32 %v7746_v57, %v1902_v11  ;;  %v2099_v26 = vmax.f32 %v2035_v62, 0.0  ;;  %v1906_v16 = vmul.f32 %v6698_v28, %v1809_v21  ;;  %v1908_v62 = vmul.f32 %v6698_v28, %v1815_v12  ;;  %v7751_v21 = vld [vmem:[#allocation56_spill] sm:$0xff] }
 0x4d0   :  { %v2096_v14 = vmax.f32 %v2032_v34, 0.0  ;;  %v1963_v25 = vadd.f32 %v7745_v47, %v1899_v54  ;;  %5268 = vmatmul.mubr.msk.bf16.gmra.mrb[56].mxu1 %vm193_vm2, %v2138_v3  ;;  %v7747_v34 = vld [vmem:[#allocation52_spill] sm:$0xff]  ;;  %v1821_v57 = vpop.xlane.xlu1 %1820 }
 0x4d1   :  { %v1794_v24 = vpop.xlane.xlu0 %1793 }
 0x4d2   :  { %v2139_v58 = vpack.c.bf16 %v2096_v14, %v2095_v55  ;;  %v2034_v15 = vadd.f32 %v6712_v2, %v1963_v25  ;;  %v1901_v49 = vmul.f32 %v6698_v28, %v1794_v24  ;;  %v2037_v25 = vadd.f32 %v6712_v2, %v1966_v13  ;;  %v7748_v24 = vld [vmem:[#allocation54_spill] sm:$0xff] }
 0x4d3   :  { %v1968_v11 = vadd.f32 %v1904_v63, %v7748_v24 }
 0x4d4   :  { %v2098_v5 = vmax.f32 %v2034_v15, 0.0  ;;  %v1965_v40 = vadd.f32 %v1901_v49, %v7747_v34  ;;  %5271 = vmatprep.mubr.msk.bf16.mxu1 %vm193_vm2, %v2139_v58  ;;  %v7749_v15 = vld [vmem:[#allocation51_spill] sm:$0xff] }
 0x4d5   :  { %v1800_v3 = vpop.xlane.xlu0 %1799  ;;  %v2039_v13 = vadd.f32 %v6712_v2, %v1968_v11 }
 0x4d6   :  { %v2140_v54 = vpack.c.bf16 %v2098_v5, %v2097_v29  ;;  %v2036_v14 = vadd.f32 %v6712_v2, %v1965_v40  ;;  %v1903_v55 = vmul.f32 %v6698_v28, %v1800_v3  ;;  %v2101_v5 = vmax.f32 %v2037_v25, 0.0  ;;  %v7750_v3 = vld [vmem:[#allocation53_spill] sm:$0xff] }
 0x4d7   :  { %v1970_v63 = vadd.f32 %v1906_v16, %v7750_v3  ;;  %v1910_v25 = vmul.f32 %v6698_v28, %v1821_v57  ;;  %v7752_v16 = vld [vmem:[#allocation58_spill] sm:$0xff] }
 0x4d8   :  { %v2100_v42 = vmax.f32 %v2036_v14, 0.0  ;;  %v1967_v47 = vadd.f32 %v7749_v15, %v1903_v55  ;;  %5272 = vmatmul.mubr.msk.bf16.gmra.mrb[60].mxu1 %vm193_vm2, %v2140_v54  ;;  %v1827_v55 = vpop.xlane.xlu1 %1826 }
 0x4d9   :  { %v1806_v58 = vpop.xlane.xlu0 %1805  ;;  %v2041_v11 = vadd.f32 %v6712_v2, %v1970_v63 }
 0x4da   :  { %v2141_v49 = vpack.c.bf16 %v2100_v42, %v2099_v26  ;;  %v2038_v29 = vadd.f32 %v6712_v2, %v1967_v47  ;;  %v1905_v40 = vmul.f32 %v6698_v28, %v1806_v58  ;;  %v2103_v42 = vmax.f32 %v2039_v13, 0.0 }
 0x4db   :  { %v1972_v58 = vadd.f32 %v1908_v62, %v7752_v16  ;;  %v1912_v13 = vmul.f32 %v6698_v28, %v1827_v55 }
 0x4dc   :  { %v2102_v34 = vmax.f32 %v2038_v29, 0.0  ;;  %v1969_v14 = vadd.f32 %v1905_v40, %v7751_v21  ;;  %5275 = vmatprep.mubr.msk.bf16.mxu1 %vm193_vm2, %v2141_v49  ;;  %v7753_v29 = vld [vmem:[#allocation55_spill] sm:$0xff]  ;;  %v1833_v57 = vpop.xlane.xlu1 %1832  ;;  %v2105_v21 = vmax.f32 %v2041_v11, 0.0 }
 0x4dd   :  { %v1812_v54 = vpop.xlane.xlu0 %1811  ;;  %v2043_v63 = vadd.f32 %v6712_v2, %v1972_v58  ;;  %v1914_v11 = vmul.f32 %v6698_v28, %v1833_v57  ;;  %v7757_v58 = vld [vmem:[#allocation59_spill] sm:$0xff] }
 0x4de   :  { %v2142_v15 = vpack.c.bf16 %v2102_v34, %v2101_v5  ;;  %v2040_v26 = vadd.f32 %v6712_v2, %v1969_v14  ;;  %v1907_v47 = vmul.f32 %v6698_v28, %v1812_v54  ;;  %v7754_v14 = vld [vmem:[#allocation57_spill] sm:$0xff] }
 0x4df   :  { %v1974_v54 = vadd.f32 %v1910_v25, %v7754_v14  ;;  %v7756_v25 = vld [vmem:[#allocation62_spill] sm:$0xff]  ;;  %v2107_v55 = vmax.f32 %v2043_v63, 0.0 }
 0x4e0   :  { %v2104_v12 = vmax.f32 %v2040_v26, 0.0  ;;  %v1971_v24 = vadd.f32 %v1907_v47, %v7753_v29  ;;  %5276 = vmatmul.mubr.msk.bf16.gmra.mrb[64].mxu1 %vm193_vm2, %v2142_v15  ;;  %v7755_v26 = vld [vmem:[#allocation60_spill] sm:$0xff] }
 0x4e1   :  { %v1818_v49 = vpop.xlane.xlu0 %1817 }
 0x4e2   :  { %v2143_v40 = vpack.c.bf16 %v2104_v12, %v2103_v42  ;;  %v2042_v34 = vadd.f32 %v6712_v2, %v1971_v24  ;;  %v1909_v5 = vmul.f32 %v6698_v28, %v1818_v49  ;;  %v2045_v12 = vadd.f32 %v6712_v2, %v1974_v54 }
 0x4e3   :  { %v1976_v49 = vadd.f32 %v1912_v13, %v7756_v25 }
 0x4e4   :  { %v2106_v62 = vmax.f32 %v2042_v34, 0.0  ;;  %v1973_v16 = vadd.f32 %v1909_v5, %v7755_v26  ;;  %5279 = vmatprep.mubr.msk.bf16.mxu1 %vm193_vm2, %v2143_v40  ;;  %v1839_v5 = vpop.xlane.xlu1 %1838 }
 0x4e5   :  { %v1824_v15 = vpop.xlane.xlu0 %1823  ;;  %v2047_v54 = vadd.f32 %v6712_v2, %v1976_v49  ;;  %v1916_v63 = vmul.f32 %v6698_v28, %v1839_v5 }
 0x4e6   :  { %v2144_v47 = vpack.c.bf16 %v2106_v62, %v2105_v21  ;;  %v2044_v42 = vadd.f32 %v6712_v2, %v1973_v16  ;;  %v1911_v24 = vmul.f32 %v6698_v28, %v1824_v15  ;;  %v2109_v62 = vmax.f32 %v2045_v12, 0.0  ;;  %v7758_v15 = vld [vmem:[#allocation61_spill] sm:$0xff] }
 0x4e7   :  { %v1978_v13 = vadd.f32 %v1914_v11, %v7758_v15  ;;  %v7761_v11 = vld [vmem:[#allocation63_spill] sm:$0xff] }
 0x4e8   :  { %v2108_v14 = vmax.f32 %v2044_v42, 0.0  ;;  %v1975_v34 = vadd.f32 %v1911_v24, %v7757_v58  ;;  %5280 = vmatmul.mubr.msk.bf16.gmra.mrb[68].mxu1 %vm193_vm2, %v2144_v47  ;;  %v7759_v42 = vld [vmem:[#allocation64_spill] sm:$0xff] }
 0x4e9   :  { %v1830_v40 = vpop.xlane.xlu0 %1829  ;;  %v2049_v12 = vadd.f32 %v6712_v2, %v1978_v13 }
 0x4ea   :  { %v2145_v26 = vpack.c.bf16 %v2108_v14, %v2107_v55  ;;  %v2046_v21 = vadd.f32 %v6712_v2, %v1975_v34  ;;  %v1913_v16 = vmul.f32 %v6698_v28, %v1830_v40  ;;  %v2111_v34 = vmax.f32 %v2047_v54, 0.0  ;;  %v7760_v40 = vld [vmem:[#allocation66_spill] sm:$0xff]  ;;  %v7762_v54 = vld [vmem:[#allocation68_spill] sm:$0xff] }
 0x4eb   :  { %v1980_v49 = vadd.f32 %v1916_v63, %v7760_v40 }
 0x4ec   :  { %v2110_v57 = vmax.f32 %v2046_v21, 0.0  ;;  %v1977_v25 = vadd.f32 %v1913_v16, %v7759_v42  ;;  %5283 = vmatprep.mubr.msk.bf16.mxu1 %vm193_vm2, %v2145_v26 }
 0x4ed   :  { %v1836_v47 = vpop.xlane.xlu0 %1835 }
 0x4ee   :  { %v2146_v24 = vpack.c.bf16 %v2110_v57, %v2109_v62  ;;  %v2048_v14 = vadd.f32 %v6712_v2, %v1977_v25  ;;  %v1915_v55 = vmul.f32 %v6698_v28, %v1836_v47  ;;  %v2113_v62 = vmax.f32 %v2049_v12, 0.0 }
 0x4ef   :  { %v2051_v25 = vadd.f32 %v6712_v2, %v1980_v49 }
 0x4f0   :  { %v2112_v58 = vmax.f32 %v2048_v14, 0.0  ;;  %v1979_v15 = vadd.f32 %v1915_v55, %v7761_v11  ;;  %5284 = vmatmul.mubr.msk.bf16.gmra.mrb[72].mxu1 %vm193_vm2, %v2146_v24  ;;  %v1845_v14 = vpop.xlane.xlu1 %1844 }
 0x4f1   :  { %v1842_v5 = vpop.xlane.xlu0 %1841  ;;  %v2115_v55 = vmax.f32 %v2051_v25, 0.0 }
 0x4f2   :  { %v2147_v21 = vpack.c.bf16 %v2112_v58, %v2111_v34  ;;  %v2050_v26 = vadd.f32 %v6712_v2, %v1979_v15  ;;  %v1917_v16 = vmul.f32 %v6698_v28, %v1842_v5  ;;  %v1918_v58 = vmul.f32 %v6698_v28, %v1845_v14  ;;  %v7763_v34 = vld [vmem:[#allocation65_spill] sm:$0xff] }
 0x4f4   :  { %v2114_v57 = vmax.f32 %v2050_v26, 0.0  ;;  %v1981_v47 = vadd.f32 %v1917_v16, %v7762_v54  ;;  %5287 = vmatprep.mubr.msk.bf16.mxu1 %vm193_vm2, %v2147_v21  ;;  %v1982_v12 = vadd.f32 %v1918_v58, %v7763_v34  ;;  %v7764_v26 = vld [vmem:[#allocation67_spill] sm:$0xff] }
 0x4f6   :  { %v2148_v13 = vpack.c.bf16 %v2114_v57, %v2113_v62  ;;  %v2052_v63 = vadd.f32 %v6712_v2, %v1981_v47  ;;  %v2053_v21 = vadd.f32 %v6712_v2, %v1982_v12 }
 0x4f8   :  { %v2116_v24 = vmax.f32 %v2052_v63, 0.0  ;;  %5288 = vmatmul.mubr.msk.bf16.gmra.mrb[76].mxu1 %vm193_vm2, %v2148_v13  ;;  %v2117_v25 = vmax.f32 %v2053_v21, 0.0  ;;  %v6995_v13 = vld [vmem:[%s7564_s9] ss:$0 sm:$0xff] }
 0x4fa   :  { %v2149_v15 = vpack.c.bf16 %v2116_v24, %v2115_v55 }
 0x4fc   :  { %5291 = vmatprep.mubr.msk.bf16.mxu1 %vm193_vm2, %v2149_v15 }
 0x4ff   :  { %v1848_v49 = vpop.xlane.xlu0 %1847 }
 0x500   :  { %v1919_v5 = vmul.f32 %v6698_v28, %v1848_v49 }
 0x502   :  { %v1983_v16 = vadd.f32 %v1919_v5, %v7764_v26 }
 0x504   :  { %v2054_v62 = vadd.f32 %v6712_v2, %v1983_v16 }
 0x506   :  { %v2118_v57 = vmax.f32 %v2054_v62, 0.0 }
 0x508   :  { %v2150_v47 = vpack.c.bf16 %v2118_v57, %v2117_v25 }
 0x50a   :  { %5292 = vmatmul.mubr.msk.bf16.gmra.mrb[80].mxu1 %vm193_vm2, %v2150_v47 }
 0x50c   :  { %v5233_v63 = vpop.f32.mrb[20].mxu1 }
 0x50d   :  { %v2314_v14 = vadd.f32 %v5233_v63, %v6995_v13  ;;  %v2305_v28 = vpop.f32.mrb[21].mxu1 }
 0x50e   :  { %v2306_v55 = vadd.f32 %v6995_v13, %v2305_v28  ;;  %v5234_v24 = vpop.f32.mrb[22].mxu1 }
 0x50f   :  { %v2317_v58 = vadd.f32 %v5234_v24, %v6995_v13  ;;  %v2308_v2 = vpop.f32.mrb[23].mxu1  ;;  %v2562_v12 = vmax.f32 %v2314_v14, 0.0 }
 0x510   :  { %v2309_v15 = vadd.f32 %v6995_v13, %v2308_v2  ;;  %v2560_v5 = vmax.f32 %v2306_v55, 0.0 }
 0x511   :  { %v2563_v49 = vmax.f32 %v2317_v58, 0.0 }
 0x512   :  { %v2561_v21 = vmax.f32 %v2309_v15, 0.0 }
 0x513   :  { %v7001_v16 = vpack.c.bf16 %v2563_v49, %v2562_v12 }
 0x514   :  { %v7003_v62 = vpack.c.bf16 %v2561_v21, %v2560_v5 }
 0x516   :  { %5299 = vmatprep.mubr.msk.bf16.mxu1 %vm193_vm2, %v7003_v62 }
 0x517   :  { %5300 = vmatmul.mubr.msk.bf16.vlgmr.msra.gmra.mrb[84].mxu1 %vm193_vm2, %v7001_v16 }
 0x548   :  { %v5237_v25 = vpop.f32.mrb[24].mxu1 }
 0x549   :  { %v2330_v57 = vadd.f32 %v5237_v25, %v6995_v13  ;;  %v2321_v47 = vpop.f32.mrb[25].mxu1 }
 0x54a   :  { %v2322_v63 = vadd.f32 %v6995_v13, %v2321_v47  ;;  %v5238_v14 = vpop.f32.mrb[26].mxu1 }
 0x54b   :  { %v2333_v28 = vadd.f32 %v5238_v14, %v6995_v13  ;;  %v2324_v55 = vpop.f32.mrb[27].mxu1  ;;  %v2566_v58 = vmax.f32 %v2330_v57, 0.0 }
 0x54c   :  { %v2325_v24 = vadd.f32 %v6995_v13, %v2324_v55  ;;  %v2564_v15 = vmax.f32 %v2322_v63, 0.0 }
 0x54d   :  { %v2567_v2 = vmax.f32 %v2333_v28, 0.0 }
 0x54e   :  { %v2565_v12 = vmax.f32 %v2325_v24, 0.0 }
 0x54f   :  { %v7013_v49 = vpack.c.bf16 %v2567_v2, %v2566_v58 }
 0x550   :  { %v7015_v5 = vpack.c.bf16 %v2565_v12, %v2564_v15 }
 0x552   :  { %5303 = vmatprep.mubr.msk.bf16.mxu1 %vm193_vm2, %v7015_v5 }
 0x553   :  { %5304 = vmatmul.mubr.msk.bf16.gmra.mrb[88].mxu1 %vm193_vm2, %v7013_v49 }
 0x554   :  { %v5241_v21 = vpop.f32.mrb[28].mxu1 }
 0x555   :  { %v2346_v25 = vadd.f32 %v5241_v21, %v6995_v13  ;;  %v2337_v47 = vpop.f32.mrb[29].mxu1 }
 0x556   :  { %v2338_v14 = vadd.f32 %v6995_v13, %v2337_v47  ;;  %v5242_v57 = vpop.f32.mrb[30].mxu1 }
 0x557   :  { %v2349_v63 = vadd.f32 %v5242_v57, %v6995_v13  ;;  %v2340_v28 = vpop.f32.mrb[31].mxu1  ;;  %v2570_v24 = vmax.f32 %v2346_v25, 0.0 }
 0x558   :  { %v2341_v55 = vadd.f32 %v6995_v13, %v2340_v28  ;;  %v2568_v2 = vmax.f32 %v2338_v14, 0.0 }
 0x559   :  { %v2571_v58 = vmax.f32 %v2349_v63, 0.0 }
 0x55a   :  { %v2569_v15 = vmax.f32 %v2341_v55, 0.0 }
 0x55b   :  { %v7025_v12 = vpack.c.bf16 %v2571_v58, %v2570_v24 }
 0x55c   :  { %v7027_v26 = vpack.c.bf16 %v2569_v15, %v2568_v2 }
 0x55e   :  { %5307 = vmatprep.mubr.msk.bf16.mxu1 %vm193_vm2, %v7027_v26 }
 0x55f   :  { %5308 = vmatmul.mubr.msk.bf16.gmra.mrb[92].mxu1 %vm193_vm2, %v7025_v12 }
 0x560   :  { %v5245_v21 = vpop.f32.mrb[32].mxu1 }
 0x561   :  { %v2362_v47 = vadd.f32 %v5245_v21, %v6995_v13  ;;  %v2353_v57 = vpop.f32.mrb[33].mxu1  ;;  %v5595_v21 = vld [vmem:[%s7567_s12] sm:$0xff]  }
 0x562   :  { %v2354_v28 = vadd.f32 %v6995_v13, %v2353_v57  ;;  %v5246_v25 = vpop.f32.mrb[34].mxu1  ;;  %5363 = vmatprep.subr.bf16.mxu0 %v5595_v21 }
 0x563   :  { %v2365_v14 = vadd.f32 %v5246_v25, %v6995_v13  ;;  %v2356_v63 = vpop.f32.mrb[35].mxu1  ;;  %v2574_v24 = vmax.f32 %v2362_v47, 0.0  ;;  %5364 = vmatpush3.bf16.msra.mxu0 %v5595_v21 }
 0x564   :  { %v2357_v55 = vadd.f32 %v6995_v13, %v2356_v63  ;;  %v2572_v2 = vmax.f32 %v2354_v28, 0.0 }
 0x565   :  { %v2575_v58 = vmax.f32 %v2365_v14, 0.0 }
 0x566   :  { %v2573_v15 = vmax.f32 %v2357_v55, 0.0 }
 0x567   :  { %v7037_v34 = vpack.c.bf16 %v2575_v58, %v2574_v24  ;;  %v5596_v24 = vld [vmem:[%s7567_s12 + $0x8] sm:$0xff]   ;;  %s4562_s12 = sshll.u32 %s5851_s8, 4  ;;  %s4563_s12 = int_to_ptr.vmem [resolvable:$true] %s4562_s12 }
 0x568   :  { %v7039_v54 = vpack.c.bf16 %v2573_v15, %v2572_v2  ;;  %5365 = vmatprep.subr.bf16.mxu0 %v5596_v24  ;;  %p5802_p3 = scmp.lt.s32.totalorder %s4563_s12, %s4563_s12 }
 0x569   :  { %7765 = vst [vmem:[#allocation34_spill] sm:$0xff] %v7037_v34  ;;  %5366 = vmatpush3.bf16.msra.mxu0 %v5596_v24 }
 0x56a   :  { %7766 = vst [vmem:[#allocation35_spill] sm:$0xff] %v7039_v54  ;;  %5311 = vmatprep.mubr.msk.bf16.mxu1 %vm193_vm2, %v7039_v54 }
 0x56b   :  { %5312 = vmatmul.mubr.msk.bf16.gmra.mrb[96].mxu1 %vm193_vm2, %v7037_v34 }
 0x56c   :  { %v5249_v57 = vpop.f32.mrb[36].mxu1 }
 0x56d   :  { %v2378_v47 = vadd.f32 %v5249_v57, %v6995_v13  ;;  %v2369_v25 = vpop.f32.mrb[37].mxu1 }
 0x56e   :  { %v2370_v28 = vadd.f32 %v6995_v13, %v2369_v25  ;;  %v5250_v14 = vpop.f32.mrb[38].mxu1 }
 0x56f   :  { %v2381_v63 = vadd.f32 %v5250_v14, %v6995_v13  ;;  %v2372_v55 = vpop.f32.mrb[39].mxu1  ;;  %v2578_v2 = vmax.f32 %v2378_v47, 0.0 }
 0x570   :  { %v2373_v58 = vadd.f32 %v6995_v13, %v2372_v55  ;;  %v2576_v40 = vmax.f32 %v2370_v28, 0.0 }
 0x571   :  { %v2579_v15 = vmax.f32 %v2381_v63, 0.0 }
 0x572   :  { %v2577_v57 = vmax.f32 %v2373_v58, 0.0 }
 0x573   :  { %v7055_v42 = vpack.c.bf16 %v2579_v15, %v2578_v2 }
 0x574   :  { %v7057_v25 = vpack.c.bf16 %v2577_v57, %v2576_v40 }
 0x576   :  { %5315 = vmatprep.mubr.msk.bf16.mxu1 %vm193_vm2, %v7057_v25 }
 0x577   :  { %5316 = vmatmul.mubr.msk.bf16.gmra.mrb[100].mxu1 %vm193_vm2, %v7055_v42 }
 0x578   :  { %v5253_v21 = vpop.f32.mrb[40].mxu1 }
 0x579   :  { %v2394_v14 = vadd.f32 %v5253_v21, %v6995_v13  ;;  %v2385_v55 = vpop.f32.mrb[41].mxu1 }
 0x57a   :  { %v2386_v47 = vadd.f32 %v6995_v13, %v2385_v55  ;;  %v5254_v63 = vpop.f32.mrb[42].mxu1 }
 0x57b   :  { %v2397_v28 = vadd.f32 %v5254_v63, %v6995_v13  ;;  %v2388_v24 = vpop.f32.mrb[43].mxu1  ;;  %v2582_v40 = vmax.f32 %v2394_v14, 0.0 }
 0x57c   :  { %v2389_v58 = vadd.f32 %v6995_v13, %v2388_v24  ;;  %v2580_v15 = vmax.f32 %v2386_v47, 0.0 }
 0x57d   :  { %v2583_v2 = vmax.f32 %v2397_v28, 0.0 }
 0x57e   :  { %v2581_v57 = vmax.f32 %v2389_v58, 0.0 }
 0x57f   :  { %v7067_v11 = vpack.c.bf16 %v2583_v2, %v2582_v40 }
 0x580   :  { %v7069_v3 = vpack.c.bf16 %v2581_v57, %v2580_v15 }
 0x582   :  { %5319 = vmatprep.mubr.msk.bf16.mxu1 %vm193_vm2, %v7069_v3 }
 0x583   :  { %5320 = vmatmul.mubr.msk.bf16.gmra.mrb[104].mxu1 %vm193_vm2, %v7067_v11 }
 0x584   :  { %v5257_v21 = vpop.f32.mrb[44].mxu1 }
 0x585   :  { %v2410_v55 = vadd.f32 %v5257_v21, %v6995_v13  ;;  %v2401_v63 = vpop.f32.mrb[45].mxu1 }
 0x586   :  { %v2402_v24 = vadd.f32 %v6995_v13, %v2401_v63  ;;  %v5258_v14 = vpop.f32.mrb[46].mxu1 }
 0x587   :  { %v2413_v47 = vadd.f32 %v5258_v14, %v6995_v13  ;;  %v2404_v28 = vpop.f32.mrb[47].mxu1  ;;  %v2586_v40 = vmax.f32 %v2410_v55, 0.0 }
 0x588   :  { %v2405_v58 = vadd.f32 %v6995_v13, %v2404_v28  ;;  %v2584_v15 = vmax.f32 %v2402_v24, 0.0 }
 0x589   :  { %v2587_v2 = vmax.f32 %v2413_v47, 0.0 }
 0x58a   :  { %v2585_v57 = vmax.f32 %v2405_v58, 0.0 }
 0x58b   :  { %v7079_v29 = vpack.c.bf16 %v2587_v2, %v2586_v40 }
 0x58c   :  { %v7081_v17 = vpack.c.bf16 %v2585_v57, %v2584_v15 }
 0x58e   :  { %5323 = vmatprep.mubr.msk.bf16.mxu1 %vm193_vm2, %v7081_v17 }
 0x58f   :  { %5324 = vmatmul.mubr.msk.bf16.gmra.mrb[108].mxu1 %vm193_vm2, %v7079_v29 }
 0x590   :  { %v5261_v21 = vpop.f32.mrb[48].mxu1 }
 0x591   :  { %v2426_v63 = vadd.f32 %v5261_v21, %v6995_v13  ;;  %v2417_v14 = vpop.f32.mrb[49].mxu1 }
 0x592   :  { %v2418_v28 = vadd.f32 %v6995_v13, %v2417_v14  ;;  %v5262_v55 = vpop.f32.mrb[50].mxu1 }
 0x593   :  { %v2429_v24 = vadd.f32 %v5262_v55, %v6995_v13  ;;  %v2420_v47 = vpop.f32.mrb[51].mxu1  ;;  %v2590_v40 = vmax.f32 %v2426_v63, 0.0 }
 0x594   :  { %v2421_v58 = vadd.f32 %v6995_v13, %v2420_v47  ;;  %v2588_v15 = vmax.f32 %v2418_v28, 0.0 }
 0x595   :  { %v2591_v2 = vmax.f32 %v2429_v24, 0.0 }
 0x596   :  { %v2589_v57 = vmax.f32 %v2421_v58, 0.0 }
 0x597   :  { %v7091_v0 = vpack.c.bf16 %v2591_v2, %v2590_v40 }
 0x598   :  { %v7093_v18 = vpack.c.bf16 %v2589_v57, %v2588_v15 }
 0x599   :  { %7767 = vst [vmem:[#allocation36_spill] sm:$0xff] %v7091_v0 }
 0x59a   :  { %5327 = vmatprep.mubr.msk.bf16.mxu1 %vm193_vm2, %v7093_v18 }
 0x59b   :  { %v5265_v21 = vpop.f32.mrb[52].mxu1  ;;  %5328 = vmatmul.mubr.msk.bf16.gmra.mrb[112].mxu1 %vm193_vm2, %v7091_v0 }
 0x59c   :  { %v2442_v14 = vadd.f32 %v5265_v21, %v6995_v13  ;;  %v2433_v55 = vpop.f32.mrb[53].mxu1 }
 0x59d   :  { %v2434_v47 = vadd.f32 %v6995_v13, %v2433_v55  ;;  %v5266_v63 = vpop.f32.mrb[54].mxu1 }
 0x59e   :  { %v2445_v28 = vadd.f32 %v5266_v63, %v6995_v13  ;;  %v2436_v24 = vpop.f32.mrb[55].mxu1  ;;  %v2594_v40 = vmax.f32 %v2442_v14, 0.0 }
 0x59f   :  { %v2437_v58 = vadd.f32 %v6995_v13, %v2436_v24  ;;  %v2592_v15 = vmax.f32 %v2434_v47, 0.0 }
 0x5a0   :  { %v2595_v2 = vmax.f32 %v2445_v28, 0.0 }
 0x5a1   :  { %v2593_v57 = vmax.f32 %v2437_v58, 0.0 }
 0x5a2   :  { %v7103_v34 = vpack.c.bf16 %v2595_v2, %v2594_v40 }
 0x5a3   :  { %v7105_v50 = vpack.c.bf16 %v2593_v57, %v2592_v15  ;;  %v5269_v10 = vpop.f32.mrb[56].mxu1 }
 0x5a4   :  { %7768 = vst [vmem:[#allocation37_spill] sm:$0xff] %v7103_v34  ;;  %v2458_v21 = vadd.f32 %v5269_v10, %v6995_v13  ;;  %v2449_v0 = vpop.f32.mrb[57].mxu1 }
 0x5a5   :  { %7769 = vst [vmem:[#allocation69_spill] sm:$0xff] %v7105_v50  ;;  %v2450_v55 = vadd.f32 %v6995_v13, %v2449_v0  ;;  %v5270_v54 = vpop.f32.mrb[58].mxu1  ;;  %5331 = vmatprep.mubr.msk.bf16.mxu1 %vm193_vm2, %v7105_v50 }
 0x5a6   :  { %v2461_v63 = vadd.f32 %v5270_v54, %v6995_v13  ;;  %v2452_v14 = vpop.f32.mrb[59].mxu1  ;;  %5332 = vmatmul.mubr.msk.bf16.gmra.mrb[116].mxu1 %vm193_vm2, %v7103_v34  ;;  %v2598_v28 = vmax.f32 %v2458_v21, 0.0 }
 0x5a7   :  { %v2453_v47 = vadd.f32 %v6995_v13, %v2452_v14  ;;  %v2596_v58 = vmax.f32 %v2450_v55, 0.0 }
 0x5a8   :  { %v2599_v24 = vmax.f32 %v2461_v63, 0.0 }
 0x5a9   :  { %v2597_v40 = vmax.f32 %v2453_v47, 0.0 }
 0x5aa   :  { %v7115_v10 = vpack.c.bf16 %v2599_v24, %v2598_v28 }
 0x5ab   :  { %v7117_v2 = vpack.c.bf16 %v2597_v40, %v2596_v58  ;;  %v5273_v0 = vpop.f32.mrb[60].mxu1 }
 0x5ac   :  { %7770 = vst [vmem:[#allocation70_spill] sm:$0xff] %v7115_v10  ;;  %v2474_v15 = vadd.f32 %v5273_v0, %v6995_v13  ;;  %v2465_v57 = vpop.f32.mrb[61].mxu1 }
 0x5ad   :  { %7771 = vst [vmem:[#allocation71_spill] sm:$0xff] %v7117_v2  ;;  %v2466_v54 = vadd.f32 %v6995_v13, %v2465_v57  ;;  %v5274_v50 = vpop.f32.mrb[62].mxu1  ;;  %5335 = vmatprep.mubr.msk.bf16.mxu1 %vm193_vm2, %v7117_v2 }
 0x5ae   :  { %v2477_v14 = vadd.f32 %v5274_v50, %v6995_v13  ;;  %v2468_v21 = vpop.f32.mrb[63].mxu1  ;;  %5336 = vmatmul.mubr.msk.bf16.gmra.mrb[120].mxu1 %vm193_vm2, %v7115_v10  ;;  %v2602_v63 = vmax.f32 %v2474_v15, 0.0 }
 0x5af   :  { %v2469_v55 = vadd.f32 %v6995_v13, %v2468_v21  ;;  %v2600_v28 = vmax.f32 %v2466_v54, 0.0 }
 0x5b0   :  { %v2603_v47 = vmax.f32 %v2477_v14, 0.0 }
 0x5b1   :  { %v2601_v24 = vmax.f32 %v2469_v55, 0.0 }
 0x5b2   :  { %v7127_v58 = vpack.c.bf16 %v2603_v47, %v2602_v63 }
 0x5b3   :  { %v7129_v40 = vpack.c.bf16 %v2601_v24, %v2600_v28  ;;  %v5277_v0 = vpop.f32.mrb[64].mxu1 }
 0x5b4   :  { %7772 = vst [vmem:[#allocation72_spill] sm:$0xff] %v7127_v58  ;;  %v2490_v57 = vadd.f32 %v5277_v0, %v6995_v13  ;;  %v2481_v2 = vpop.f32.mrb[65].mxu1 }
 0x5b5   :  { %7773 = vst [vmem:[#allocation73_spill] sm:$0xff] %v7129_v40  ;;  %v2482_v50 = vadd.f32 %v6995_v13, %v2481_v2  ;;  %v5278_v34 = vpop.f32.mrb[66].mxu1  ;;  %5339 = vmatprep.mubr.msk.bf16.mxu1 %vm193_vm2, %v7129_v40 }
 0x5b6   :  { %v2493_v21 = vadd.f32 %v5278_v34, %v6995_v13  ;;  %v2484_v15 = vpop.f32.mrb[67].mxu1  ;;  %5340 = vmatmul.mubr.msk.bf16.gmra.mrb[124].mxu1 %vm193_vm2, %v7127_v58  ;;  %v2606_v14 = vmax.f32 %v2490_v57, 0.0 }
 0x5b7   :  { %v2485_v54 = vadd.f32 %v6995_v13, %v2484_v15  ;;  %v2604_v63 = vmax.f32 %v2482_v50, 0.0 }
 0x5b8   :  { %v2607_v55 = vmax.f32 %v2493_v21, 0.0 }
 0x5b9   :  { %v2605_v47 = vmax.f32 %v2485_v54, 0.0 }
 0x5ba   :  { %v7139_v28 = vpack.c.bf16 %v2607_v55, %v2606_v14 }
 0x5bb   :  { %v7141_v24 = vpack.c.bf16 %v2605_v47, %v2604_v63  ;;  %v5281_v2 = vpop.f32.mrb[68].mxu1 }
 0x5bc   :  { %7774 = vst [vmem:[#allocation74_spill] sm:$0xff] %v7139_v28  ;;  %v2506_v0 = vadd.f32 %v5281_v2, %v6995_v13  ;;  %v2497_v40 = vpop.f32.mrb[69].mxu1 }
 0x5bd   :  { %7775 = vst [vmem:[#allocation75_spill] sm:$0xff] %v7141_v24  ;;  %v2498_v34 = vadd.f32 %v6995_v13, %v2497_v40  ;;  %v5282_v10 = vpop.f32.mrb[70].mxu1  ;;  %5343 = vmatprep.mubr.msk.bf16.mxu1 %vm193_vm2, %v7141_v24 }
 0x5be   :  { %v2509_v15 = vadd.f32 %v5282_v10, %v6995_v13  ;;  %v2500_v57 = vpop.f32.mrb[71].mxu1  ;;  %5344 = vmatmul.mubr.msk.bf16.gmra.mrb[128].mxu1 %vm193_vm2, %v7139_v28  ;;  %v2610_v21 = vmax.f32 %v2506_v0, 0.0 }
 0x5bf   :  { %v2501_v50 = vadd.f32 %v6995_v13, %v2500_v57  ;;  %v2608_v14 = vmax.f32 %v2498_v34, 0.0 }
 0x5c0   :  { %v2611_v54 = vmax.f32 %v2509_v15, 0.0 }
 0x5c1   :  { %v2609_v55 = vmax.f32 %v2501_v50, 0.0 }
 0x5c2   :  { %v7151_v63 = vpack.c.bf16 %v2611_v54, %v2610_v21 }
 0x5c3   :  { %v7153_v47 = vpack.c.bf16 %v2609_v55, %v2608_v14  ;;  %v5285_v40 = vpop.f32.mrb[72].mxu1 }
 0x5c4   :  { %7776 = vst [vmem:[#allocation76_spill] sm:$0xff] %v7151_v63  ;;  %v2522_v2 = vadd.f32 %v5285_v40, %v6995_v13  ;;  %v2513_v24 = vpop.f32.mrb[73].mxu1 }
 0x5c5   :  { %7777 = vst [vmem:[#allocation77_spill] sm:$0xff] %v7153_v47  ;;  %v2514_v10 = vadd.f32 %v6995_v13, %v2513_v24  ;;  %v5286_v58 = vpop.f32.mrb[74].mxu1  ;;  %5347 = vmatprep.mubr.msk.bf16.mxu1 %vm193_vm2, %v7153_v47 }
 0x5c6   :  { %v2525_v57 = vadd.f32 %v5286_v58, %v6995_v13  ;;  %v2516_v0 = vpop.f32.mrb[75].mxu1  ;;  %5348 = vmatmul.mubr.msk.bf16.gmra.mrb[132].mxu1 %vm193_vm2, %v7151_v63  ;;  %v2614_v15 = vmax.f32 %v2522_v2, 0.0 }
 0x5c7   :  { %v2517_v34 = vadd.f32 %v6995_v13, %v2516_v0  ;;  %v2612_v21 = vmax.f32 %v2514_v10, 0.0 }
 0x5c8   :  { %v2615_v50 = vmax.f32 %v2525_v57, 0.0 }
 0x5c9   :  { %v2613_v54 = vmax.f32 %v2517_v34, 0.0 }
 0x5ca   :  { %v7163_v14 = vpack.c.bf16 %v2615_v50, %v2614_v15 }
 0x5cb   :  { %v7165_v55 = vpack.c.bf16 %v2613_v54, %v2612_v21  ;;  %v5289_v24 = vpop.f32.mrb[76].mxu1 }
 0x5cc   :  { %7778 = vst [vmem:[#allocation78_spill] sm:$0xff] %v7163_v14  ;;  %v2538_v40 = vadd.f32 %v5289_v24, %v6995_v13  ;;  %v2529_v28 = vpop.f32.mrb[77].mxu1 }
 0x5cd   :  { %7779 = vst [vmem:[#allocation79_spill] sm:$0xff] %v7165_v55  ;;  %v2530_v58 = vadd.f32 %v6995_v13, %v2529_v28  ;;  %v5290_v47 = vpop.f32.mrb[78].mxu1  ;;  %5351 = vmatprep.mubr.msk.bf16.mxu1 %vm193_vm2, %v7165_v55 }
 0x5ce   :  { %v2541_v0 = vadd.f32 %v5290_v47, %v6995_v13  ;;  %v2532_v2 = vpop.f32.mrb[79].mxu1  ;;  %5352 = vmatmul.mubr.msk.bf16.gmra.mrb[136].mxu1 %vm193_vm2, %v7163_v14  ;;  %v2618_v57 = vmax.f32 %v2538_v40, 0.0 }
 0x5cf   :  { %v2533_v10 = vadd.f32 %v6995_v13, %v2532_v2  ;;  %v2616_v15 = vmax.f32 %v2530_v58, 0.0 }
 0x5d0   :  { %v2619_v34 = vmax.f32 %v2541_v0, 0.0 }
 0x5d1   :  { %v2617_v50 = vmax.f32 %v2533_v10, 0.0 }
 0x5d2   :  { %v7175_v21 = vpack.c.bf16 %v2619_v34, %v2618_v57 }
 0x5d3   :  { %v7177_v54 = vpack.c.bf16 %v2617_v50, %v2616_v15 }
 0x5d4   :  { %7780 = vst [vmem:[#allocation80_spill] sm:$0xff] %v7175_v21 }
 0x5d5   :  { %7781 = vst [vmem:[#allocation81_spill] sm:$0xff] %v7177_v54  ;;  %5355 = vmatprep.mubr.msk.bf16.mxu1 %vm193_vm2, %v7177_v54 }
 0x5d6   :  { %5356 = vmatmul.mubr.msk.bf16.gmra.mrb[140].mxu1 %vm193_vm2, %v7175_v21 }
 0x5dd   :  { %v5293_v28 = vpop.f32.mrb[80].mxu1 }
 0x5de   :  { %v2554_v47 = vadd.f32 %v5293_v28, %v6995_v13  ;;  %v2545_v24 = vpop.f32.mrb[81].mxu1  ;;  %v7198_v28 = vld [vmem:[%s7566_s11] ss:$0 sm:$0xff] }
 0x5df   :  { %v2546_v2 = vadd.f32 %v6995_v13, %v2545_v24  ;;  %v5294_v40 = vpop.f32.mrb[82].mxu1 }
 0x5e0   :  { %v2557_v58 = vadd.f32 %v5294_v40, %v6995_v13  ;;  %v2548_v0 = vpop.f32.mrb[83].mxu1  ;;  %v2622_v57 = vmax.f32 %v2554_v47, 0.0 }
 0x5e1   :  { %v2549_v10 = vadd.f32 %v6995_v13, %v2548_v0  ;;  %v2620_v15 = vmax.f32 %v2546_v2, 0.0 }
 0x5e2   :  { %v2623_v34 = vmax.f32 %v2557_v58, 0.0 }
 0x5e3   :  { %v2621_v50 = vmax.f32 %v2549_v10, 0.0 }
 0x5e4   :  { %v7187_v54 = vpack.c.bf16 %v2623_v34, %v2622_v57 }
 0x5e5   :  { %v7189_v14 = vpack.c.bf16 %v2621_v50, %v2620_v15 }
 0x5e6   :  { %7782 = vst [vmem:[#allocation82_spill] sm:$0xff] %v7187_v54 }
 0x5e7   :  { %7783 = vst [vmem:[#allocation83_spill] sm:$0xff] %v7189_v14  ;;  %5359 = vmatprep.mubr.msk.bf16.mxu1 %vm193_vm2, %v7189_v14 }
 0x5e8   :  { %5360 = vmatmul.mubr.msk.bf16.gmra.mrb[144].mxu1 %vm193_vm2, %v7187_v54 }
 0x5ea   :  { %v5301_v13 = vpop.f32.mrb[84].mxu1 }
 0x5eb   :  { %v2818_v47 = vadd.f32 %v5301_v13, %v7198_v28  ;;  %v2809_v24 = vpop.f32.mrb[85].mxu1 }
 0x5ec   :  { %v2810_v2 = vadd.f32 %v7198_v28, %v2809_v24  ;;  %v5302_v40 = vpop.f32.mrb[86].mxu1 }
 0x5ed   :  { %v2821_v58 = vadd.f32 %v5302_v40, %v7198_v28  ;;  %v2812_v0 = vpop.f32.mrb[87].mxu1  ;;  %v3066_v57 = vmax.f32 %v2818_v47, 0.0 }
 0x5ee   :  { %v2813_v10 = vadd.f32 %v7198_v28, %v2812_v0  ;;  %v3064_v15 = vmax.f32 %v2810_v2, 0.0 }
 0x5ef   :  { %v3067_v34 = vmax.f32 %v2821_v58, 0.0 }
 0x5f0   :  { %v3065_v50 = vmax.f32 %v2813_v10, 0.0 }
 0x5f1   :  { %v3129_v54 = vpack.c.bf16 %v3067_v34, %v3066_v57 }
 0x5f2   :  { %v3128_v14 = vpack.c.bf16 %v3065_v50, %v3064_v15 }
 0x5f4   :  { %5367 = vmatprep.mubr.msk.bf16.mxu0 %vm193_vm2, %v3128_v14 }
 0x5f5   :  { %5368 = vmatmul.mubr.msk.bf16.vlgmr.msra.gmra.mrb[68].mxu0 %vm193_vm2, %v3129_v54 }
 0x626   :  { %v5305_v13 = vpop.f32.mrb[88].mxu1 }
 0x627   :  { %v2834_v21 = vadd.f32 %v5305_v13, %v7198_v28  ;;  %v2825_v24 = vpop.f32.mrb[89].mxu1 }
 0x628   :  { %v2826_v55 = vadd.f32 %v7198_v28, %v2825_v24  ;;  %v5306_v40 = vpop.f32.mrb[90].mxu1 }
 0x629   :  { %v2837_v63 = vadd.f32 %v5306_v40, %v7198_v28  ;;  %v2828_v0 = vpop.f32.mrb[91].mxu1  ;;  %v3070_v2 = vmax.f32 %v2834_v21, 0.0 }
 0x62a   :  { %v2829_v47 = vadd.f32 %v7198_v28, %v2828_v0  ;;  %v3068_v10 = vmax.f32 %v2826_v55, 0.0 }
 0x62b   :  { %v3071_v58 = vmax.f32 %v2837_v63, 0.0 }
 0x62c   :  { %v3069_v57 = vmax.f32 %v2829_v47, 0.0 }
 0x62d   :  { %v3131_v34 = vpack.c.bf16 %v3071_v58, %v3070_v2 }
 0x62e   :  { %v3130_v14 = vpack.c.bf16 %v3069_v57, %v3068_v10 }
 0x630   :  { %5371 = vmatprep.mubr.msk.bf16.mxu0 %vm193_vm2, %v3130_v14 }
 0x631   :  { %5372 = vmatmul.mubr.msk.bf16.gmra.mrb[72].mxu0 %vm193_vm2, %v3131_v34 }
 0x632   :  { %v5309_v54 = vpop.f32.mrb[92].mxu1 }
 0x633   :  { %v2850_v15 = vadd.f32 %v5309_v54, %v7198_v28  ;;  %v2841_v50 = vpop.f32.mrb[93].mxu1 }
 0x634   :  { %v2842_v13 = vadd.f32 %v7198_v28, %v2841_v50  ;;  %v5310_v24 = vpop.f32.mrb[94].mxu1 }
 0x635   :  { %v2853_v40 = vadd.f32 %v5310_v24, %v7198_v28  ;;  %v2844_v0 = vpop.f32.mrb[95].mxu1  ;;  %v3074_v55 = vmax.f32 %v2850_v15, 0.0 }
 0x636   :  { %v2845_v63 = vadd.f32 %v7198_v28, %v2844_v0  ;;  %v3072_v47 = vmax.f32 %v2842_v13, 0.0 }
 0x637   :  { %v3075_v21 = vmax.f32 %v2853_v40, 0.0 }
 0x638   :  { %v3073_v2 = vmax.f32 %v2845_v63, 0.0 }
 0x639   :  { %v3133_v58 = vpack.c.bf16 %v3075_v21, %v3074_v55 }
 0x63a   :  { %v3132_v10 = vpack.c.bf16 %v3073_v2, %v3072_v47  ;;  %v5849_v2 = vmov 0  }
 0x63b   :  { %5589 = vset.pattern.permute.xlu1 %v5849_v2  ;;  %5590 = vset.pattern.permute.xlu0 %v5849_v2 }
 0x63c   :  { %5375 = vmatprep.mubr.msk.bf16.mxu0 %vm193_vm2, %v3132_v10 }
 0x63d   :  { %5376 = vmatmul.mubr.msk.bf16.gmra.mrb[76].mxu0 %vm193_vm2, %v3133_v58 }
 0x63e   :  { %v5313_v57 = vpop.f32.mrb[96].mxu1 }
 0x63f   :  { %v2866_v34 = vadd.f32 %v5313_v57, %v7198_v28  ;;  %v2857_v14 = vpop.f32.mrb[97].mxu1 }
 0x640   :  { %v2858_v54 = vadd.f32 %v7198_v28, %v2857_v14  ;;  %v5314_v50 = vpop.f32.mrb[98].mxu1 }
 0x641   :  { %v2869_v24 = vadd.f32 %v5314_v50, %v7198_v28  ;;  %v2860_v0 = vpop.f32.mrb[99].mxu1  ;;  %v3078_v13 = vmax.f32 %v2866_v34, 0.0 }
 0x642   :  { %v2861_v15 = vadd.f32 %v7198_v28, %v2860_v0  ;;  %v3076_v63 = vmax.f32 %v2858_v54, 0.0 }
 0x643   :  { %v3079_v40 = vmax.f32 %v2869_v24, 0.0 }
 0x644   :  { %v3077_v55 = vmax.f32 %v2861_v15, 0.0 }
 0x645   :  { %v3135_v21 = vpack.c.bf16 %v3079_v40, %v3078_v13 }
 0x646   :  { %v3134_v47 = vpack.c.bf16 %v3077_v55, %v3076_v63 }
 0x648   :  { %5379 = vmatprep.mubr.msk.bf16.mxu0 %vm193_vm2, %v3134_v47 }
 0x649   :  { %5380 = vmatmul.mubr.msk.bf16.gmra.mrb[80].mxu0 %vm193_vm2, %v3135_v21 }
 0x64a   :  { %v5317_v58 = vpop.f32.mrb[100].mxu1 }
 0x64b   :  { %v2882_v10 = vadd.f32 %v5317_v58, %v7198_v28  ;;  %v2873_v57 = vpop.f32.mrb[101].mxu1 }
 0x64c   :  { %v2874_v14 = vadd.f32 %v7198_v28, %v2873_v57  ;;  %v5318_v50 = vpop.f32.mrb[102].mxu1 }
 0x64d   :  { %v2885_v34 = vadd.f32 %v5318_v50, %v7198_v28  ;;  %v2876_v54 = vpop.f32.mrb[103].mxu1  ;;  %v3082_v0 = vmax.f32 %v2882_v10, 0.0 }
 0x64e   :  { %v2877_v24 = vadd.f32 %v7198_v28, %v2876_v54  ;;  %v3080_v13 = vmax.f32 %v2874_v14, 0.0 }
 0x64f   :  { %v3083_v15 = vmax.f32 %v2885_v34, 0.0 }
 0x650   :  { %v3081_v40 = vmax.f32 %v2877_v24, 0.0 }
 0x651   :  { %v3137_v63 = vpack.c.bf16 %v3083_v15, %v3082_v0 }
 0x652   :  { %v3136_v55 = vpack.c.bf16 %v3081_v40, %v3080_v13 }
 0x654   :  { %5383 = vmatprep.mubr.msk.bf16.mxu0 %vm193_vm2, %v3136_v55 }
 0x655   :  { %5384 = vmatmul.mubr.msk.bf16.gmra.mrb[84].mxu0 %vm193_vm2, %v3137_v63 }
 0x656   :  { %v5321_v21 = vpop.f32.mrb[104].mxu1 }
 0x657   :  { %v2898_v47 = vadd.f32 %v5321_v21, %v7198_v28  ;;  %v2889_v2 = vpop.f32.mrb[105].mxu1 }
 0x658   :  { %v2890_v58 = vadd.f32 %v7198_v28, %v2889_v2  ;;  %v5322_v57 = vpop.f32.mrb[106].mxu1 }
 0x659   :  { %v2901_v50 = vadd.f32 %v5322_v57, %v7198_v28  ;;  %v2892_v54 = vpop.f32.mrb[107].mxu1  ;;  %v3086_v14 = vmax.f32 %v2898_v47, 0.0 }
 0x65a   :  { %v2893_v10 = vadd.f32 %v7198_v28, %v2892_v54  ;;  %v3084_v24 = vmax.f32 %v2890_v58, 0.0 }
 0x65b   :  { %v3087_v34 = vmax.f32 %v2901_v50, 0.0 }
 0x65c   :  { %v3085_v0 = vmax.f32 %v2893_v10, 0.0 }
 0x65d   :  { %v3139_v15 = vpack.c.bf16 %v3087_v34, %v3086_v14 }
 0x65e   :  { %v3138_v13 = vpack.c.bf16 %v3085_v0, %v3084_v24 }
 0x660   :  { %5387 = vmatprep.mubr.msk.bf16.mxu0 %vm193_vm2, %v3138_v13 }
 0x661   :  { %5388 = vmatmul.mubr.msk.bf16.gmra.mrb[88].mxu0 %vm193_vm2, %v3139_v15 }
 0x662   :  { %v5325_v40 = vpop.f32.mrb[108].mxu1 }
 0x663   :  { %v2914_v63 = vadd.f32 %v5325_v40, %v7198_v28  ;;  %v2905_v55 = vpop.f32.mrb[109].mxu1 }
 0x664   :  { %v2906_v21 = vadd.f32 %v7198_v28, %v2905_v55  ;;  %v5326_v2 = vpop.f32.mrb[110].mxu1 }
 0x665   :  { %v2917_v57 = vadd.f32 %v5326_v2, %v7198_v28  ;;  %v2908_v54 = vpop.f32.mrb[111].mxu1  ;;  %v3090_v58 = vmax.f32 %v2914_v63, 0.0 }
 0x666   :  { %v2909_v47 = vadd.f32 %v7198_v28, %v2908_v54  ;;  %v3088_v10 = vmax.f32 %v2906_v21, 0.0 }
 0x667   :  { %v3091_v50 = vmax.f32 %v2917_v57, 0.0 }
 0x668   :  { %v3089_v14 = vmax.f32 %v2909_v47, 0.0 }
 0x669   :  { %v3141_v34 = vpack.c.bf16 %v3091_v50, %v3090_v58 }
 0x66a   :  { %v3140_v24 = vpack.c.bf16 %v3089_v14, %v3088_v10 }
 0x66c   :  { %5391 = vmatprep.mubr.msk.bf16.mxu0 %vm193_vm2, %v3140_v24 }
 0x66d   :  { %5392 = vmatmul.mubr.msk.bf16.gmra.mrb[92].mxu0 %vm193_vm2, %v3141_v34 }
 0x66e   :  { %v5329_v0 = vpop.f32.mrb[112].mxu1 }
 0x66f   :  { %v2930_v15 = vadd.f32 %v5329_v0, %v7198_v28  ;;  %v2921_v13 = vpop.f32.mrb[113].mxu1 }
 0x670   :  { %v2922_v40 = vadd.f32 %v7198_v28, %v2921_v13  ;;  %v5330_v55 = vpop.f32.mrb[114].mxu1 }
 0x671   :  { %v2933_v2 = vadd.f32 %v5330_v55, %v7198_v28  ;;  %v2924_v54 = vpop.f32.mrb[115].mxu1  ;;  %v3094_v21 = vmax.f32 %v2930_v15, 0.0 }
 0x672   :  { %v2925_v63 = vadd.f32 %v7198_v28, %v2924_v54  ;;  %v3092_v47 = vmax.f32 %v2922_v40, 0.0 }
 0x673   :  { %v3095_v57 = vmax.f32 %v2933_v2, 0.0 }
 0x674   :  { %v3093_v58 = vmax.f32 %v2925_v63, 0.0 }
 0x675   :  { %v3143_v50 = vpack.c.bf16 %v3095_v57, %v3094_v21 }
 0x676   :  { %v3142_v10 = vpack.c.bf16 %v3093_v58, %v3092_v47 }
 0x678   :  { %5395 = vmatprep.mubr.msk.bf16.mxu0 %vm193_vm2, %v3142_v10 }
 0x679   :  { %v5333_v14 = vpop.f32.mrb[116].mxu1  ;;  %5396 = vmatmul.mubr.msk.bf16.gmra.mrb[96].mxu0 %vm193_vm2, %v3143_v50 }
 0x67a   :  { %v2946_v34 = vadd.f32 %v5333_v14, %v7198_v28  ;;  %v2937_v24 = vpop.f32.mrb[117].mxu1 }
 0x67b   :  { %v2938_v0 = vadd.f32 %v7198_v28, %v2937_v24  ;;  %v5334_v13 = vpop.f32.mrb[118].mxu1 }
 0x67c   :  { %v2949_v55 = vadd.f32 %v5334_v13, %v7198_v28  ;;  %v2940_v54 = vpop.f32.mrb[119].mxu1  ;;  %v3098_v40 = vmax.f32 %v2946_v34, 0.0 }
 0x67d   :  { %v2941_v15 = vadd.f32 %v7198_v28, %v2940_v54  ;;  %v3096_v63 = vmax.f32 %v2938_v0, 0.0 }
 0x67e   :  { %v3099_v2 = vmax.f32 %v2949_v55, 0.0 }
 0x67f   :  { %v3097_v21 = vmax.f32 %v2941_v15, 0.0 }
 0x680   :  { %v3145_v57 = vpack.c.bf16 %v3099_v2, %v3098_v40 }
 0x681   :  { %v3144_v47 = vpack.c.bf16 %v3097_v21, %v3096_v63  ;;  %v5337_v58 = vpop.f32.mrb[120].mxu1 }
 0x682   :  { %v2962_v50 = vadd.f32 %v5337_v58, %v7198_v28  ;;  %v2953_v10 = vpop.f32.mrb[121].mxu1 }
 0x683   :  { %v2954_v14 = vadd.f32 %v7198_v28, %v2953_v10  ;;  %v5338_v27 = vpop.f32.mrb[122].mxu1  ;;  %5399 = vmatprep.mubr.msk.bf16.mxu0 %vm193_vm2, %v3144_v47 }
 0x684   :  { %v2965_v24 = vadd.f32 %v5338_v27, %v7198_v28  ;;  %v2956_v13 = vpop.f32.mrb[123].mxu1  ;;  %5400 = vmatmul.mubr.msk.bf16.gmra.mrb[100].mxu0 %vm193_vm2, %v3145_v57  ;;  %v3102_v0 = vmax.f32 %v2962_v50, 0.0 }
 0x685   :  { %v2957_v34 = vadd.f32 %v7198_v28, %v2956_v13  ;;  %v3100_v54 = vmax.f32 %v2954_v14, 0.0 }
 0x686   :  { %v3103_v55 = vmax.f32 %v2965_v24, 0.0 }
 0x687   :  { %v3101_v15 = vmax.f32 %v2957_v34, 0.0 }
 0x688   :  { %v3147_v40 = vpack.c.bf16 %v3103_v55, %v3102_v0 }
 0x689   :  { %v3146_v2 = vpack.c.bf16 %v3101_v15, %v3100_v54  ;;  %v5341_v63 = vpop.f32.mrb[124].mxu1 }
 0x68a   :  { %v2978_v21 = vadd.f32 %v5341_v63, %v7198_v28  ;;  %v2969_v58 = vpop.f32.mrb[125].mxu1 }
 0x68b   :  { %v2970_v10 = vadd.f32 %v7198_v28, %v2969_v58  ;;  %v5342_v47 = vpop.f32.mrb[126].mxu1  ;;  %5403 = vmatprep.mubr.msk.bf16.mxu0 %vm193_vm2, %v3146_v2 }
 0x68c   :  { %v2981_v27 = vadd.f32 %v5342_v47, %v7198_v28  ;;  %v2972_v57 = vpop.f32.mrb[127].mxu1  ;;  %5404 = vmatmul.mubr.msk.bf16.gmra.mrb[104].mxu0 %vm193_vm2, %v3147_v40  ;;  %v3106_v14 = vmax.f32 %v2978_v21, 0.0 }
 0x68d   :  { %v2973_v50 = vadd.f32 %v7198_v28, %v2972_v57  ;;  %v3104_v13 = vmax.f32 %v2970_v10, 0.0 }
 0x68e   :  { %v3107_v24 = vmax.f32 %v2981_v27, 0.0 }
 0x68f   :  { %v3105_v34 = vmax.f32 %v2973_v50, 0.0 }
 0x690   :  { %v3149_v0 = vpack.c.bf16 %v3107_v24, %v3106_v14 }
 0x691   :  { %v3148_v55 = vpack.c.bf16 %v3105_v34, %v3104_v13  ;;  %v5345_v54 = vpop.f32.mrb[128].mxu1 }
 0x692   :  { %v2994_v15 = vadd.f32 %v5345_v54, %v7198_v28  ;;  %v2985_v63 = vpop.f32.mrb[129].mxu1 }
 0x693   :  { %v2986_v58 = vadd.f32 %v7198_v28, %v2985_v63  ;;  %v5346_v2 = vpop.f32.mrb[130].mxu1  ;;  %5407 = vmatprep.mubr.msk.bf16.mxu0 %vm193_vm2, %v3148_v55 }
 0x694   :  { %v2997_v47 = vadd.f32 %v5346_v2, %v7198_v28  ;;  %v2988_v40 = vpop.f32.mrb[131].mxu1  ;;  %5408 = vmatmul.mubr.msk.bf16.gmra.mrb[108].mxu0 %vm193_vm2, %v3149_v0  ;;  %v3110_v10 = vmax.f32 %v2994_v15, 0.0 }
 0x695   :  { %v2989_v21 = vadd.f32 %v7198_v28, %v2988_v40  ;;  %v3108_v57 = vmax.f32 %v2986_v58, 0.0 }
 0x696   :  { %v3111_v27 = vmax.f32 %v2997_v47, 0.0 }
 0x697   :  { %v3109_v50 = vmax.f32 %v2989_v21, 0.0 }
 0x698   :  { %v3151_v14 = vpack.c.bf16 %v3111_v27, %v3110_v10 }
 0x699   :  { %v3150_v24 = vpack.c.bf16 %v3109_v50, %v3108_v57  ;;  %v5349_v13 = vpop.f32.mrb[132].mxu1 }
 0x69a   :  { %v3010_v34 = vadd.f32 %v5349_v13, %v7198_v28  ;;  %v3001_v54 = vpop.f32.mrb[133].mxu1 }
 0x69b   :  { %v3002_v63 = vadd.f32 %v7198_v28, %v3001_v54  ;;  %v5350_v55 = vpop.f32.mrb[134].mxu1  ;;  %5411 = vmatprep.mubr.msk.bf16.mxu0 %vm193_vm2, %v3150_v24 }
 0x69c   :  { %v3013_v2 = vadd.f32 %v5350_v55, %v7198_v28  ;;  %v3004_v0 = vpop.f32.mrb[135].mxu1  ;;  %5412 = vmatmul.mubr.msk.bf16.gmra.mrb[112].mxu0 %vm193_vm2, %v3151_v14  ;;  %v3114_v58 = vmax.f32 %v3010_v34, 0.0 }
 0x69d   :  { %v3005_v15 = vadd.f32 %v7198_v28, %v3004_v0  ;;  %v3112_v40 = vmax.f32 %v3002_v63, 0.0 }
 0x69e   :  { %v3115_v47 = vmax.f32 %v3013_v2, 0.0 }
 0x69f   :  { %v3113_v21 = vmax.f32 %v3005_v15, 0.0 }
 0x6a0   :  { %v3153_v10 = vpack.c.bf16 %v3115_v47, %v3114_v58 }
 0x6a1   :  { %v3152_v27 = vpack.c.bf16 %v3113_v21, %v3112_v40  ;;  %v5353_v57 = vpop.f32.mrb[136].mxu1 }
 0x6a2   :  { %v3026_v50 = vadd.f32 %v5353_v57, %v7198_v28  ;;  %v3017_v13 = vpop.f32.mrb[137].mxu1 }
 0x6a3   :  { %v3018_v54 = vadd.f32 %v7198_v28, %v3017_v13  ;;  %v5354_v24 = vpop.f32.mrb[138].mxu1  ;;  %5415 = vmatprep.mubr.msk.bf16.mxu0 %vm193_vm2, %v3152_v27 }
 0x6a4   :  { %v3029_v55 = vadd.f32 %v5354_v24, %v7198_v28  ;;  %v3020_v14 = vpop.f32.mrb[139].mxu1  ;;  %5416 = vmatmul.mubr.msk.bf16.gmra.mrb[116].mxu0 %vm193_vm2, %v3153_v10  ;;  %v3118_v63 = vmax.f32 %v3026_v50, 0.0 }
 0x6a5   :  { %v3021_v34 = vadd.f32 %v7198_v28, %v3020_v14  ;;  %v3116_v0 = vmax.f32 %v3018_v54, 0.0 }
 0x6a6   :  { %v3119_v2 = vmax.f32 %v3029_v55, 0.0 }
 0x6a7   :  { %v3117_v15 = vmax.f32 %v3021_v34, 0.0 }
 0x6a8   :  { %v3155_v58 = vpack.c.bf16 %v3119_v2, %v3118_v63 }
 0x6a9   :  { %v3154_v47 = vpack.c.bf16 %v3117_v15, %v3116_v0  ;;  %v5357_v40 = vpop.f32.mrb[140].mxu1 }
 0x6aa   :  { %v3042_v21 = vadd.f32 %v5357_v40, %v7198_v28  ;;  %v3033_v57 = vpop.f32.mrb[141].mxu1 }
 0x6ab   :  { %v3034_v13 = vadd.f32 %v7198_v28, %v3033_v57  ;;  %v5358_v27 = vpop.f32.mrb[142].mxu1  ;;  %5419 = vmatprep.mubr.msk.bf16.mxu0 %vm193_vm2, %v3154_v47 }
 0x6ac   :  { %v3045_v24 = vadd.f32 %v5358_v27, %v7198_v28  ;;  %v3036_v10 = vpop.f32.mrb[143].mxu1  ;;  %5420 = vmatmul.mubr.msk.bf16.gmra.mrb[120].mxu0 %vm193_vm2, %v3155_v58  ;;  %v3122_v54 = vmax.f32 %v3042_v21, 0.0 }
 0x6ad   :  { %v3037_v50 = vadd.f32 %v7198_v28, %v3036_v10  ;;  %v3120_v14 = vmax.f32 %v3034_v13, 0.0 }
 0x6ae   :  { %v3123_v55 = vmax.f32 %v3045_v24, 0.0 }
 0x6af   :  { %v3121_v34 = vmax.f32 %v3037_v50, 0.0 }
 0x6b0   :  { %v3157_v63 = vpack.c.bf16 %v3123_v55, %v3122_v54 }
 0x6b1   :  { %v3156_v2 = vpack.c.bf16 %v3121_v34, %v3120_v14 }
 0x6b3   :  { %5423 = vmatprep.mubr.msk.bf16.mxu0 %vm193_vm2, %v3156_v2 }
 0x6b4   :  { %5424 = vmatmul.mubr.msk.bf16.gmra.mrb[124].mxu0 %vm193_vm2, %v3157_v63 }
 0x6bb   :  { %v5361_v0 = vpop.f32.mrb[144].mxu1 }
 0x6bc   :  { %v3058_v15 = vadd.f32 %v5361_v0, %v7198_v28  ;;  %v3049_v47 = vpop.f32.mrb[145].mxu1 }
 0x6bd   :  { %v3050_v40 = vadd.f32 %v7198_v28, %v3049_v47  ;;  %v5362_v57 = vpop.f32.mrb[146].mxu1 }
 0x6be   :  { %v3061_v58 = vadd.f32 %v5362_v57, %v7198_v28  ;;  %v3052_v27 = vpop.f32.mrb[147].mxu1  ;;  %v3126_v13 = vmax.f32 %v3058_v15, 0.0 }
 0x6bf   :  { %v3053_v21 = vadd.f32 %v7198_v28, %v3052_v27  ;;  %v3124_v10 = vmax.f32 %v3050_v40, 0.0 }
 0x6c0   :  { %v3127_v24 = vmax.f32 %v3061_v58, 0.0 }
 0x6c1   :  { %v3125_v50 = vmax.f32 %v3053_v21, 0.0 }
 0x6c2   :  { %v3159_v54 = vpack.c.bf16 %v3127_v24, %v3126_v13 }
 0x6c3   :  { %v3158_v55 = vpack.c.bf16 %v3125_v50, %v3124_v10 }
 0x6c5   :  { %5427 = vmatprep.mubr.msk.bf16.mxu0 %vm193_vm2, %v3158_v55 }
 0x6c6   :  { %5428 = vmatmul.mubr.msk.bf16.gmra.mrb[128].mxu0 %vm193_vm2, %v3159_v54 }
 0x6c8   :  { %v5369_v14 = vpop.f32.mrb[68].mxu0 }
 0x6c9   :  { %3573 = vperm.xlu1 %5589, %v5369_v14   ;;  %v3306_v34 = vpop.f32.mrb[69].mxu0 }
 0x6ca   :  { %v5370_v63 = vpop.f32.mrb[70].mxu0 }
 0x6cb   :  { %v3309_v2 = vpop.f32.mrb[71].mxu0 }
 0x6cd   :  { %3563 = vperm.xlu1 %5589, %v3306_v34  }
 0x6d1   :  { %3578 = vperm.xlu1 %5589, %v5370_v63  }
 0x6d5   :  { %3568 = vperm.xlu1 %5589, %v3309_v2  }
 0x704   :  { %v5373_v0 = vpop.f32.mrb[72].mxu0 }
 0x705   :  { %3593 = vperm.xlu0 %5590, %v5373_v0   ;;  %v3322_v28 = vpop.f32.mrb[73].mxu0 }
 0x706   :  { %v5374_v15 = vpop.f32.mrb[74].mxu0 }
 0x707   :  { %3598 = vperm.xlu1 %5589, %v5374_v15   ;;  %v3325_v47 = vpop.f32.mrb[75].mxu0 }
 0x709   :  { %3583 = vperm.xlu0 %5590, %v3322_v28  }
 0x70b   :  { %3588 = vperm.xlu1 %5589, %v3325_v47  }
 0x710   :  { %v5377_v40 = vpop.f32.mrb[76].mxu0 }
 0x711   :  { %3613 = vperm.xlu0 %5590, %v5377_v40   ;;  %v3338_v57 = vpop.f32.mrb[77].mxu0 }
 0x712   :  { %v5378_v58 = vpop.f32.mrb[78].mxu0 }
 0x713   :  { %3618 = vperm.xlu1 %5589, %v5378_v58   ;;  %v3341_v27 = vpop.f32.mrb[79].mxu0 }
 0x715   :  { %3603 = vperm.xlu0 %5590, %v3338_v57  }
 0x717   :  { %3608 = vperm.xlu1 %5589, %v3341_v27  }
 0x71c   :  { %v5381_v21 = vpop.f32.mrb[80].mxu0 }
 0x71d   :  { %3633 = vperm.xlu0 %5590, %v5381_v21   ;;  %v3354_v13 = vpop.f32.mrb[81].mxu0 }
 0x71e   :  { %v5382_v24 = vpop.f32.mrb[82].mxu0 }
 0x71f   :  { %3638 = vperm.xlu1 %5589, %v5382_v24   ;;  %v3357_v10 = vpop.f32.mrb[83].mxu0 }
 0x721   :  { %3623 = vperm.xlu0 %5590, %v3354_v13  }
 0x723   :  { %3628 = vperm.xlu1 %5589, %v3357_v10  }
 0x728   :  { %v5385_v50 = vpop.f32.mrb[84].mxu0 }
 0x729   :  { %3653 = vperm.xlu1 %5589, %v5385_v50   ;;  %v3370_v54 = vpop.f32.mrb[85].mxu0 }
 0x72a   :  { %v5386_v55 = vpop.f32.mrb[86].mxu0 }
 0x72b   :  { %v3373_v14 = vpop.f32.mrb[87].mxu0 }
 0x72c   :  { %3648 = vperm.xlu0 %5590, %v3373_v14   ;;  %v7784_v14 = vld [vmem:[#allocation33_spill] sm:$0xff] }
 0x72d   :  { %3643 = vperm.xlu1 %5589, %v3370_v54  }
 0x731   :  { %3658 = vperm.xlu1 %5589, %v5386_v55  }
 0x734   :  { %v5389_v34 = vpop.f32.mrb[88].mxu0 }
 0x735   :  { %3673 = vperm.xlu0 %5590, %v5389_v34   ;;  %v3386_v63 = vpop.f32.mrb[89].mxu0 }
 0x736   :  { %3663 = vperm.xlu1 %5589, %v3386_v63   ;;  %v5390_v2 = vpop.f32.mrb[90].mxu0 }
 0x737   :  { %v3389_v0 = vpop.f32.mrb[91].mxu0 }
 0x73a   :  { %3678 = vperm.xlu1 %5589, %v5390_v2  }
 0x73e   :  { %3668 = vperm.xlu1 %5589, %v3389_v0  }
 0x740   :  { %v5393_v28 = vpop.f32.mrb[92].mxu0 }
 0x741   :  { %3693 = vperm.xlu0 %5590, %v5393_v28   ;;  %v3402_v15 = vpop.f32.mrb[93].mxu0 }
 0x742   :  { %v5394_v47 = vpop.f32.mrb[94].mxu0 }
 0x743   :  { %3698 = vperm.xlu1 %5589, %v5394_v47   ;;  %v3405_v40 = vpop.f32.mrb[95].mxu0 }
 0x745   :  { %3683 = vperm.xlu0 %5590, %v3402_v15  }
 0x747   :  { %3688 = vperm.xlu1 %5589, %v3405_v40  }
 0x748   :  { %v3574_v57 = vpop.permute.xlu1 %3573 }
 0x749   :  { %v3883_v24 = vmul.f32 %v6237_v19, %v3574_v57 }
 0x74b   :  { %v4761_v55 = vclamps-f32 %v3883_v24, 100.0 }
 0x74c   :  { %v3564_v58 = vpop.permute.xlu1 %3563  ;;  %v5397_v27 = vpop.f32.mrb[96].mxu0 }
 0x74d   :  { %3713 = vperm.xlu0 %5590, %v5397_v27   ;;  %v3418_v21 = vpop.f32.mrb[97].mxu0  ;;  %v3881_v34 = vmul.f32 %v3564_v58, %v7784_v14 }
 0x74e   :  { %v5398_v13 = vpop.f32.mrb[98].mxu0 }
 0x74f   :  { %3718 = vperm.xlu1 %5589, %v5398_v13   ;;  %v3421_v10 = vpop.f32.mrb[99].mxu0  ;;  %v4759_v15 = vclamps-f32 %v3881_v34, 100.0 }
 0x750   :  { %v3579_v50 = vpop.permute.xlu1 %3578 }
 0x751   :  { %v3884_v54 = vmul.f32 %v6243_v22, %v3579_v50  ;;  %3703 = vperm.xlu0 %5590, %v3418_v21  }
 0x753   :  { %v4762_v63 = vclamps-f32 %v3884_v54, 100.0  ;;  %3708 = vperm.xlu1 %5589, %v3421_v10  }
 0x754   :  { %v3569_v2 = vpop.permute.xlu1 %3568 }
 0x755   :  { %v7299_v0 = vpack.c.bf16 %v4762_v63, %v4761_v55  ;;  %v3882_v28 = vmul.f32 %v3569_v2, %v6246_v23 }
 0x757   :  { %v4760_v47 = vclamps-f32 %v3882_v28, 100.0  ;;  %v5401_v40 = vpop.f32.mrb[100].mxu0 }
 0x758   :  { %3733 = vperm.xlu0 %5590, %v5401_v40   ;;  %v3434_v19 = vpop.f32.mrb[101].mxu0 }
 0x759   :  { %v7302_v57 = vpack.c.bf16 %v4760_v47, %v4759_v15  ;;  %v5402_v27 = vpop.f32.mrb[102].mxu0 }
 0x75a   :  { %3738 = vperm.xlu1 %5589, %v5402_v27   ;;  %v3437_v22 = vpop.f32.mrb[103].mxu0 }
 0x75c   :  { %3723 = vperm.xlu0 %5590, %v3434_v19  }
 0x75e   :  { %3728 = vperm.xlu1 %5589, %v3437_v22  }
 0x75f   :  { %v5405_v58 = vpop.f32.mrb[104].mxu0 }
 0x760   :  { %3753 = vperm.xlu0 %5590, %v5405_v58   ;;  %v3450_v21 = vpop.f32.mrb[105].mxu0 }
 0x761   :  { %v5406_v13 = vpop.f32.mrb[106].mxu0 }
 0x762   :  { %3758 = vperm.xlu1 %5589, %v5406_v13   ;;  %v3453_v24 = vpop.f32.mrb[107].mxu0 }
 0x764   :  { %3743 = vperm.xlu0 %5590, %v3450_v21  }
 0x766   :  { %3748 = vperm.xlu1 %5589, %v3453_v24  }
 0x767   :  { %v5409_v23 = vpop.f32.mrb[108].mxu0 }
 0x768   :  { %3773 = vperm.xlu0 %5590, %v5409_v23   ;;  %v3466_v10 = vpop.f32.mrb[109].mxu0 }
 0x769   :  { %v5410_v50 = vpop.f32.mrb[110].mxu0 }
 0x76a   :  { %3778 = vperm.xlu1 %5589, %v5410_v50   ;;  %v3469_v54 = vpop.f32.mrb[111].mxu0 }
 0x76c   :  { %3763 = vperm.xlu0 %5590, %v3466_v10   ;;  %v7679_v10 = vmov 1.0|1.0  }
 0x76d   :  { %4824 = vmatprep.mubr.msk.bf16.mxu1 %vm4823_vm14, %v7679_v10 }
 0x76e   :  { %3768 = vperm.xlu1 %5589, %v3469_v54  }
 0x76f   :  { %v7304_v55 = vpop.f32.mrb[112].mxu0 }
 0x770   :  { %v3482_v14 = vpop.f32.mrb[113].mxu0 }
 0x771   :  { %v7306_v34 = vpop.f32.mrb[114].mxu0 }
 0x772   :  { %v3485_v63 = vpop.f32.mrb[115].mxu0 }
 0x777   :  { %v5417_v2 = vpop.f32.mrb[116].mxu0 }
 0x778   :  { %3813 = vperm.xlu0 %5590, %v5417_v2   ;;  %v3498_v28 = vpop.f32.mrb[117].mxu0 }
 0x779   :  { %v5418_v15 = vpop.f32.mrb[118].mxu0 }
 0x77a   :  { %3818 = vperm.xlu1 %5589, %v5418_v15   ;;  %v3501_v47 = vpop.f32.mrb[119].mxu0 }
 0x77c   :  { %3803 = vperm.xlu0 %5590, %v3498_v28  }
 0x77e   :  { %3808 = vperm.xlu1 %5589, %v3501_v47  }
 0x77f   :  { %v5421_v40 = vpop.f32.mrb[120].mxu0 }
 0x780   :  { %3833 = vperm.xlu0 %5590, %v5421_v40   ;;  %v3514_v19 = vpop.f32.mrb[121].mxu0 }
 0x781   :  { %v5422_v27 = vpop.f32.mrb[122].mxu0 }
 0x782   :  { %3838 = vperm.xlu1 %5589, %v5422_v27   ;;  %v3517_v22 = vpop.f32.mrb[123].mxu0 }
 0x784   :  { %v3594_v58 = vpop.permute.xlu0 %3593  ;;  %3823 = vperm.xlu0 %5590, %v3514_v19  }
 0x785   :  { %v3887_v21 = vmul.f32 %v6262_v30, %v3594_v58 }
 0x786   :  { %v3599_v23 = vpop.permute.xlu1 %3598  ;;  %3828 = vperm.xlu1 %5589, %v3517_v22  }
 0x787   :  { %v3888_v50 = vmul.f32 %v6268_v33, %v3599_v23  ;;  %v5425_v54 = vpop.f32.mrb[124].mxu0  ;;  %v4765_v15 = vclamps-f32 %v3887_v21, 100.0 }
 0x788   :  { %v3584_v2 = vpop.permute.xlu0 %3583  ;;  %3853 = vperm.xlu0 %5590, %v5425_v54   ;;  %v3530_v28 = vpop.f32.mrb[125].mxu0 }
 0x789   :  { %v4766_v47 = vclamps-f32 %v3888_v50, 100.0  ;;  %v3885_v30 = vmul.f32 %v3584_v2, %v6266_v32  ;;  %v5426_v40 = vpop.f32.mrb[126].mxu0 }
 0x78a   :  { %v3589_v19 = vpop.permute.xlu1 %3588  ;;  %3858 = vperm.xlu1 %5589, %v5426_v40   ;;  %v3533_v27 = vpop.f32.mrb[127].mxu0 }
 0x78b   :  { %v7316_v58 = vpack.c.bf16 %v4766_v47, %v4765_v15  ;;  %v3886_v22 = vmul.f32 %v3589_v19, %v6271_v35  ;;  %v4763_v24 = vclamps-f32 %v3885_v30, 100.0 }
 0x78c   :  { %3843 = vperm.xlu0 %5590, %v3530_v28  }
 0x78d   :  { %v4764_v10 = vclamps-f32 %v3886_v22, 100.0 }
 0x78e   :  { %3848 = vperm.xlu1 %5589, %v3533_v27  }
 0x78f   :  { %v7319_v33 = vpack.c.bf16 %v4764_v10, %v4763_v24 }
 0x790   :  { %v3614_v23 = vpop.permute.xlu0 %3613  ;;  %3783 = vperm.xlu0 %5590, %v3482_v14  }
 0x791   :  { %v3891_v21 = vmul.f32 %v6276_v38, %v3614_v23 }
 0x792   :  { %v3619_v50 = vpop.permute.xlu1 %3618  ;;  %3788 = vperm.xlu1 %5589, %v3485_v63  }
 0x793   :  { %v3892_v32 = vmul.f32 %v6284_v43, %v3619_v50  ;;  %v4769_v2 = vclamps-f32 %v3891_v21, 100.0 }
 0x794   :  { %v3604_v54 = vpop.permute.xlu0 %3603 }
 0x795   :  { %v4770_v15 = vclamps-f32 %v3892_v32, 100.0  ;;  %v3889_v47 = vmul.f32 %v3604_v54, %v6282_v41 }
 0x796   :  { %v3609_v35 = vpop.permute.xlu1 %3608 }
 0x797   :  { %v7324_v28 = vpack.c.bf16 %v4770_v15, %v4769_v2  ;;  %v3890_v30 = vmul.f32 %v3609_v35, %v6288_v44  ;;  %v4767_v10 = vclamps-f32 %v3889_v47, 100.0  ;;  %v4290_v44 = vld [vmem:[%s7787_s2] sm:$0xff] }
 0x798   :  { %v4291_v15 = vmax.f32 %v4290_v44, 1.0 }
 0x799   :  { %v4768_v40 = vclamps-f32 %v3890_v30, 100.0  ;;  %v5429_v19 = vpop.f32.mrb[128].mxu0 }
 0x79a   :  { %v3546_v14 = vpop.f32.mrb[129].mxu0 }
 0x79b   :  { %v7327_v27 = vpack.c.bf16 %v4768_v40, %v4767_v10  ;;  %3863 = vperm.xlu0 %5590, %v3546_v14   ;;  %v5430_v38 = vpop.f32.mrb[130].mxu0 }
 0x79c   :  { %v3634_v63 = vpop.permute.xlu0 %3633  ;;  %v3549_v43 = vpop.f32.mrb[131].mxu0 }
 0x79d   :  { %v3895_v22 = vmul.f32 %v6296_v48, %v3634_v63  ;;  %3868 = vperm.xlu1 %5589, %v3549_v43  }
 0x79e   :  { %v3639_v24 = vpop.permute.xlu1 %3638 }
 0x79f   :  { %v3896_v41 = vmul.f32 %v6304_v52, %v3639_v24  ;;  %3873 = vperm.xlu0 %5590, %v5429_v19   ;;  %v4773_v21 = vclamps-f32 %v3895_v22, 100.0 }
 0x7a0   :  { %v3624_v23 = vpop.permute.xlu0 %3623 }
 0x7a1   :  { %v4774_v50 = vclamps-f32 %v3896_v41, 100.0  ;;  %v3893_v32 = vmul.f32 %v3624_v23, %v6302_v51  ;;  %3878 = vperm.xlu1 %5589, %v5430_v38  }
 0x7a2   :  { %v3629_v54 = vpop.permute.xlu1 %3628 }
 0x7a3   :  { %v7335_v2 = vpack.c.bf16 %v4774_v50, %v4773_v21  ;;  %v3894_v48 = vmul.f32 %v3629_v54, %v6308_v53  ;;  %3793 = vperm.xlu0 %5590, %v7304_v55   ;;  %v4771_v52 = vclamps-f32 %v3893_v32, 100.0 }
 0x7a5   :  { %v4772_v47 = vclamps-f32 %v3894_v48, 100.0  ;;  %3798 = vperm.xlu1 %5589, %v7306_v34  }
 0x7a7   :  { %v7340_v35 = vpack.c.bf16 %v4772_v47, %v4771_v52  ;;  %4294 = vperm.xlu0 %5590, %v4291_v15  }
 0x7a8   :  { %v3654_v30 = vpop.permute.xlu1 %3653 }
 0x7a9   :  { %v3899_v53 = vmul.f32 %v6316_v56, %v3654_v30 }
 0x7ab   :  { %v3649_v10 = vpop.permute.xlu0 %3648  ;;  %v4777_v22 = vclamps-f32 %v3899_v53, 100.0 }
 0x7ac   :  { %v3898_v51 = vmul.f32 %v3649_v10, %v6328_v61  ;;  %v3644_v40 = vpop.permute.xlu1 %3643  ;;  %v4106_v61 = vsel %vm193_vm2, %v7003_v62, %v7302_v57 }
 0x7ad   :  { %v3897_v19 = vmul.f32 %v3644_v40, %v6322_v59 }
 0x7ae   :  { %v4776_v14 = vclamps-f32 %v3898_v51, 100.0 }
 0x7af   :  { %v4775_v38 = vclamps-f32 %v3897_v19, 100.0 }
 0x7b0   :  { %v3659_v55 = vpop.permute.xlu1 %3658 }
 0x7b1   :  { %v4081_v63 = vpack.c.bf16 %v4776_v14, %v4775_v38  ;;  %v3900_v43 = vmul.f32 %v6324_v60, %v3659_v55  ;;  %v4109_v60 = vsel %vm193_vm2, %v7001_v16, %v7299_v0 }
 0x7b3   :  { %v4778_v34 = vclamps-f32 %v3900_v43, 100.0  ;;  %v4130_v24 = vsel %vm193_vm2, %v7057_v25, %v4081_v63 }
 0x7b4   :  { %5014 = vmatprep.subr.bf16.mxu1 %v4130_v24  ;;  %v3674_v59 = vpop.permute.xlu0 %3673 }
 0x7b5   :  { %v4082_v41 = vpack.c.bf16 %v4778_v34, %v4777_v22  ;;  %5015 = vmatpush3.bf16.msra.mxu1 %v4106_v61  ;;  %v3664_v23 = vpop.permute.xlu1 %3663  ;;  %v3903_v44 = vmul.f32 %v6336_v1, %v3674_v59 }
 0x7b6   :  { %v3901_v62 = vmul.f32 %v3664_v23, %v6342_v6  ;;  %v4112_v6 = vsel %vm193_vm2, %v7015_v5, %v7319_v33 }
 0x7b7   :  { %v4133_v56 = vsel %vm193_vm2, %v7055_v42, %v4082_v41  ;;  %v4781_v50 = vclamps-f32 %v3903_v44, 100.0 }
 0x7b8   :  { %5016 = vmatprep.subr.bf16.mxu1 %v4133_v56  ;;  %v4779_v42 = vclamps-f32 %v3901_v62, 100.0 }
 0x7b9   :  { %5017 = vmatpush3.bf16.msra.mxu1 %v4109_v60  ;;  %v3679_v25 = vpop.permute.xlu1 %3678 }
 0x7ba   :  { %v3904_v21 = vmul.f32 %v6344_v7, %v3679_v25 }
 0x7bc   :  { %v4782_v57 = vclamps-f32 %v3904_v21, 100.0  ;;  %v7791_v21 = vld [vmem:[#allocation38_spill] sm:$0xff] }
 0x7bd   :  { %v3669_v32 = vpop.permute.xlu1 %3668 }
 0x7be   :  { %v4084_v54 = vpack.c.bf16 %v4782_v57, %v4781_v50  ;;  %v3902_v48 = vmul.f32 %v3669_v32, %v6348_v8  ;;  %v7793_v32 = vld [vmem:[#allocation34_spill] sm:$0xff] }
 0x7c0   :  { %v4780_v15 = vclamps-f32 %v3902_v48, 100.0  ;;  %v3694_v1 = vpop.permute.xlu0 %3693 }
 0x7c1   :  { %v3907_v47 = vmul.f32 %v6356_v20, %v3694_v1  ;;  %v4139_v20 = vsel %vm193_vm2, %v7067_v11, %v4084_v54  ;;  %v4127_v54 = vsel %vm193_vm2, %v7793_v32, %v7335_v2  ;;  %v7795_v1 = vld [vmem:[#allocation41_spill] sm:$0xff] }
 0x7c2   :  { %v4083_v52 = vpack.c.bf16 %v4780_v15, %v4779_v42  ;;  %v3699_v30 = vpop.permute.xlu1 %3698 }
 0x7c3   :  { %v3908_v16 = vmul.f32 %v6364_v36, %v3699_v30  ;;  %v4785_v10 = vclamps-f32 %v3907_v47, 100.0 }
 0x7c4   :  { %v4136_v7 = vsel %vm193_vm2, %v7069_v3, %v4083_v52  ;;  %v3684_v0 = vpop.permute.xlu0 %3683  ;;  %v4115_v3 = vsel %vm193_vm2, %v7013_v49, %v7316_v58 }
 0x7c5   :  { %5018 = vmatprep.subr.bf16.mxu1 %v4136_v7  ;;  %v4786_v8 = vclamps-f32 %v3908_v16, 100.0  ;;  %v3905_v51 = vmul.f32 %v3684_v0, %v6362_v31  ;;  %v7797_v7 = vld [vmem:[#allocation43_spill] sm:$0xff]  ;;  %v7798_v0 = vmov 1.0|1.0  }
 0x7c6   :  { %5019 = vmatpush3.bf16.msra.mxu1 %v4112_v6  ;;  %v3689_v40 = vpop.permute.xlu1 %3688 }
 0x7c7   :  { %5020 = vmatprep.subr.bf16.mxu1 %v4139_v20  ;;  %v4086_v36 = vpack.c.bf16 %v4786_v8, %v4785_v10  ;;  %v3906_v19 = vmul.f32 %v3689_v40, %v6368_v39  ;;  %v4783_v14 = vclamps-f32 %v3905_v51, 100.0  ;;  %v4118_v39 = vsel %vm193_vm2, %v7027_v26, %v7327_v27  ;;  %v7799_v51 = vld [vmem:[#allocation42_spill] sm:$0xff] }
 0x7c9   :  { %v4784_v53 = vclamps-f32 %v3906_v19, 100.0  ;;  %v4145_v49 = vsel %vm193_vm2, %v7079_v29, %v4086_v36  ;;  %v7800_v19 = vld [vmem:[#allocation44_spill] sm:$0xff] }
 0x7ca   :  { %5021 = vmatpush3.bf16.msra.mxu1 %v4115_v3 }
 0x7cb   :  { %v4085_v5 = vpack.c.bf16 %v4784_v53, %v4783_v14 }
 0x7cc   :  { %v3714_v33 = vpop.permute.xlu0 %3713 }
 0x7cd   :  { %v3911_v31 = vmul.f32 %v6376_v46, %v3714_v33  ;;  %v4142_v38 = vsel %vm193_vm2, %v7081_v17, %v4085_v5  ;;  %v7801_v33 = vld [vmem:[#allocation45_spill] sm:$0xff] }
 0x7ce   :  { %v3719_v11 = vpop.permute.xlu1 %3718  ;;  %5022 = vmatprep.subr.bf16.mxu1 %v4142_v38 }
 0x7cf   :  { %v3912_v55 = vmul.f32 %v7731_v45, %v3719_v11  ;;  %5023 = vmatpush3.bf16.msra.mxu1 %v4118_v39  ;;  %v4789_v63 = vclamps-f32 %v3911_v31, 100.0  ;;  %v4121_v45 = vsel %vm193_vm2, %v7025_v12, %v7324_v28  ;;  %v7790_v28 = vld [vmem:[#allocation36_spill] sm:$0xff] }
 0x7d0   :  { %v3704_v58 = vpop.permute.xlu0 %3703  ;;  %5024 = vmatprep.subr.bf16.mxu1 %v4145_v49 }
 0x7d1   :  { %v4790_v43 = vclamps-f32 %v3912_v55, 100.0  ;;  %v3909_v46 = vmul.f32 %v3704_v58, %v7730_v9  ;;  %v7788_v9 = vld [vmem:[#allocation39_spill] sm:$0xff] }
 0x7d2   :  { %v3709_v22 = vpop.permute.xlu1 %3708  ;;  %v7802_v55 = vld [vmem:[#allocation47_spill] sm:$0xff] }
 0x7d3   :  { %v4088_v17 = vpack.c.bf16 %v4790_v43, %v4789_v63  ;;  %v3910_v34 = vmul.f32 %v3709_v22, %v7732_v37  ;;  %5025 = vmatpush3.bf16.msra.mxu1 %v4121_v45  ;;  %v4787_v26 = vclamps-f32 %v3909_v46, 100.0  ;;  %v7789_v37 = vld [vmem:[#allocation35_spill] sm:$0xff]  ;;  %v7803_v43 = vld [vmem:[#allocation46_spill] sm:$0xff] }
 0x7d4   :  { %v4124_v56 = vsel %vm193_vm2, %v7789_v37, %v7340_v35  ;;  %v7809_v35 = vld [vmem:[#allocation59_spill] sm:$0xff] }
 0x7d5   :  { %v4788_v27 = vclamps-f32 %v3910_v34, 100.0  ;;  %v4151_v44 = vsel %vm193_vm2, %v7790_v28, %v4088_v17  ;;  %v7804_v34 = vld [vmem:[#allocation48_spill] sm:$0xff] }
 0x7d7   :  { %v4087_v24 = vpack.c.bf16 %v4788_v27, %v4787_v26  ;;  %v3734_v61 = vpop.permute.xlu0 %3733 }
 0x7d8   :  { %v3915_v29 = vmul.f32 %v7734_v4, %v3734_v61 }
 0x7d9   :  { %v3739_v41 = vpop.permute.xlu1 %3738  ;;  %v4148_v59 = vsel %vm193_vm2, %v7093_v18, %v4087_v24  ;;  %v7792_v18 = vld [vmem:[#allocation40_spill] sm:$0xff] }
 0x7da   :  { %v3916_v23 = vmul.f32 %v7788_v9, %v3739_v41  ;;  %5026 = vmatprep.subr.bf16.mxu1 %v4148_v59  ;;  %v4793_v60 = vclamps-f32 %v3915_v29, 100.0  ;;  %v7805_v41 = vld [vmem:[#allocation55_spill] sm:$0xff] }
 0x7db   :  { %5027 = vmatpush3.bf16.msra.mxu1 %v4124_v56  ;;  %v3724_v12 = vpop.permute.xlu0 %3723  ;;  %v7807_v56 = vld [vmem:[#allocation54_spill] sm:$0xff] }
 0x7dc   :  { %v4794_v25 = vclamps-f32 %v3916_v23, 100.0  ;;  %v3913_v4 = vmul.f32 %v3724_v12, %v7791_v21  ;;  %5028 = vmatprep.subr.bf16.mxu1 %v4151_v44  ;;  %v7806_v23 = vld [vmem:[#allocation53_spill] sm:$0xff] }
 0x7dd   :  { %v3729_v50 = vpop.permute.xlu1 %3728 }
 0x7de   :  { %v7398_v62 = vpack.c.bf16 %v4794_v25, %v4793_v60  ;;  %v3914_v57 = vmul.f32 %v3729_v50, %v7792_v18  ;;  %v4791_v42 = vclamps-f32 %v3913_v4, 100.0  ;;  %v7808_v60 = vld [vmem:[#allocation56_spill] sm:$0xff] }
 0x7df   :  { %5029 = vmatpush3.bf16.msra.mxu1 %v4127_v54  ;;  %v3754_v48 = vpop.permute.xlu0 %3753 }
 0x7e0   :  { %v4792_v15 = vclamps-f32 %v3914_v57, 100.0  ;;  %v3919_v52 = vmul.f32 %v7795_v1, %v3754_v48 }
 0x7e1   :  { %v3759_v30 = vpop.permute.xlu1 %3758 }
 0x7e2   :  { %v4089_v16 = vpack.c.bf16 %v4792_v15, %v4791_v42  ;;  %v3920_v2 = vmul.f32 %v7797_v7, %v3759_v30  ;;  %4826 = vmatmul.mubr.msk.bf16.vlgmr.msra.gmra.mrb[148].mxu1 %vm4825_vm15, %v7798_v0  ;;  %v4797_v10 = vclamps-f32 %v3919_v52, 100.0  ;;  %v7810_v15 = vld [vmem:[#allocation57_spill] sm:$0xff]  ;;  %v7811_v52 = vld [vmem:[#allocation58_spill] sm:$0xff] }
 0x7e3   :  { %v3744_v6 = vpop.permute.xlu0 %3743  ;;  %4828 = vmatprep.mubr.msk.bf16.mxu1 %vm4827_vm1, %v7798_v0  ;;  %v7812_v30 = vld [vmem:[#allocation77_spill] sm:$0xff] }
 0x7e4   :  { %v4798_v8 = vclamps-f32 %v3920_v2, 100.0  ;;  %v3917_v20 = vmul.f32 %v3744_v6, %v7799_v51  ;;  %v7813_v6 = vld [vmem:[#allocation69_spill] sm:$0xff]  ;;  %v7814_v51 = vld [vmem:[#allocation60_spill] sm:$0xff] }
 0x7e5   :  { %v3749_v40 = vpop.permute.xlu1 %3748 }
 0x7e6   :  { %v7417_v36 = vpack.c.bf16 %v4798_v8, %v4797_v10  ;;  %v3918_v3 = vmul.f32 %v3749_v40, %v7800_v19  ;;  %v4795_v53 = vclamps-f32 %v3917_v20, 100.0  ;;  %v4154_v10 = vsel %vm193_vm2, %v7813_v6, %v4089_v16  ;;  %v7815_v40 = vld [vmem:[#allocation76_spill] sm:$0xff]  ;;  %v7817_v16 = vld [vmem:[#allocation63_spill] sm:$0xff] }
 0x7e7   :  { %v3774_v14 = vpop.permute.xlu0 %3773 }
 0x7e8   :  { %v4796_v5 = vclamps-f32 %v3918_v3, 100.0  ;;  %v3923_v31 = vmul.f32 %v7801_v33, %v3774_v14 }
 0x7e9   :  { %v3779_v38 = vpop.permute.xlu1 %3778 }
 0x7ea   :  { %v4091_v11 = vpack.c.bf16 %v4796_v5, %v4795_v53  ;;  %v3924_v39 = vmul.f32 %v7802_v55, %v3779_v38  ;;  %v4801_v58 = vclamps-f32 %v3923_v31, 100.0  ;;  %v7816_v31 = vld [vmem:[#allocation37_spill] sm:$0xff] }
 0x7eb   :  { %v3764_v49 = vpop.permute.xlu0 %3763  ;;  %v4157_v38 = vsel %vm193_vm2, %v7816_v31, %v7398_v62  ;;  %v7822_v62 = vld [vmem:[#allocation64_spill] sm:$0xff] }
 0x7ec   :  { %v4802_v63 = vclamps-f32 %v3924_v39, 100.0  ;;  %v3921_v46 = vmul.f32 %v3764_v49, %v7803_v43 }
 0x7ed   :  { %v3769_v22 = vpop.permute.xlu1 %3768 }
 0x7ee   :  { %v7423_v17 = vpack.c.bf16 %v4802_v63, %v4801_v58  ;;  %v3922_v45 = vmul.f32 %v3769_v22, %v7804_v34  ;;  %v4799_v26 = vclamps-f32 %v3921_v46, 100.0  ;;  %v7818_v63 = vld [vmem:[#allocation61_spill] sm:$0xff]  ;;  %v7819_v46 = vld [vmem:[#allocation62_spill] sm:$0xff]  ;;  %v7820_v34 = vld [vmem:[#allocation79_spill] sm:$0xff] }
 0x7f0   :  { %v4800_v27 = vclamps-f32 %v3922_v45, 100.0 }
 0x7f2   :  { %v7426_v24 = vpack.c.bf16 %v4800_v27, %v4799_v26  ;;  %v7821_v27 = vld [vmem:[#allocation71_spill] sm:$0xff] }
 0x7f7   :  { %v3814_v61 = vpop.permute.xlu0 %3813 }
 0x7f8   :  { %v3931_v37 = vmul.f32 %v3814_v61, %v7806_v23  ;;  %v4160_v61 = vsel %vm193_vm2, %v7821_v27, %v4091_v11 }
 0x7f9   :  { %v3819_v29 = vpop.permute.xlu1 %3818 }
 0x7fa   :  { %v3932_v59 = vmul.f32 %v3819_v29, %v7805_v41  ;;  %v4809_v4 = vclamps-f32 %v3931_v37, 100.0 }
 0x7fb   :  { %v3804_v9 = vpop.permute.xlu0 %3803 }
 0x7fc   :  { %v3929_v12 = vmul.f32 %v3804_v9, %v7807_v56  ;;  %v4810_v44 = vclamps-f32 %v3932_v59, 100.0  ;;  %v7823_v59 = vld [vmem:[#allocation78_spill] sm:$0xff] }
 0x7fd   :  { %v3809_v28 = vpop.permute.xlu1 %3808 }
 0x7fe   :  { %v3930_v25 = vmul.f32 %v3809_v28, %v7808_v60  ;;  %v4807_v50 = vclamps-f32 %v3929_v12, 100.0  ;;  %v4098_v32 = vpack.c.bf16 %v4810_v44, %v4809_v4  ;;  %v7824_v28 = vld [vmem:[#allocation50_spill] sm:$0xff] }
 0x7ff   :  { %v3834_v21 = vpop.permute.xlu0 %3833 }
 0x800   :  { %v4808_v18 = vclamps-f32 %v3930_v25, 100.0  ;;  %v3935_v1 = vmul.f32 %v3834_v21, %v7810_v15  ;;  %v4181_v19 = vsel %vm193_vm2, %v7815_v40, %v4098_v32  ;;  %v7825_v25 = vld [vmem:[#allocation70_spill] sm:$0xff]  ;;  %v7833_v40 = vld [vmem:[#allocation65_spill] sm:$0xff] }
 0x801   :  { %v3839_v57 = vpop.permute.xlu1 %3838  ;;  %v4163_v21 = vsel %vm193_vm2, %v7825_v25, %v7417_v36 }
 0x802   :  { %v4097_v54 = vpack.c.bf16 %v4808_v18, %v4807_v50  ;;  %v3936_v48 = vmul.f32 %v3839_v57, %v7809_v35  ;;  %v4813_v14 = vclamps-f32 %v3935_v1, 100.0  ;;  %v7826_v50 = vld [vmem:[#allocation52_spill] sm:$0xff] }
 0x803   :  { %v3824_v42 = vpop.permute.xlu0 %3823  ;;  %v7829_v1 = vld [vmem:[#allocation80_spill] sm:$0xff] }
 0x804   :  { %v3933_v47 = vmul.f32 %v3824_v42, %v7811_v52  ;;  %v4178_v7 = vsel %vm193_vm2, %v7812_v30, %v4097_v54  ;;  %v4814_v8 = vclamps-f32 %v3936_v48, 100.0  ;;  %v7827_v54 = vld [vmem:[#allocation81_spill] sm:$0xff]  ;;  %v7830_v52 = vld [vmem:[#allocation72_spill] sm:$0xff] }
 0x805   :  { %5036 = vmatprep.subr.bf16.mxu1 %v4178_v7  ;;  %v3829_v2 = vpop.permute.xlu1 %3828  ;;  %v7828_v48 = vld [vmem:[#allocation73_spill] sm:$0xff]  ;;  %v7831_v7 = vld [vmem:[#allocation66_spill] sm:$0xff] }
 0x806   :  { %v3934_v20 = vmul.f32 %v3829_v2, %v7814_v51  ;;  %5037 = vmatpush3.bf16.msra.mxu1 %v4154_v10  ;;  %v4811_v53 = vclamps-f32 %v3933_v47, 100.0  ;;  %v4100_v55 = vpack.c.bf16 %v4814_v8, %v4813_v14  ;;  %v4166_v42 = vsel %vm193_vm2, %v7828_v48, %v7426_v24  ;;  %v7832_v10 = vld [vmem:[#allocation68_spill] sm:$0xff] }
 0x807   :  { %v3854_v3 = vpop.permute.xlu0 %3853  ;;  %5038 = vmatprep.subr.bf16.mxu1 %v4181_v19  ;;  %v4169_v47 = vsel %vm193_vm2, %v7830_v52, %v7423_v17  ;;  %v7835_v17 = vld [vmem:[#allocation49_spill] sm:$0xff] }
 0x808   :  { %v4812_v5 = vclamps-f32 %v3934_v20, 100.0  ;;  %v3939_v43 = vmul.f32 %v3854_v3, %v7818_v63  ;;  %v4187_v9 = vsel %vm193_vm2, %v7823_v59, %v4100_v55  ;;  %v7842_v59 = vmov 0.0|0.0   ;;  %v4309_v52 = vld [vmem:[%s7568_s13 + $0x18] sm:$0xff] }
 0x809   :  { %v3859_v33 = vpop.permute.xlu1 %3858 }
 0x80a   :  { %v4099_v39 = vpack.c.bf16 %v4812_v5, %v4811_v53  ;;  %v3940_v49 = vmul.f32 %v3859_v33, %v7817_v16  ;;  %5039 = vmatpush3.bf16.msra.mxu1 %v4157_v38  ;;  %v4817_v37 = vclamps-f32 %v3939_v43, 100.0  ;;  %v7834_v53 = vld [vmem:[#allocation67_spill] sm:$0xff] }
 0x80b   :  { %v3844_v58 = vpop.permute.xlu0 %3843 }
 0x80c   :  { %v3937_v22 = vmul.f32 %v3844_v58, %v7819_v46  ;;  %v4184_v45 = vsel %vm193_vm2, %v7820_v34, %v4099_v39  ;;  %v4818_v29 = vclamps-f32 %v3940_v49, 100.0  ;;  %v7836_v39 = vld [vmem:[#allocation83_spill] sm:$0xff] }
 0x80d   :  { %v3849_v26 = vpop.permute.xlu1 %3848  ;;  %5040 = vmatprep.subr.bf16.mxu1 %v4184_v45  ;;  %v7837_v58 = vld [vmem:[#allocation75_spill] sm:$0xff] }
 0x80e   :  { %v3938_v41 = vmul.f32 %v3849_v26, %v7822_v62  ;;  %5041 = vmatpush3.bf16.msra.mxu1 %v4160_v61  ;;  %v4815_v56 = vclamps-f32 %v3937_v22, 100.0  ;;  %v4102_v11 = vpack.c.bf16 %v4818_v29, %v4817_v37  ;;  %v7838_v46 = vld [vmem:[#allocation51_spill] sm:$0xff]  ;;  %v7839_v26 = vld [vmem:[#allocation82_spill] sm:$0xff] }
 0x80f   :  { %v3784_v23 = vpop.permute.xlu0 %3783  ;;  %5042 = vmatprep.subr.bf16.mxu1 %v4187_v9  ;;  %v7840_v29 = vld [vmem:[#allocation74_spill] sm:$0xff]  ;;  %v7843_v9 = vmov 0.0   ;;  %v4311_v37 = vld [vmem:[#allocation18 + $0x8] sm:$0xff] }
 0x810   :  { %v4816_v12 = vclamps-f32 %v3938_v41, 100.0  ;;  %v3925_v44 = vmul.f32 %v3784_v23, %v7824_v28  ;;  %v4193_v36 = vsel %vm193_vm2, %v7829_v1, %v4102_v11  ;;  %180 = vst.msk [vmem:[#allocation2] sm:$0xff] %vm179_vm4, %v7843_v9  ;;  %v4310_v23 = vld [vmem:[#allocation18] sm:$0xff]  ;;  %v4313_v28 = vld [vmem:[#allocation18 + $0x18] sm:$0xff] }
 0x811   :  { %v3789_v60 = vpop.permute.xlu1 %3788 }
 0x812   :  { %v4101_v4 = vpack.c.bf16 %v4816_v12, %v4815_v56  ;;  %v3926_v18 = vmul.f32 %v3789_v60, %v7826_v50  ;;  %5043 = vmatpush3.bf16.msra.mxu1 %v4163_v21  ;;  %v4803_v57 = vclamps-f32 %v3925_v44, 100.0  ;;  %v5477_v56 = vpack.c.bf16 %v4311_v37, %v4310_v23  ;;  %v4312_v12 = vld [vmem:[#allocation18 + $0x10] sm:$0xff] }
 0x813   :  { %v5480_v13 = vpack.c.bf16 %v4313_v28, %v4312_v12 }
 0x814   :  { %v4804_v32 = vclamps-f32 %v3926_v18, 100.0  ;;  %v4190_v35 = vsel %vm193_vm2, %v7827_v54, %v4101_v4 }
 0x815   :  { %5044 = vmatprep.subr.bf16.mxu1 %v4190_v35 }
 0x816   :  { %v4095_v15 = vpack.c.bf16 %v4804_v32, %v4803_v57  ;;  %5045 = vmatpush3.bf16.msra.mxu1 %v4166_v42  ;;  %v4306_v42 = vld [vmem:[%s7568_s13] sm:$0xff] }
 0x817   :  { %5046 = vmatprep.subr.bf16.mxu1 %v4193_v36  ;;  %v4201_v32 = vld [vmem:[#allocation2] sm:$0xff]  ;;  %v4308_v36 = vld [vmem:[%s7568_s13 + $0x10] sm:$0xff] }
 0x818   :  { %v4172_v63 = vsel %vm193_vm2, %v7837_v58, %v4095_v15  ;;  %v4307_v15 = vld [vmem:[%s7568_s13 + $0x8] sm:$0xff] }
 0x819   :  { %v5483_v1 = vpack.c.bf16 %v4307_v15, %v4306_v42 }
 0x81a   :  { %5047 = vmatpush3.bf16.msra.mxu1 %v4169_v47  ;;  %v3864_v30 = vpop.permute.xlu0 %3863 }
 0x81b   :  { %v3941_v2 = vmul.f32 %v3864_v30, %v7831_v7 }
 0x81c   :  { %v3869_v6 = vpop.permute.xlu1 %3868 }
 0x81d   :  { %v3942_v8 = vmul.f32 %v3869_v6, %v7832_v10  ;;  %v4819_v20 = vclamps-f32 %v3941_v2, 100.0  ;;  %v5486_v2 = vpack.c.bf16 %v4309_v52, %v4308_v36  ;;  %v4288_v6 = vld [vmem:[#allocation9] sm:$0xff]  ;;  %v4469_v10 = vld [vmem:[%s7571_s16] sm:$0xff] }
 0x81e   :  { %v3874_v51 = vpop.permute.xlu0 %3873 }
 0x81f   :  { %v4820_v24 = vclamps-f32 %v3942_v8, 100.0  ;;  %v3943_v19 = vmul.f32 %v3874_v51, %v7833_v40  ;;  %v4470_v8 = vld [vmem:[%s7571_s16 + $0x8] sm:$0xff] }
 0x820   :  { %v3879_v3 = vpop.permute.xlu1 %3878  ;;  %v5489_v51 = vpack.c.bf16 %v4470_v8, %v4469_v10 }
 0x821   :  { %v4103_v14 = vpack.c.bf16 %v4820_v24, %v4819_v20  ;;  %v3944_v5 = vmul.f32 %v3879_v3, %v7834_v53  ;;  %v4821_v31 = vclamps-f32 %v3943_v19, 100.0  ;;  %v4471_v20 = vld [vmem:[%s7571_s16 + $0x10] sm:$0xff]  ;;  %v4472_v24 = vld [vmem:[%s7571_s16 + $0x18] sm:$0xff]  ;;  %v4299_v19 = vld [vmem:[%s7689_s24] sm:$0xff] }
 0x822   :  { %v3794_v33 = vpop.permute.xlu0 %3793  ;;  %v5492_v40 = vpack.c.bf16 %v4472_v24, %v4471_v20 }
 0x823   :  { %v4822_v38 = vclamps-f32 %v3944_v5, 100.0  ;;  %v3927_v55 = vmul.f32 %v7835_v17, %v3794_v33  ;;  %v4196_v16 = vsel %vm193_vm2, %v7836_v39, %v4103_v14 }
 0x824   :  { %5048 = vmatprep.subr.bf16.mxu1 %v4196_v16  ;;  %v3799_v49 = vpop.permute.xlu1 %3798 }
 0x825   :  { %v4104_v43 = vpack.c.bf16 %v4822_v38, %v4821_v31  ;;  %v3928_v22 = vmul.f32 %v7838_v46, %v3799_v49  ;;  %5049 = vmatpush3.bf16.msra.mxu1 %v4172_v63  ;;  %v4805_v34 = vclamps-f32 %v3927_v55, 100.0  ;;  %v4833_v31 = vld [vmem:[#allocation20] ss:$0 sm:$0xff]  ;;  %v4835_v49 = vld [vmem:[%s7572_s17] ss:$0 sm:$0xff] }
 0x826   :  { %v4295_v50 = vpop.permute.xlu0 %4294 }
 0x827   :  { %v4806_v45 = vclamps-f32 %v3928_v22, 100.0  ;;  %v4199_v27 = vsel %vm193_vm2, %v7839_v26, %v4104_v43  ;;  %5597 = vrcp.f32 %v4295_v50 }
 0x828   :  { %5050 = vmatprep.subr.bf16.mxu1 %v4199_v27 }
 0x829   :  { %v4096_v61 = vpack.c.bf16 %v4806_v45, %v4805_v34 }
 0x82b   :  { %v4175_v62 = vsel %vm193_vm2, %v7840_v29, %v4096_v61 }
 0x82c   :  { %5051 = vmatpush3.bf16.msra.mxu1 %v4175_v62 }
 0x82d   :  { %5476 = vmatprep.subr.bf16.mxu1 %v7842_v59 }
 0x82f   :  { %4830 = vmatmul.mubr.msk.bf16.vlgmr.msra.gmra.mrb[152].mxu1 %vm4829_vm3, %v7798_v0 }
 0x830   :  { %5439 = vmatprep.mubr.msk.f32.mxu1 %vm5845_vm0, %v7843_v9  ;;  %5478 = vmatpush3.bf16.msra.mxu1 %v5477_v56 }
 0x831   :  { %5479 = vmatprep.subr.bf16.mxu1 %v7842_v59  ;;  %v5598_v47 = vpop.eup %5597 }
 0x834   :  { %5481 = vmatpush3.bf16.msra.mxu1 %v5480_v13 }
 0x835   :  { %5482 = vmatprep.subr.bf16.mxu1 %v7842_v59 }
 0x8b5   :  { %v5030_v0 = vpop.f32.mrb[148].mxu1 }
 0x8b6   :  { %v5031_v44 = vpop.f32.mrb[149].mxu1 }
 0x8b7   :  { %v5032_v60 = vadd.f32 %v5031_v44, %v5030_v0  ;;  %v5033_v25 = vpop.f32.mrb[150].mxu1 }
 0x8b8   :  { %v5034_v21 = vpop.f32.mrb[151].mxu1 }
 0x902   :  { %v5052_v11 = vpop.f32.mrb[152].mxu1 }
 0x903   :  { %v5053_v4 = vpop.f32.mrb[153].mxu1 }
 0x904   :  { %v5054_v18 = vadd.f32 %v5053_v4, %v5052_v11  ;;  %v5055_v57 = vpop.f32.mrb[154].mxu1 }
 0x905   :  { %v5056_v54 = vpop.f32.mrb[155].mxu1 }
 0x906   :  { %v4277_v35 = vadd.f32 %v5054_v18, %v5032_v60 }
 0x908   :  { %v4282_v48 = vadd.f32 %v4277_v35, %v4201_v32 }
 0x90a   :  { %4284 = vst.msk [vmem:[#allocation2] sm:$0xff] %vm179_vm4, %v4282_v48 }
 0x911   :  { %v4289_v30 = vld [vmem:[#allocation2] sm:$0xff] }
 0x912   :  { %v4298_v7 = vmul.f32 %v5598_v47, %v4289_v30  ;;  %5440 = vmatmul.mubr.msk.f32.vlgmr.msra.gmra.mrb[2].mxu1 %vm193_vm2, %v4289_v30 }
 0x913   :  { %5484 = vmatpush3.bf16.msra.mxu1 %v5483_v1  ;;  %5450 = vmatprep.mubr.msk.f32.mxu1 %vm5845_vm0, %v7843_v9 }
 0x914   :  { %4301 = vrot.lane.b32.xlu1 %v4298_v7, %s5848_s23  ;;  %5485 = vmatprep.subr.bf16.mxu1 %v7842_v59 }
 0x917   :  { %5487 = vmatpush3.bf16.msra.mxu1 %v5486_v2 }
 0x918   :  { %5488 = vmatprep.subr.bf16.mxu1 %v7842_v59 }
 0x91a   :  { %5451 = vmatmul.mubr.msk.f32.vlgmr.msra.gmra.mrb[156].mxu1 %vm193_vm2, %v4288_v6 }
 0x91b   :  { %5461 = vmatprep.mubr.msk.f32.mxu1 %vm5845_vm0, %v7843_v9  ;;  %5490 = vmatpush3.bf16.msra.mxu1 %v5489_v51 }
 0x91c   :  { %5491 = vmatprep.subr.bf16.mxu1 %v7842_v59 }
 0x91f   :  { %5493 = vmatpush3.bf16.msra.mxu1 %v5492_v40 }
 0x986   :  { %v4302_v3 = vpop.permute.xlu1 %4301 }
 0x987   :  { %v4304_v14 = vadd.f32 %v4302_v3, %v4299_v19 }
 0x989   :  { %4305 = vst.msk [vmem:[%s7574_s19] sm:$0xff] %vm1656_vm13, %v4304_v14  ;;  %s5797_s19 = scalar_lea.vmem %s4563_s12, 128 }
 0x98a   :  { %p5798_p2 = scmp.ne.s32.totalorder %s4563_s12, %s5797_s19  ;;  %p5803_p4 = scmp.lt.s32.totalorder %s5797_s19, %s5797_s19 }
 0x98c   :  { %p5804_p5 = por %p5803_p4, %p5802_p3 }
 0x98e   :  { %p5805_p6 = pnand %p5804_p5, %p5798_p2 }
 0x9e5   :  { %v4383_v53 = vpop.f32.mrb[2].mxu1 }
 0x9e6   :  { %v5441_v5 = vpop.f32.mrb[3].mxu1 }
 0x9ed   :  { %v4456_v33 = vpop.f32.mrb[156].mxu1 }
 0x9ee   :  { %v4457_v38 = vadd.f32 %v4456_v33, %v4383_v53  ;;  %v5452_v17 = vpop.f32.mrb[157].mxu1 }
 0x9f0   :  { %v4467_v55 = vadd.f32 %v4833_v31, %v4457_v38 }
 0x9f2   :  { %v4468_v39 = vmax.f32 %v4467_v55, 0.0 }
 0x9f4   :  { %5462 = vmatmul.mubr.msk.f32.vlgmr.msra.gmra.mrb[158].mxu1 %vm193_vm2, %v4468_v39 }
 0xac7   :  { %v4542_v16 = vpop.f32.mrb[158].mxu1 }
 0xac8   :  { %v4546_v58 = vadd.f32 %v4542_v16, %v4288_v6  ;;  %v5463_v63 = vpop.f32.mrb[159].mxu1 }
 0xaca   :  { %v4554_v43 = vadd.f32 %v4835_v49, %v4546_v58 }
 0xacc   :  { %4555 = vst.msk [vmem:[#allocation21] sm:$0xff] %vm193_vm2, %v4554_v43 }
 0xacd   :  { %5808 = shalt.err (!%p5805_p6)
}
 0xace   :  { %s5809_s14 = scalar_lea.hbm %s7573_s18, 128 }
 0xacf   :  { %p5810_p7 = scmp.ne.s32.totalorder %s7573_s18, %s5809_s14  ;;  %p5813_p8 = scmp.lt.u32.totalorder %s5809_s14, %s7573_s18 }
 0xad1   :  { %p5815_p9 = pnand %p5813_p8, %p5810_p7 }
 0xad3   :  { %5818 = shalt.err (!%p5815_p9)
}
 0xad4   :  { %4565 = dma.vmem_to_hbm [thread:$0]  %s4563_s12, 128, %s7573_s18, [#allocation8]  }
 0xad5   :  { %5829 = dma.done.wait [#allocation8], 128  }
 0xad6   :  { %5830 = vsyncadd [#allocation8], 4294967168 }
 0xad7   :  { %4573 = vsyncpa [#allocation7], 1 }
 0xad8   :  { %4574 = vsyncpa [#allocation10], 1 }
 0xad9   :  { %4575 = vsyncpa [#allocation13], 1 }
 0xada   :  { %4576 = vsyncpa [#allocation16], 1 }
 0xadb   :  { %4577 = vsyncpa [#allocation19], 1 }
 0xadc   :  { %4578 = vsyncpa [#allocation8], 1 }

</bundles_post_ra>
